<compile_context>
chip_gen: v7x
topology: tpu7x:2x2x1
jax: 0.10.0
libtpu: 0.0.40
codegen_flags: <defaults>
</compile_context>

<pallas_src>
import math

import jax
import jax.numpy as jnp
import numpy as np
from jax import lax
from jax.experimental import pallas as pl
from jax.experimental.pallas import tpu as pltpu


def _round_up(x, m):
    return ((x + m - 1) // m) * m


# ---------------------------------------------------------------------------
# Fused Pallas kernel (all LSTM layers + FC head)
# ---------------------------------------------------------------------------
def _make_fused_lstm_kernel(n_layers, T, Tc, B_blk, dims_in, Hp, use_bf16,
                            classification):
    """Kernel signature:
        kernel(x, (wih, whh, bias) * n_layers, fc_w, fc_b, out, seq_sc, gx_sc)

      x      : (T, B_blk, Din0)   time-major input block
      wih    : (Din_l, 4*Hp)      input->hidden weight (transposed, gate order ifgo,
                                  gate-blocked / zero-padded to Hp lanes per gate)
      whh    : (Hp, 4*Hp)         hidden->hidden weight (transposed, padded)
      bias   : (1, 4*Hp)          b_ih + b_hh (padded)
      fc_w   : (1, Hp), fc_b: (1, 1)
      out    : (B_blk, 1)
      seq_sc : (T, B_blk, Hp)     inter-layer activation sequence (VMEM)
      gx_sc  : (Tc, B_blk, 4*Hp)  per-chunk hoisted input-projection gates
    """
    n_chunks = T // Tc
    mm_dtype = jnp.bfloat16 if use_bf16 else jnp.float32
    H4 = 4 * Hp

    def sigmoid(x):
        # One EUP op (tanh) instead of exp + reciprocal.
        return 0.5 * jnp.tanh(0.5 * x) + 0.5

    def kernel(*refs):
        x_ref = refs[0]
        fcw_ref = refs[1 + 3 * n_layers]
        fcb_ref = refs[2 + 3 * n_layers]
        out_ref = refs[3 + 3 * n_layers]
        seq_sc, gx_sc = refs[4 + 3 * n_layers:]

        h = jnp.zeros((B_blk, Hp), jnp.float32)

        for l in range(n_layers):
            wih_ref = refs[1 + 3 * l]
            whh_ref = refs[2 + 3 * l]
            b_ref = refs[3 + 3 * l]
            din = dims_in[l]

            # Load weights once per layer; loop-invariant across timesteps.
            # TODO(synk): for small B, hold W_hh in MXU weight registers across
            # the time loop via pltpu.matmul_push_rhs / matmul_acc_lhs.
            wih = wih_ref[...].astype(mm_dtype)
            whh = whh_ref[...].astype(mm_dtype)
            bias = b_ref[...]

            h = jnp.zeros((B_blk, Hp), jnp.float32)
            c = jnp.zeros((B_blk, Hp), jnp.float32)
            write_seq = l < n_layers - 1        # last layer only needs h_final

            # Time-chunked cuDNN-style hoisting: the big input projection is
            # done once per chunk, bounding gx_sc to (Tc, B_blk, 4*Hp).
            for ck in range(n_chunks):
                base = ck * Tc
                if l == 0:
                    xin = x_ref[pl.ds(base, Tc)]          # (Tc, B_blk, Din0)
                else:
                    xin = seq_sc[pl.ds(base, Tc)]         # (Tc, B_blk, Hp)
                xin2d = xin.reshape(Tc * B_blk, din).astype(mm_dtype)
                gx_sc[...] = (jnp.dot(xin2d, wih,
                                      preferred_element_type=jnp.float32)
                              + bias).reshape(Tc, B_blk, H4)

                def step(t, carry, base=base, write_seq=write_seq):
                    h, c = carry
                    # Serial path: only h @ W_hh + precomputed gates_x[t].
                    gates = gx_sc[t] + jnp.dot(h.astype(mm_dtype), whh,
                                               preferred_element_type=jnp.float32)
                    # Lane-aligned gate blocks (each slice = whole 128-lane blocks).
                    i_g = sigmoid(gates[:, 0 * Hp:1 * Hp])
                    f_g = sigmoid(gates[:, 1 * Hp:2 * Hp])
                    g_g = jnp.tanh(gates[:, 2 * Hp:3 * Hp])
                    o_g = sigmoid(gates[:, 3 * Hp:4 * Hp])

                    c_new = f_g * c + i_g * g_g
                    h_new = o_g * jnp.tanh(c_new)
                    if write_seq:
                        seq_sc[base + t] = h_new.astype(seq_sc.dtype)
                    return (h_new, c_new)

                # h/c stay in vregs across the whole recurrence (loop carry).
                h, c = lax.fori_loop(0, Tc, step, (h, c), unroll=min(Tc, 8))

        # Fused FC head: (B, Hp) row-reduction instead of an N=1 MXU matmul.
        res = jnp.sum(h * fcw_ref[...], axis=-1, keepdims=True) + fcb_ref[...]
        if classification:
            res = sigmoid(res)
        out_ref[...] = res

    return kernel


# ---------------------------------------------------------------------------
# Wrapper
# ---------------------------------------------------------------------------
def _pad_gate_cols(w_t, H, Hp):
    """(rows, 4H) gate-blocked [i f g o] -> (rows, 4Hp), zero-padding each gate."""
    if H == Hp:
        return w_t
    rows = w_t.shape[0]
    out = jnp.zeros((rows, 4 * Hp), w_t.dtype)
    for g in range(4):
        out = out.at[:, g * Hp:g * Hp + H].set(w_t[:, g * H:(g + 1) * H])
    return out


def _pad_rows(w, Hp):
    rows = w.shape[0]
    if rows == Hp:
        return w
    return jnp.concatenate([w, jnp.zeros((Hp - rows, w.shape[1]), w.dtype)], 0)


def simple_lstm_forward(x_btd, params, *, t_chunk=None, use_bf16=False,
                        task="regression"):
    """Full SimpleLSTM forward.  x_btd: (B, T, input_dim).  Returns (B, 1)."""
    B, T, Din = x_btd.shape
    layers = params["lstm"]
    L = len(layers)
    H = layers[0]["w_hh_t"].shape[0]

    Hp = _round_up(H, 128)               # lane-aligned gates
    Bp = _round_up(B, 8)                 # full-sublane batch
    Tc = t_chunk if t_chunk is not None else min(T, 8)
    assert T % Tc == 0, "t_chunk must divide T"

    # Time-major, batch-padded input.
    x_tbd = jnp.transpose(x_btd, (1, 0, 2)).astype(jnp.float32)
    if Bp != B:
        x_tbd = jnp.pad(x_tbd, ((0, 0), (0, Bp - B), (0, 0)))

    dims_in = [Din] + [Hp] * (L - 1)

    # TODO(synk): inter-layer dropout is training-only -> inference semantics here.
    inputs = [x_tbd]
    for l, layer in enumerate(layers):
        w_ih_t = _pad_gate_cols(layer["w_ih_t"], H, Hp)
        if l > 0:
            w_ih_t = _pad_rows(w_ih_t, Hp)
        w_hh_t = _pad_rows(_pad_gate_cols(layer["w_hh_t"], H, Hp), Hp)
        bias = _pad_gate_cols(layer["bias"].reshape(1, 4 * H), H, Hp)
        inputs += [w_ih_t, w_hh_t, bias]
    fc_w = jnp.zeros((1, Hp), jnp.float32).at[:, :H].set(
        params["fc_w_t"].reshape(1, H))
    inputs += [fc_w, params["fc_b"].reshape(1, 1).astype(jnp.float32)]

    # Batch-parallel grid axis (megacore on v7x); single block at small Bp.
    B_blk = Bp // 2 if (Bp >= 16 and Bp % 16 == 0) else Bp
    n_bblk = Bp // B_blk

    kernel = _make_fused_lstm_kernel(L, T, Tc, B_blk, dims_in, Hp, use_bf16,
                                     task == "classification")

    def _rep_spec(shape):
        nd = len(shape)
        return pl.BlockSpec(shape, lambda i, nd=nd: (0,) * nd)

    in_specs = [pl.BlockSpec((T, B_blk, Din), lambda i: (0, i, 0))]
    in_specs += [_rep_spec(a.shape) for a in inputs[1:]]

    flops = (2 * T * Bp * sum(d * 4 * Hp for d in dims_in)
             + 2 * T * Bp * Hp * 4 * Hp * L)
    bytes_accessed = sum(int(a.size) * a.dtype.itemsize for a in inputs) + Bp * 4

    out = pl.pallas_call(
        kernel,
        out_shape=jax.ShapeDtypeStruct((Bp, 1), jnp.float32),
        grid=(n_bblk,),
        in_specs=in_specs,
        out_specs=pl.BlockSpec((B_blk, 1), lambda i: (i, 0)),
        scratch_shapes=[
            pltpu.VMEM((T, B_blk, Hp), jnp.float32),        # inter-layer sequence
            pltpu.VMEM((Tc, B_blk, 4 * Hp), jnp.float32),   # chunked gate projections
        ],
        compiler_params=pltpu.CompilerParams(
            dimension_semantics=("parallel",),
            # Re-derive per chip for large H/T/B (v7x has 64 MiB physical VMEM).
            vmem_limit_bytes=32 * 1024 * 1024,
        ),
        cost_estimate=pl.CostEstimate(
            flops=flops,
            transcendentals=5 * T * Bp * Hp * L,
            bytes_accessed=bytes_accessed,
        ),
    )(*inputs)
    return out[:B]


# ---------------------------------------------------------------------------
# Deterministic parameter init (matches nn.LSTM / nn.Linear shapes)
# ---------------------------------------------------------------------------
def init_params(key, input_dim, hidden_dim, n_layers):
    stdv = 1.0 / math.sqrt(hidden_dim)
    layers = []
    for l in range(n_layers):
        din = input_dim if l == 0 else hidden_dim
        key, k1, k2, k3, k4 = jax.random.split(key, 5)
        w_ih = jax.random.uniform(k1, (4 * hidden_dim, din), jnp.float32, -stdv, stdv)
        w_hh = jax.random.uniform(k2, (4 * hidden_dim, hidden_dim), jnp.float32, -stdv, stdv)
        b_ih = jax.random.uniform(k3, (4 * hidden_dim,), jnp.float32, -stdv, stdv)
        b_hh = jax.random.uniform(k4, (4 * hidden_dim,), jnp.float32, -stdv, stdv)
        layers.append({
            "w_ih_t": w_ih.T,                        # (din, 4H)
            "w_hh_t": w_hh.T,                        # (H, 4H)
            "bias": b_ih + b_hh,                     # (4H,)
        })
    key, k5, k6 = jax.random.split(key, 3)
    fc_std = 1.0 / math.sqrt(hidden_dim)
    fc_w = jax.random.uniform(k5, (1, hidden_dim), jnp.float32, -fc_std, fc_std)
    fc_b = jax.random.uniform(k6, (1,), jnp.float32, -fc_std, fc_std)
    return {"lstm": layers, "fc_w_t": fc_w.T, "fc_b": fc_b}


# ---------------------------------------------------------------------------
# Pure-JAX reference (mirrors PyTorch nn.LSTM gate equations) for validation
# ---------------------------------------------------------------------------
def reference_forward(x_btd, params):
    x = jnp.transpose(x_btd, (1, 0, 2))              # (T, B, Din)
    B = x.shape[1]
    h_final = None
    for layer in params["lstm"]:
        H = layer["w_hh_t"].shape[0]

        def step(carry, x_t, layer=layer, H=H):
            h, c = carry
            gates = x_t @ layer["w_ih_t"] + h @ layer["w_hh_t"] + layer["bias"]
            i = jax.nn.sigmoid(gates[:, 0 * H:1 * H])
            f = jax.nn.sigmoid(gates[:, 1 * H:2 * H])
            g = jnp.tanh(gates[:, 2 * H:3 * H])
            o = jax.nn.sigmoid(gates[:, 3 * H:4 * H])
            c = f * c + i * g
            h = o * jnp.tanh(c)
            return (h, c), h

        init = (jnp.zeros((B, H), jnp.float32), jnp.zeros((B, H), jnp.float32))
        (h_final, _), ys = lax.scan(step, init, x)
        x = ys
    return h_final @ params["fc_w_t"] + params["fc_b"].reshape(1, 1)


if __name__ == "__main__":
    B, T, INPUT_DIM, HIDDEN_DIM, N_LAYERS = 2, 8, 8, 32, 2

    key = jax.random.PRNGKey(0)
    key, xk, pk = jax.random.split(key, 3)
    x = jax.random.normal(xk, (B, T, INPUT_DIM), jnp.float32)
    params = init_params(pk, INPUT_DIM, HIDDEN_DIM, N_LAYERS)

    ref = np.asarray(reference_forward(x, params))

    # f32 MXU path (exact vs. the f32 reference); t_chunk=4 exercises chunking.
    out = simple_lstm_forward(x, params, t_chunk=4, use_bf16=False)
    out = jax.block_until_ready(out)
    np.testing.assert_allclose(np.asarray(out), ref, rtol=1e-5, atol=1e-5)
    assert out.shape == (B, 1)

    # bf16 MXU-operand path (v6e/v7x fast path); looser tolerance.
    out_bf16 = simple_lstm_forward(x, params, t_chunk=4, use_bf16=True)
    out_bf16 = jax.block_until_ready(out_bf16)
    np.testing.assert_allclose(np.asarray(out_bf16), ref, rtol=5e-2, atol=5e-2)

    print("KERNEL_OK")
</pallas_src>

<mosaic_0001>
module attributes {stable_mosaic.version = 11 : i64} {
  func.func @kernel(%arg0: i32, %arg1: memref<8x8x8xf32, #tpu.memory_space<vmem>>, %arg2: memref<8x512xf32, #tpu.memory_space<vmem>>, %arg3: memref<128x512xf32, #tpu.memory_space<vmem>>, %arg4: memref<1x512xf32, #tpu.memory_space<vmem>>, %arg5: memref<128x512xf32, #tpu.memory_space<vmem>>, %arg6: memref<128x512xf32, #tpu.memory_space<vmem>>, %arg7: memref<1x512xf32, #tpu.memory_space<vmem>>, %arg8: memref<1x128xf32, #tpu.memory_space<vmem>>, %arg9: memref<1x1xf32, #tpu.memory_space<vmem>>, %arg10: memref<8x1xf32, #tpu.memory_space<vmem>>, %arg11: memref<8x8x128xf32, #tpu.memory_space<vmem>>, %arg12: memref<4x8x512xf32, #tpu.memory_space<vmem>>) attributes {dimension_semantics = [#tpu.dimension_semantics<parallel>], iteration_bounds = array<i64: 1>, scalar_prefetch = 0 : i64, scratch_operands = 2 : i64, tpu.core_type = #tpu.core_type<tc>, window_params = [{transform_indices = @transform_0, window_bounds = array<i64: 8, 8, 8>}, {pipeline_mode = #tpu.pipeline_mode<synchronous>, transform_indices = @transform_1, window_bounds = array<i64: 8, 512>}, {pipeline_mode = #tpu.pipeline_mode<synchronous>, transform_indices = @transform_2, window_bounds = array<i64: 128, 512>}, {pipeline_mode = #tpu.pipeline_mode<synchronous>, transform_indices = @transform_3, window_bounds = array<i64: 1, 512>}, {pipeline_mode = #tpu.pipeline_mode<synchronous>, transform_indices = @transform_4, window_bounds = array<i64: 128, 512>}, {pipeline_mode = #tpu.pipeline_mode<synchronous>, transform_indices = @transform_5, window_bounds = array<i64: 128, 512>}, {pipeline_mode = #tpu.pipeline_mode<synchronous>, transform_indices = @transform_6, window_bounds = array<i64: 1, 512>}, {pipeline_mode = #tpu.pipeline_mode<synchronous>, transform_indices = @transform_7, window_bounds = array<i64: 1, 128>}, {pipeline_mode = #tpu.pipeline_mode<synchronous>, transform_indices = @transform_8, window_bounds = array<i64: 1, 1>}, {transform_indices = @transform_9, window_bounds = array<i64: 8, 1>}]} {
    %c0 = arith.constant 0 : index
    %c0_0 = arith.constant 0 : index
    %0 = vector.load %arg2[%c0, %c0_0] : memref<8x512xf32, #tpu.memory_space<vmem>>, vector<8x512xf32>
    %c0_1 = arith.constant 0 : index
    %c0_2 = arith.constant 0 : index
    %1 = vector.load %arg3[%c0_1, %c0_2] : memref<128x512xf32, #tpu.memory_space<vmem>>, vector<128x512xf32>
    %c0_3 = arith.constant 0 : index
    %c0_4 = arith.constant 0 : index
    %2 = vector.load %arg4[%c0_3, %c0_4] : memref<1x512xf32, #tpu.memory_space<vmem>>, vector<1x512xf32>
    %cst = arith.constant 0.000000e+00 : f32
    %3 = vector.broadcast %cst : f32 to vector<8x128xf32>
    %cst_5 = arith.constant 0.000000e+00 : f32
    %4 = vector.broadcast %cst_5 : f32 to vector<8x128xf32>
    %c0_6 = arith.constant 0 : index
    %c0_7 = arith.constant 0 : index
    %c0_8 = arith.constant 0 : index
    %5 = vector.load %arg1[%c0_6, %c0_7, %c0_8] : memref<8x8x8xf32, #tpu.memory_space<vmem>>, vector<4x8x8xf32>
    %6 = vector.shape_cast %5 : vector<4x8x8xf32> to vector<32x8xf32>
    %cst_9 = arith.constant dense<0.000000e+00> : vector<32x512xf32>
    %7 = tpu.matmul %6, %0, %cst_9 {dimension_numbers = #tpu.dot_dimension_numbers<[1], [0], [0], [1], [0, 0, 1, 1], [], []>} : vector<32x8xf32>, vector<8x512xf32>, vector<32x512xf32> -> vector<32x512xf32>
    %8 = vector.broadcast %2 : vector<1x512xf32> to vector<32x512xf32>
    %9 = arith.addf %7, %8 : vector<32x512xf32>
    %10 = vector.shape_cast %9 : vector<32x512xf32> to vector<4x8x512xf32>
    %c0_10 = arith.constant 0 : index
    %c0_11 = arith.constant 0 : index
    %c0_12 = arith.constant 0 : index
    %11 = vector.load %arg12[%c0_10, %c0_11, %c0_12] : memref<4x8x512xf32, #tpu.memory_space<vmem>>, vector<4x8x512xf32>
    tpu.vector_store %arg12[%c0_10, %c0_11, %c0_12], %10 {strides = array<i32>} : memref<4x8x512xf32, #tpu.memory_space<vmem>>, vector<4x8x512xf32>,
    %c0_i32 = arith.constant 0 : i32
    %12 = arith.index_cast %c0_i32 : i32 to index
    %c0_13 = arith.constant 0 : index
    %c0_14 = arith.constant 0 : index
    %13 = vector.load %arg12[%12, %c0_13, %c0_14] : memref<4x8x512xf32, #tpu.memory_space<vmem>>, vector<1x8x512xf32>
    %14 = vector.shape_cast %13 : vector<1x8x512xf32> to vector<8x512xf32>
    %cst_15 = arith.constant dense<0.000000e+00> : vector<8x512xf32>
    %15 = tpu.matmul %3, %1, %cst_15 {dimension_numbers = #tpu.dot_dimension_numbers<[1], [0], [0], [1], [0, 0, 1, 1], [], []>} : vector<8x128xf32>, vector<128x512xf32>, vector<8x512xf32> -> vector<8x512xf32>
    %16 = arith.addf %14, %15 : vector<8x512xf32>
    %17 = vector.extract_strided_slice %16 {offsets = [0, 0], sizes = [8, 128], strides = [1, 1]} : vector<8x512xf32> to vector<8x128xf32>
    %cst_16 = arith.constant 5.000000e-01 : f32
    %18 = vector.broadcast %cst_16 : f32 to vector<8x128xf32>
    %19 = arith.mulf %18, %17 : vector<8x128xf32>
    %20 = math.tanh %19 : vector<8x128xf32>
    %cst_17 = arith.constant 5.000000e-01 : f32
    %21 = vector.broadcast %cst_17 : f32 to vector<8x128xf32>
    %22 = arith.mulf %21, %20 : vector<8x128xf32>
    %cst_18 = arith.constant 5.000000e-01 : f32
    %23 = vector.broadcast %cst_18 : f32 to vector<8x128xf32>
    %24 = arith.addf %22, %23 : vector<8x128xf32>
    %25 = vector.extract_strided_slice %16 {offsets = [0, 128], sizes = [8, 128], strides = [1, 1]} : vector<8x512xf32> to vector<8x128xf32>
    %cst_19 = arith.constant 5.000000e-01 : f32
    %26 = vector.broadcast %cst_19 : f32 to vector<8x128xf32>
    %27 = arith.mulf %26, %25 : vector<8x128xf32>
    %28 = math.tanh %27 : vector<8x128xf32>
    %cst_20 = arith.constant 5.000000e-01 : f32
    %29 = vector.broadcast %cst_20 : f32 to vector<8x128xf32>
    %30 = arith.mulf %29, %28 : vector<8x128xf32>
    %cst_21 = arith.constant 5.000000e-01 : f32
    %31 = vector.broadcast %cst_21 : f32 to vector<8x128xf32>
    %32 = arith.addf %30, %31 : vector<8x128xf32>
    %33 = vector.extract_strided_slice %16 {offsets = [0, 256], sizes = [8, 128], strides = [1, 1]} : vector<8x512xf32> to vector<8x128xf32>
    %34 = math.tanh %33 : vector<8x128xf32>
    %35 = vector.extract_strided_slice %16 {offsets = [0, 384], sizes = [8, 128], strides = [1, 1]} : vector<8x512xf32> to vector<8x128xf32>
    %cst_22 = arith.constant 5.000000e-01 : f32
    %36 = vector.broadcast %cst_22 : f32 to vector<8x128xf32>
    %37 = arith.mulf %36, %35 : vector<8x128xf32>
    %38 = math.tanh %37 : vector<8x128xf32>
    %cst_23 = arith.constant 5.000000e-01 : f32
    %39 = vector.broadcast %cst_23 : f32 to vector<8x128xf32>
    %40 = arith.mulf %39, %38 : vector<8x128xf32>
    %cst_24 = arith.constant 5.000000e-01 : f32
    %41 = vector.broadcast %cst_24 : f32 to vector<8x128xf32>
    %42 = arith.addf %40, %41 : vector<8x128xf32>
    %43 = arith.mulf %32, %4 : vector<8x128xf32>
    %44 = arith.mulf %24, %34 : vector<8x128xf32>
    %45 = arith.addf %43, %44 : vector<8x128xf32>
    %46 = math.tanh %45 : vector<8x128xf32>
    %47 = arith.mulf %42, %46 : vector<8x128xf32>
    %c0_i32_25 = arith.constant 0 : i32
    %48 = arith.addi %c0_i32_25, %c0_i32 : i32
    %49 = arith.index_cast %48 : i32 to index
    %c0_26 = arith.constant 0 : index
    %c0_27 = arith.constant 0 : index
    %50 = vector.load %arg11[%49, %c0_26, %c0_27] : memref<8x8x128xf32, #tpu.memory_space<vmem>>, vector<1x8x128xf32>
    %51 = vector.shape_cast %50 : vector<1x8x128xf32> to vector<8x128xf32>
    %52 = vector.shape_cast %47 : vector<8x128xf32> to vector<1x8x128xf32>
    tpu.vector_store %arg11[%49, %c0_26, %c0_27], %52 {strides = array<i32>} : memref<8x8x128xf32, #tpu.memory_space<vmem>>, vector<1x8x128xf32>,
    %c1_i32 = arith.constant 1 : i32
    %53 = arith.index_cast %c1_i32 : i32 to index
    %c0_28 = arith.constant 0 : index
    %c0_29 = arith.constant 0 : index
    %54 = vector.load %arg12[%53, %c0_28, %c0_29] : memref<4x8x512xf32, #tpu.memory_space<vmem>>, vector<1x8x512xf32>
    %55 = vector.shape_cast %54 : vector<1x8x512xf32> to vector<8x512xf32>
    %cst_30 = arith.constant dense<0.000000e+00> : vector<8x512xf32>
    %56 = tpu.matmul %47, %1, %cst_30 {dimension_numbers = #tpu.dot_dimension_numbers<[1], [0], [0], [1], [0, 0, 1, 1], [], []>} : vector<8x128xf32>, vector<128x512xf32>, vector<8x512xf32> -> vector<8x512xf32>
    %57 = arith.addf %55, %56 : vector<8x512xf32>
    %58 = vector.extract_strided_slice %57 {offsets = [0, 0], sizes = [8, 128], strides = [1, 1]} : vector<8x512xf32> to vector<8x128xf32>
    %cst_31 = arith.constant 5.000000e-01 : f32
    %59 = vector.broadcast %cst_31 : f32 to vector<8x128xf32>
    %60 = arith.mulf %59, %58 : vector<8x128xf32>
    %61 = math.tanh %60 : vector<8x128xf32>
    %cst_32 = arith.constant 5.000000e-01 : f32
    %62 = vector.broadcast %cst_32 : f32 to vector<8x128xf32>
    %63 = arith.mulf %62, %61 : vector<8x128xf32>
    %cst_33 = arith.constant 5.000000e-01 : f32
    %64 = vector.broadcast %cst_33 : f32 to vector<8x128xf32>
    %65 = arith.addf %63, %64 : vector<8x128xf32>
    %66 = vector.extract_strided_slice %57 {offsets = [0, 128], sizes = [8, 128], strides = [1, 1]} : vector<8x512xf32> to vector<8x128xf32>
    %cst_34 = arith.constant 5.000000e-01 : f32
    %67 = vector.broadcast %cst_34 : f32 to vector<8x128xf32>
    %68 = arith.mulf %67, %66 : vector<8x128xf32>
    %69 = math.tanh %68 : vector<8x128xf32>
    %cst_35 = arith.constant 5.000000e-01 : f32
    %70 = vector.broadcast %cst_35 : f32 to vector<8x128xf32>
    %71 = arith.mulf %70, %69 : vector<8x128xf32>
    %cst_36 = arith.constant 5.000000e-01 : f32
    %72 = vector.broadcast %cst_36 : f32 to vector<8x128xf32>
    %73 = arith.addf %71, %72 : vector<8x128xf32>
    %74 = vector.extract_strided_slice %57 {offsets = [0, 256], sizes = [8, 128], strides = [1, 1]} : vector<8x512xf32> to vector<8x128xf32>
    %75 = math.tanh %74 : vector<8x128xf32>
    %76 = vector.extract_strided_slice %57 {offsets = [0, 384], sizes = [8, 128], strides = [1, 1]} : vector<8x512xf32> to vector<8x128xf32>
    %cst_37 = arith.constant 5.000000e-01 : f32
    %77 = vector.broadcast %cst_37 : f32 to vector<8x128xf32>
    %78 = arith.mulf %77, %76 : vector<8x128xf32>
    %79 = math.tanh %78 : vector<8x128xf32>
    %cst_38 = arith.constant 5.000000e-01 : f32
    %80 = vector.broadcast %cst_38 : f32 to vector<8x128xf32>
    %81 = arith.mulf %80, %79 : vector<8x128xf32>
    %cst_39 = arith.constant 5.000000e-01 : f32
    %82 = vector.broadcast %cst_39 : f32 to vector<8x128xf32>
    %83 = arith.addf %81, %82 : vector<8x128xf32>
    %84 = arith.mulf %73, %45 : vector<8x128xf32>
    %85 = arith.mulf %65, %75 : vector<8x128xf32>
    %86 = arith.addf %84, %85 : vector<8x128xf32>
    %87 = math.tanh %86 : vector<8x128xf32>
    %88 = arith.mulf %83, %87 : vector<8x128xf32>
    %c0_i32_40 = arith.constant 0 : i32
    %89 = arith.addi %c0_i32_40, %c1_i32 : i32
    %90 = arith.index_cast %89 : i32 to index
    %c0_41 = arith.constant 0 : index
    %c0_42 = arith.constant 0 : index
    %91 = vector.load %arg11[%90, %c0_41, %c0_42] : memref<8x8x128xf32, #tpu.memory_space<vmem>>, vector<1x8x128xf32>
    %92 = vector.shape_cast %91 : vector<1x8x128xf32> to vector<8x128xf32>
    %93 = vector.shape_cast %88 : vector<8x128xf32> to vector<1x8x128xf32>
    tpu.vector_store %arg11[%90, %c0_41, %c0_42], %93 {strides = array<i32>} : memref<8x8x128xf32, #tpu.memory_space<vmem>>, vector<1x8x128xf32>,
    %c2_i32 = arith.constant 2 : i32
    %94 = arith.index_cast %c2_i32 : i32 to index
    %c0_43 = arith.constant 0 : index
    %c0_44 = arith.constant 0 : index
    %95 = vector.load %arg12[%94, %c0_43, %c0_44] : memref<4x8x512xf32, #tpu.memory_space<vmem>>, vector<1x8x512xf32>
    %96 = vector.shape_cast %95 : vector<1x8x512xf32> to vector<8x512xf32>
    %cst_45 = arith.constant dense<0.000000e+00> : vector<8x512xf32>
    %97 = tpu.matmul %88, %1, %cst_45 {dimension_numbers = #tpu.dot_dimension_numbers<[1], [0], [0], [1], [0, 0, 1, 1], [], []>} : vector<8x128xf32>, vector<128x512xf32>, vector<8x512xf32> -> vector<8x512xf32>
    %98 = arith.addf %96, %97 : vector<8x512xf32>
    %99 = vector.extract_strided_slice %98 {offsets = [0, 0], sizes = [8, 128], strides = [1, 1]} : vector<8x512xf32> to vector<8x128xf32>
    %cst_46 = arith.constant 5.000000e-01 : f32
    %100 = vector.broadcast %cst_46 : f32 to vector<8x128xf32>
    %101 = arith.mulf %100, %99 : vector<8x128xf32>
    %102 = math.tanh %101 : vector<8x128xf32>
    %cst_47 = arith.constant 5.000000e-01 : f32
    %103 = vector.broadcast %cst_47 : f32 to vector<8x128xf32>
    %104 = arith.mulf %103, %102 : vector<8x128xf32>
    %cst_48 = arith.constant 5.000000e-01 : f32
    %105 = vector.broadcast %cst_48 : f32 to vector<8x128xf32>
    %106 = arith.addf %104, %105 : vector<8x128xf32>
    %107 = vector.extract_strided_slice %98 {offsets = [0, 128], sizes = [8, 128], strides = [1, 1]} : vector<8x512xf32> to vector<8x128xf32>
    %cst_49 = arith.constant 5.000000e-01 : f32
    %108 = vector.broadcast %cst_49 : f32 to vector<8x128xf32>
    %109 = arith.mulf %108, %107 : vector<8x128xf32>
    %110 = math.tanh %109 : vector<8x128xf32>
    %cst_50 = arith.constant 5.000000e-01 : f32
    %111 = vector.broadcast %cst_50 : f32 to vector<8x128xf32>
    %112 = arith.mulf %111, %110 : vector<8x128xf32>
    %cst_51 = arith.constant 5.000000e-01 : f32
    %113 = vector.broadcast %cst_51 : f32 to vector<8x128xf32>
    %114 = arith.addf %112, %113 : vector<8x128xf32>
    %115 = vector.extract_strided_slice %98 {offsets = [0, 256], sizes = [8, 128], strides = [1, 1]} : vector<8x512xf32> to vector<8x128xf32>
    %116 = math.tanh %115 : vector<8x128xf32>
    %117 = vector.extract_strided_slice %98 {offsets = [0, 384], sizes = [8, 128], strides = [1, 1]} : vector<8x512xf32> to vector<8x128xf32>
    %cst_52 = arith.constant 5.000000e-01 : f32
    %118 = vector.broadcast %cst_52 : f32 to vector<8x128xf32>
    %119 = arith.mulf %118, %117 : vector<8x128xf32>
    %120 = math.tanh %119 : vector<8x128xf32>
    %cst_53 = arith.constant 5.000000e-01 : f32
    %121 = vector.broadcast %cst_53 : f32 to vector<8x128xf32>
    %122 = arith.mulf %121, %120 : vector<8x128xf32>
    %cst_54 = arith.constant 5.000000e-01 : f32
    %123 = vector.broadcast %cst_54 : f32 to vector<8x128xf32>
    %124 = arith.addf %122, %123 : vector<8x128xf32>
    %125 = arith.mulf %114, %86 : vector<8x128xf32>
    %126 = arith.mulf %106, %116 : vector<8x128xf32>
    %127 = arith.addf %125, %126 : vector<8x128xf32>
    %128 = math.tanh %127 : vector<8x128xf32>
    %129 = arith.mulf %124, %128 : vector<8x128xf32>
    %c0_i32_55 = arith.constant 0 : i32
    %130 = arith.addi %c0_i32_55, %c2_i32 : i32
    %131 = arith.index_cast %130 : i32 to index
    %c0_56 = arith.constant 0 : index
    %c0_57 = arith.constant 0 : index
    %132 = vector.load %arg11[%131, %c0_56, %c0_57] : memref<8x8x128xf32, #tpu.memory_space<vmem>>, vector<1x8x128xf32>
    %133 = vector.shape_cast %132 : vector<1x8x128xf32> to vector<8x128xf32>
    %134 = vector.shape_cast %129 : vector<8x128xf32> to vector<1x8x128xf32>
    tpu.vector_store %arg11[%131, %c0_56, %c0_57], %134 {strides = array<i32>} : memref<8x8x128xf32, #tpu.memory_space<vmem>>, vector<1x8x128xf32>,
    %c3_i32 = arith.constant 3 : i32
    %135 = arith.index_cast %c3_i32 : i32 to index
    %c0_58 = arith.constant 0 : index
    %c0_59 = arith.constant 0 : index
    %136 = vector.load %arg12[%135, %c0_58, %c0_59] : memref<4x8x512xf32, #tpu.memory_space<vmem>>, vector<1x8x512xf32>
    %137 = vector.shape_cast %136 : vector<1x8x512xf32> to vector<8x512xf32>
    %cst_60 = arith.constant dense<0.000000e+00> : vector<8x512xf32>
    %138 = tpu.matmul %129, %1, %cst_60 {dimension_numbers = #tpu.dot_dimension_numbers<[1], [0], [0], [1], [0, 0, 1, 1], [], []>} : vector<8x128xf32>, vector<128x512xf32>, vector<8x512xf32> -> vector<8x512xf32>
    %139 = arith.addf %137, %138 : vector<8x512xf32>
    %140 = vector.extract_strided_slice %139 {offsets = [0, 0], sizes = [8, 128], strides = [1, 1]} : vector<8x512xf32> to vector<8x128xf32>
    %cst_61 = arith.constant 5.000000e-01 : f32
    %141 = vector.broadcast %cst_61 : f32 to vector<8x128xf32>
    %142 = arith.mulf %141, %140 : vector<8x128xf32>
    %143 = math.tanh %142 : vector<8x128xf32>
    %cst_62 = arith.constant 5.000000e-01 : f32
    %144 = vector.broadcast %cst_62 : f32 to vector<8x128xf32>
    %145 = arith.mulf %144, %143 : vector<8x128xf32>
    %cst_63 = arith.constant 5.000000e-01 : f32
    %146 = vector.broadcast %cst_63 : f32 to vector<8x128xf32>
    %147 = arith.addf %145, %146 : vector<8x128xf32>
    %148 = vector.extract_strided_slice %139 {offsets = [0, 128], sizes = [8, 128], strides = [1, 1]} : vector<8x512xf32> to vector<8x128xf32>
    %cst_64 = arith.constant 5.000000e-01 : f32
    %149 = vector.broadcast %cst_64 : f32 to vector<8x128xf32>
    %150 = arith.mulf %149, %148 : vector<8x128xf32>
    %151 = math.tanh %150 : vector<8x128xf32>
    %cst_65 = arith.constant 5.000000e-01 : f32
    %152 = vector.broadcast %cst_65 : f32 to vector<8x128xf32>
    %153 = arith.mulf %152, %151 : vector<8x128xf32>
    %cst_66 = arith.constant 5.000000e-01 : f32
    %154 = vector.broadcast %cst_66 : f32 to vector<8x128xf32>
    %155 = arith.addf %153, %154 : vector<8x128xf32>
    %156 = vector.extract_strided_slice %139 {offsets = [0, 256], sizes = [8, 128], strides = [1, 1]} : vector<8x512xf32> to vector<8x128xf32>
    %157 = math.tanh %156 : vector<8x128xf32>
    %158 = vector.extract_strided_slice %139 {offsets = [0, 384], sizes = [8, 128], strides = [1, 1]} : vector<8x512xf32> to vector<8x128xf32>
    %cst_67 = arith.constant 5.000000e-01 : f32
    %159 = vector.broadcast %cst_67 : f32 to vector<8x128xf32>
    %160 = arith.mulf %159, %158 : vector<8x128xf32>
    %161 = math.tanh %160 : vector<8x128xf32>
    %cst_68 = arith.constant 5.000000e-01 : f32
    %162 = vector.broadcast %cst_68 : f32 to vector<8x128xf32>
    %163 = arith.mulf %162, %161 : vector<8x128xf32>
    %cst_69 = arith.constant 5.000000e-01 : f32
    %164 = vector.broadcast %cst_69 : f32 to vector<8x128xf32>
    %165 = arith.addf %163, %164 : vector<8x128xf32>
    %166 = arith.mulf %155, %127 : vector<8x128xf32>
    %167 = arith.mulf %147, %157 : vector<8x128xf32>
    %168 = arith.addf %166, %167 : vector<8x128xf32>
    %169 = math.tanh %168 : vector<8x128xf32>
    %170 = arith.mulf %165, %169 : vector<8x128xf32>
    %c0_i32_70 = arith.constant 0 : i32
    %171 = arith.addi %c0_i32_70, %c3_i32 : i32
    %172 = arith.index_cast %171 : i32 to index
    %c0_71 = arith.constant 0 : index
    %c0_72 = arith.constant 0 : index
    %173 = vector.load %arg11[%172, %c0_71, %c0_72] : memref<8x8x128xf32, #tpu.memory_space<vmem>>, vector<1x8x128xf32>
    %174 = vector.shape_cast %173 : vector<1x8x128xf32> to vector<8x128xf32>
    %175 = vector.shape_cast %170 : vector<8x128xf32> to vector<1x8x128xf32>
    tpu.vector_store %arg11[%172, %c0_71, %c0_72], %175 {strides = array<i32>} : memref<8x8x128xf32, #tpu.memory_space<vmem>>, vector<1x8x128xf32>,
    %c4_i32 = arith.constant 4 : i32
    %c4 = arith.constant 4 : index
    %c0_73 = arith.constant 0 : index
    %c0_74 = arith.constant 0 : index
    %176 = vector.load %arg1[%c4, %c0_73, %c0_74] : memref<8x8x8xf32, #tpu.memory_space<vmem>>, vector<4x8x8xf32>
    %177 = vector.shape_cast %176 : vector<4x8x8xf32> to vector<32x8xf32>
    %cst_75 = arith.constant dense<0.000000e+00> : vector<32x512xf32>
    %178 = tpu.matmul %177, %0, %cst_75 {dimension_numbers = #tpu.dot_dimension_numbers<[1], [0], [0], [1], [0, 0, 1, 1], [], []>} : vector<32x8xf32>, vector<8x512xf32>, vector<32x512xf32> -> vector<32x512xf32>
    %179 = vector.broadcast %2 : vector<1x512xf32> to vector<32x512xf32>
    %180 = arith.addf %178, %179 : vector<32x512xf32>
    %181 = vector.shape_cast %180 : vector<32x512xf32> to vector<4x8x512xf32>
    %c0_76 = arith.constant 0 : index
    %c0_77 = arith.constant 0 : index
    %c0_78 = arith.constant 0 : index
    %182 = vector.load %arg12[%c0_76, %c0_77, %c0_78] : memref<4x8x512xf32, #tpu.memory_space<vmem>>, vector<4x8x512xf32>
    tpu.vector_store %arg12[%c0_76, %c0_77, %c0_78], %181 {strides = array<i32>} : memref<4x8x512xf32, #tpu.memory_space<vmem>>, vector<4x8x512xf32>,
    %c0_i32_79 = arith.constant 0 : i32
    %183 = arith.index_cast %c0_i32_79 : i32 to index
    %c0_80 = arith.constant 0 : index
    %c0_81 = arith.constant 0 : index
    %184 = vector.load %arg12[%183, %c0_80, %c0_81] : memref<4x8x512xf32, #tpu.memory_space<vmem>>, vector<1x8x512xf32>
    %185 = vector.shape_cast %184 : vector<1x8x512xf32> to vector<8x512xf32>
    %cst_82 = arith.constant dense<0.000000e+00> : vector<8x512xf32>
    %186 = tpu.matmul %170, %1, %cst_82 {dimension_numbers = #tpu.dot_dimension_numbers<[1], [0], [0], [1], [0, 0, 1, 1], [], []>} : vector<8x128xf32>, vector<128x512xf32>, vector<8x512xf32> -> vector<8x512xf32>
    %187 = arith.addf %185, %186 : vector<8x512xf32>
    %188 = vector.extract_strided_slice %187 {offsets = [0, 0], sizes = [8, 128], strides = [1, 1]} : vector<8x512xf32> to vector<8x128xf32>
    %cst_83 = arith.constant 5.000000e-01 : f32
    %189 = vector.broadcast %cst_83 : f32 to vector<8x128xf32>
    %190 = arith.mulf %189, %188 : vector<8x128xf32>
    %191 = math.tanh %190 : vector<8x128xf32>
    %cst_84 = arith.constant 5.000000e-01 : f32
    %192 = vector.broadcast %cst_84 : f32 to vector<8x128xf32>
    %193 = arith.mulf %192, %191 : vector<8x128xf32>
    %cst_85 = arith.constant 5.000000e-01 : f32
    %194 = vector.broadcast %cst_85 : f32 to vector<8x128xf32>
    %195 = arith.addf %193, %194 : vector<8x128xf32>
    %196 = vector.extract_strided_slice %187 {offsets = [0, 128], sizes = [8, 128], strides = [1, 1]} : vector<8x512xf32> to vector<8x128xf32>
    %cst_86 = arith.constant 5.000000e-01 : f32
    %197 = vector.broadcast %cst_86 : f32 to vector<8x128xf32>
    %198 = arith.mulf %197, %196 : vector<8x128xf32>
    %199 = math.tanh %198 : vector<8x128xf32>
    %cst_87 = arith.constant 5.000000e-01 : f32
    %200 = vector.broadcast %cst_87 : f32 to vector<8x128xf32>
    %201 = arith.mulf %200, %199 : vector<8x128xf32>
    %cst_88 = arith.constant 5.000000e-01 : f32
    %202 = vector.broadcast %cst_88 : f32 to vector<8x128xf32>
    %203 = arith.addf %201, %202 : vector<8x128xf32>
    %204 = vector.extract_strided_slice %187 {offsets = [0, 256], sizes = [8, 128], strides = [1, 1]} : vector<8x512xf32> to vector<8x128xf32>
    %205 = math.tanh %204 : vector<8x128xf32>
    %206 = vector.extract_strided_slice %187 {offsets = [0, 384], sizes = [8, 128], strides = [1, 1]} : vector<8x512xf32> to vector<8x128xf32>
    %cst_89 = arith.constant 5.000000e-01 : f32
    %207 = vector.broadcast %cst_89 : f32 to vector<8x128xf32>
    %208 = arith.mulf %207, %206 : vector<8x128xf32>
    %209 = math.tanh %208 : vector<8x128xf32>
    %cst_90 = arith.constant 5.000000e-01 : f32
    %210 = vector.broadcast %cst_90 : f32 to vector<8x128xf32>
    %211 = arith.mulf %210, %209 : vector<8x128xf32>
    %cst_91 = arith.constant 5.000000e-01 : f32
    %212 = vector.broadcast %cst_91 : f32 to vector<8x128xf32>
    %213 = arith.addf %211, %212 : vector<8x128xf32>
    %214 = arith.mulf %203, %168 : vector<8x128xf32>
    %215 = arith.mulf %195, %205 : vector<8x128xf32>
    %216 = arith.addf %214, %215 : vector<8x128xf32>
    %217 = math.tanh %216 : vector<8x128xf32>
    %218 = arith.mulf %213, %217 : vector<8x128xf32>
    %c4_i32_92 = arith.constant 4 : i32
    %219 = arith.addi %c4_i32_92, %c0_i32_79 : i32
    %220 = arith.index_cast %219 : i32 to index
    %c0_93 = arith.constant 0 : index
    %c0_94 = arith.constant 0 : index
    %221 = vector.load %arg11[%220, %c0_93, %c0_94] : memref<8x8x128xf32, #tpu.memory_space<vmem>>, vector<1x8x128xf32>
    %222 = vector.shape_cast %221 : vector<1x8x128xf32> to vector<8x128xf32>
    %223 = vector.shape_cast %218 : vector<8x128xf32> to vector<1x8x128xf32>
    tpu.vector_store %arg11[%220, %c0_93, %c0_94], %223 {strides = array<i32>} : memref<8x8x128xf32, #tpu.memory_space<vmem>>, vector<1x8x128xf32>,
    %c1_i32_95 = arith.constant 1 : i32
    %224 = arith.index_cast %c1_i32_95 : i32 to index
    %c0_96 = arith.constant 0 : index
    %c0_97 = arith.constant 0 : index
    %225 = vector.load %arg12[%224, %c0_96, %c0_97] : memref<4x8x512xf32, #tpu.memory_space<vmem>>, vector<1x8x512xf32>
    %226 = vector.shape_cast %225 : vector<1x8x512xf32> to vector<8x512xf32>
    %cst_98 = arith.constant dense<0.000000e+00> : vector<8x512xf32>
    %227 = tpu.matmul %218, %1, %cst_98 {dimension_numbers = #tpu.dot_dimension_numbers<[1], [0], [0], [1], [0, 0, 1, 1], [], []>} : vector<8x128xf32>, vector<128x512xf32>, vector<8x512xf32> -> vector<8x512xf32>
    %228 = arith.addf %226, %227 : vector<8x512xf32>
    %229 = vector.extract_strided_slice %228 {offsets = [0, 0], sizes = [8, 128], strides = [1, 1]} : vector<8x512xf32> to vector<8x128xf32>
    %cst_99 = arith.constant 5.000000e-01 : f32
    %230 = vector.broadcast %cst_99 : f32 to vector<8x128xf32>
    %231 = arith.mulf %230, %229 : vector<8x128xf32>
    %232 = math.tanh %231 : vector<8x128xf32>
    %cst_100 = arith.constant 5.000000e-01 : f32
    %233 = vector.broadcast %cst_100 : f32 to vector<8x128xf32>
    %234 = arith.mulf %233, %232 : vector<8x128xf32>
    %cst_101 = arith.constant 5.000000e-01 : f32
    %235 = vector.broadcast %cst_101 : f32 to vector<8x128xf32>
    %236 = arith.addf %234, %235 : vector<8x128xf32>
    %237 = vector.extract_strided_slice %228 {offsets = [0, 128], sizes = [8, 128], strides = [1, 1]} : vector<8x512xf32> to vector<8x128xf32>
    %cst_102 = arith.constant 5.000000e-01 : f32
    %238 = vector.broadcast %cst_102 : f32 to vector<8x128xf32>
    %239 = arith.mulf %238, %237 : vector<8x128xf32>
    %240 = math.tanh %239 : vector<8x128xf32>
    %cst_103 = arith.constant 5.000000e-01 : f32
    %241 = vector.broadcast %cst_103 : f32 to vector<8x128xf32>
    %242 = arith.mulf %241, %240 : vector<8x128xf32>
    %cst_104 = arith.constant 5.000000e-01 : f32
    %243 = vector.broadcast %cst_104 : f32 to vector<8x128xf32>
    %244 = arith.addf %242, %243 : vector<8x128xf32>
    %245 = vector.extract_strided_slice %228 {offsets = [0, 256], sizes = [8, 128], strides = [1, 1]} : vector<8x512xf32> to vector<8x128xf32>
    %246 = math.tanh %245 : vector<8x128xf32>
    %247 = vector.extract_strided_slice %228 {offsets = [0, 384], sizes = [8, 128], strides = [1, 1]} : vector<8x512xf32> to vector<8x128xf32>
    %cst_105 = arith.constant 5.000000e-01 : f32
    %248 = vector.broadcast %cst_105 : f32 to vector<8x128xf32>
    %249 = arith.mulf %248, %247 : vector<8x128xf32>
    %250 = math.tanh %249 : vector<8x128xf32>
    %cst_106 = arith.constant 5.000000e-01 : f32
    %251 = vector.broadcast %cst_106 : f32 to vector<8x128xf32>
    %252 = arith.mulf %251, %250 : vector<8x128xf32>
    %cst_107 = arith.constant 5.000000e-01 : f32
    %253 = vector.broadcast %cst_107 : f32 to vector<8x128xf32>
    %254 = arith.addf %252, %253 : vector<8x128xf32>
    %255 = arith.mulf %244, %216 : vector<8x128xf32>
    %256 = arith.mulf %236, %246 : vector<8x128xf32>
    %257 = arith.addf %255, %256 : vector<8x128xf32>
    %258 = math.tanh %257 : vector<8x128xf32>
    %259 = arith.mulf %254, %258 : vector<8x128xf32>
    %c4_i32_108 = arith.constant 4 : i32
    %260 = arith.addi %c4_i32_108, %c1_i32_95 : i32
    %261 = arith.index_cast %260 : i32 to index
    %c0_109 = arith.constant 0 : index
    %c0_110 = arith.constant 0 : index
    %262 = vector.load %arg11[%261, %c0_109, %c0_110] : memref<8x8x128xf32, #tpu.memory_space<vmem>>, vector<1x8x128xf32>
    %263 = vector.shape_cast %262 : vector<1x8x128xf32> to vector<8x128xf32>
    %264 = vector.shape_cast %259 : vector<8x128xf32> to vector<1x8x128xf32>
    tpu.vector_store %arg11[%261, %c0_109, %c0_110], %264 {strides = array<i32>} : memref<8x8x128xf32, #tpu.memory_space<vmem>>, vector<1x8x128xf32>,
    %c2_i32_111 = arith.constant 2 : i32
    %265 = arith.index_cast %c2_i32_111 : i32 to index
    %c0_112 = arith.constant 0 : index
    %c0_113 = arith.constant 0 : index
    %266 = vector.load %arg12[%265, %c0_112, %c0_113] : memref<4x8x512xf32, #tpu.memory_space<vmem>>, vector<1x8x512xf32>
    %267 = vector.shape_cast %266 : vector<1x8x512xf32> to vector<8x512xf32>
    %cst_114 = arith.constant dense<0.000000e+00> : vector<8x512xf32>
    %268 = tpu.matmul %259, %1, %cst_114 {dimension_numbers = #tpu.dot_dimension_numbers<[1], [0], [0], [1], [0, 0, 1, 1], [], []>} : vector<8x128xf32>, vector<128x512xf32>, vector<8x512xf32> -> vector<8x512xf32>
    %269 = arith.addf %267, %268 : vector<8x512xf32>
    %270 = vector.extract_strided_slice %269 {offsets = [0, 0], sizes = [8, 128], strides = [1, 1]} : vector<8x512xf32> to vector<8x128xf32>
    %cst_115 = arith.constant 5.000000e-01 : f32
    %271 = vector.broadcast %cst_115 : f32 to vector<8x128xf32>
    %272 = arith.mulf %271, %270 : vector<8x128xf32>
    %273 = math.tanh %272 : vector<8x128xf32>
    %cst_116 = arith.constant 5.000000e-01 : f32
    %274 = vector.broadcast %cst_116 : f32 to vector<8x128xf32>
    %275 = arith.mulf %274, %273 : vector<8x128xf32>
    %cst_117 = arith.constant 5.000000e-01 : f32
    %276 = vector.broadcast %cst_117 : f32 to vector<8x128xf32>
    %277 = arith.addf %275, %276 : vector<8x128xf32>
    %278 = vector.extract_strided_slice %269 {offsets = [0, 128], sizes = [8, 128], strides = [1, 1]} : vector<8x512xf32> to vector<8x128xf32>
    %cst_118 = arith.constant 5.000000e-01 : f32
    %279 = vector.broadcast %cst_118 : f32 to vector<8x128xf32>
    %280 = arith.mulf %279, %278 : vector<8x128xf32>
    %281 = math.tanh %280 : vector<8x128xf32>
    %cst_119 = arith.constant 5.000000e-01 : f32
    %282 = vector.broadcast %cst_119 : f32 to vector<8x128xf32>
    %283 = arith.mulf %282, %281 : vector<8x128xf32>
    %cst_120 = arith.constant 5.000000e-01 : f32
    %284 = vector.broadcast %cst_120 : f32 to vector<8x128xf32>
    %285 = arith.addf %283, %284 : vector<8x128xf32>
    %286 = vector.extract_strided_slice %269 {offsets = [0, 256], sizes = [8, 128], strides = [1, 1]} : vector<8x512xf32> to vector<8x128xf32>
    %287 = math.tanh %286 : vector<8x128xf32>
    %288 = vector.extract_strided_slice %269 {offsets = [0, 384], sizes = [8, 128], strides = [1, 1]} : vector<8x512xf32> to vector<8x128xf32>
    %cst_121 = arith.constant 5.000000e-01 : f32
    %289 = vector.broadcast %cst_121 : f32 to vector<8x128xf32>
    %290 = arith.mulf %289, %288 : vector<8x128xf32>
    %291 = math.tanh %290 : vector<8x128xf32>
    %cst_122 = arith.constant 5.000000e-01 : f32
    %292 = vector.broadcast %cst_122 : f32 to vector<8x128xf32>
    %293 = arith.mulf %292, %291 : vector<8x128xf32>
    %cst_123 = arith.constant 5.000000e-01 : f32
    %294 = vector.broadcast %cst_123 : f32 to vector<8x128xf32>
    %295 = arith.addf %293, %294 : vector<8x128xf32>
    %296 = arith.mulf %285, %257 : vector<8x128xf32>
    %297 = arith.mulf %277, %287 : vector<8x128xf32>
    %298 = arith.addf %296, %297 : vector<8x128xf32>
    %299 = math.tanh %298 : vector<8x128xf32>
    %300 = arith.mulf %295, %299 : vector<8x128xf32>
    %c4_i32_124 = arith.constant 4 : i32
    %301 = arith.addi %c4_i32_124, %c2_i32_111 : i32
    %302 = arith.index_cast %301 : i32 to index
    %c0_125 = arith.constant 0 : index
    %c0_126 = arith.constant 0 : index
    %303 = vector.load %arg11[%302, %c0_125, %c0_126] : memref<8x8x128xf32, #tpu.memory_space<vmem>>, vector<1x8x128xf32>
    %304 = vector.shape_cast %303 : vector<1x8x128xf32> to vector<8x128xf32>
    %305 = vector.shape_cast %300 : vector<8x128xf32> to vector<1x8x128xf32>
    tpu.vector_store %arg11[%302, %c0_125, %c0_126], %305 {strides = array<i32>} : memref<8x8x128xf32, #tpu.memory_space<vmem>>, vector<1x8x128xf32>,
    %c3_i32_127 = arith.constant 3 : i32
    %306 = arith.index_cast %c3_i32_127 : i32 to index
    %c0_128 = arith.constant 0 : index
    %c0_129 = arith.constant 0 : index
    %307 = vector.load %arg12[%306, %c0_128, %c0_129] : memref<4x8x512xf32, #tpu.memory_space<vmem>>, vector<1x8x512xf32>
    %308 = vector.shape_cast %307 : vector<1x8x512xf32> to vector<8x512xf32>
    %cst_130 = arith.constant dense<0.000000e+00> : vector<8x512xf32>
    %309 = tpu.matmul %300, %1, %cst_130 {dimension_numbers = #tpu.dot_dimension_numbers<[1], [0], [0], [1], [0, 0, 1, 1], [], []>} : vector<8x128xf32>, vector<128x512xf32>, vector<8x512xf32> -> vector<8x512xf32>
    %310 = arith.addf %308, %309 : vector<8x512xf32>
    %311 = vector.extract_strided_slice %310 {offsets = [0, 0], sizes = [8, 128], strides = [1, 1]} : vector<8x512xf32> to vector<8x128xf32>
    %cst_131 = arith.constant 5.000000e-01 : f32
    %312 = vector.broadcast %cst_131 : f32 to vector<8x128xf32>
    %313 = arith.mulf %312, %311 : vector<8x128xf32>
    %314 = math.tanh %313 : vector<8x128xf32>
    %cst_132 = arith.constant 5.000000e-01 : f32
    %315 = vector.broadcast %cst_132 : f32 to vector<8x128xf32>
    %316 = arith.mulf %315, %314 : vector<8x128xf32>
    %cst_133 = arith.constant 5.000000e-01 : f32
    %317 = vector.broadcast %cst_133 : f32 to vector<8x128xf32>
    %318 = arith.addf %316, %317 : vector<8x128xf32>
    %319 = vector.extract_strided_slice %310 {offsets = [0, 128], sizes = [8, 128], strides = [1, 1]} : vector<8x512xf32> to vector<8x128xf32>
    %cst_134 = arith.constant 5.000000e-01 : f32
    %320 = vector.broadcast %cst_134 : f32 to vector<8x128xf32>
    %321 = arith.mulf %320, %319 : vector<8x128xf32>
    %322 = math.tanh %321 : vector<8x128xf32>
    %cst_135 = arith.constant 5.000000e-01 : f32
    %323 = vector.broadcast %cst_135 : f32 to vector<8x128xf32>
    %324 = arith.mulf %323, %322 : vector<8x128xf32>
    %cst_136 = arith.constant 5.000000e-01 : f32
    %325 = vector.broadcast %cst_136 : f32 to vector<8x128xf32>
    %326 = arith.addf %324, %325 : vector<8x128xf32>
    %327 = vector.extract_strided_slice %310 {offsets = [0, 256], sizes = [8, 128], strides = [1, 1]} : vector<8x512xf32> to vector<8x128xf32>
    %328 = math.tanh %327 : vector<8x128xf32>
    %329 = vector.extract_strided_slice %310 {offsets = [0, 384], sizes = [8, 128], strides = [1, 1]} : vector<8x512xf32> to vector<8x128xf32>
    %cst_137 = arith.constant 5.000000e-01 : f32
    %330 = vector.broadcast %cst_137 : f32 to vector<8x128xf32>
    %331 = arith.mulf %330, %329 : vector<8x128xf32>
    %332 = math.tanh %331 : vector<8x128xf32>
    %cst_138 = arith.constant 5.000000e-01 : f32
    %333 = vector.broadcast %cst_138 : f32 to vector<8x128xf32>
    %334 = arith.mulf %333, %332 : vector<8x128xf32>
    %cst_139 = arith.constant 5.000000e-01 : f32
    %335 = vector.broadcast %cst_139 : f32 to vector<8x128xf32>
    %336 = arith.addf %334, %335 : vector<8x128xf32>
    %337 = arith.mulf %326, %298 : vector<8x128xf32>
    %338 = arith.mulf %318, %328 : vector<8x128xf32>
    %339 = arith.addf %337, %338 : vector<8x128xf32>
    %340 = math.tanh %339 : vector<8x128xf32>
    %341 = arith.mulf %336, %340 : vector<8x128xf32>
    %c4_i32_140 = arith.constant 4 : i32
    %342 = arith.addi %c4_i32_140, %c3_i32_127 : i32
    %343 = arith.index_cast %342 : i32 to index
    %c0_141 = arith.constant 0 : index
    %c0_142 = arith.constant 0 : index
    %344 = vector.load %arg11[%343, %c0_141, %c0_142] : memref<8x8x128xf32, #tpu.memory_space<vmem>>, vector<1x8x128xf32>
    %345 = vector.shape_cast %344 : vector<1x8x128xf32> to vector<8x128xf32>
    %346 = vector.shape_cast %341 : vector<8x128xf32> to vector<1x8x128xf32>
    tpu.vector_store %arg11[%343, %c0_141, %c0_142], %346 {strides = array<i32>} : memref<8x8x128xf32, #tpu.memory_space<vmem>>, vector<1x8x128xf32>,
    %c4_i32_143 = arith.constant 4 : i32
    %c0_144 = arith.constant 0 : index
    %c0_145 = arith.constant 0 : index
    %347 = vector.load %arg5[%c0_144, %c0_145] : memref<128x512xf32, #tpu.memory_space<vmem>>, vector<128x512xf32>
    %c0_146 = arith.constant 0 : index
    %c0_147 = arith.constant 0 : index
    %348 = vector.load %arg6[%c0_146, %c0_147] : memref<128x512xf32, #tpu.memory_space<vmem>>, vector<128x512xf32>
    %c0_148 = arith.constant 0 : index
    %c0_149 = arith.constant 0 : index
    %349 = vector.load %arg7[%c0_148, %c0_149] : memref<1x512xf32, #tpu.memory_space<vmem>>, vector<1x512xf32>
    %cst_150 = arith.constant 0.000000e+00 : f32
    %350 = vector.broadcast %cst_150 : f32 to vector<8x128xf32>
    %cst_151 = arith.constant 0.000000e+00 : f32
    %351 = vector.broadcast %cst_151 : f32 to vector<8x128xf32>
    %c0_152 = arith.constant 0 : index
    %c0_153 = arith.constant 0 : index
    %c0_154 = arith.constant 0 : index
    %352 = vector.load %arg11[%c0_152, %c0_153, %c0_154] : memref<8x8x128xf32, #tpu.memory_space<vmem>>, vector<4x8x128xf32>
    %353 = vector.shape_cast %352 : vector<4x8x128xf32> to vector<32x128xf32>
    %cst_155 = arith.constant dense<0.000000e+00> : vector<32x512xf32>
    %354 = tpu.matmul %353, %347, %cst_155 {dimension_numbers = #tpu.dot_dimension_numbers<[1], [0], [0], [1], [0, 0, 1, 1], [], []>} : vector<32x128xf32>, vector<128x512xf32>, vector<32x512xf32> -> vector<32x512xf32>
    %355 = vector.broadcast %349 : vector<1x512xf32> to vector<32x512xf32>
    %356 = arith.addf %354, %355 : vector<32x512xf32>
    %357 = vector.shape_cast %356 : vector<32x512xf32> to vector<4x8x512xf32>
    %c0_156 = arith.constant 0 : index
    %c0_157 = arith.constant 0 : index
    %c0_158 = arith.constant 0 : index
    %358 = vector.load %arg12[%c0_156, %c0_157, %c0_158] : memref<4x8x512xf32, #tpu.memory_space<vmem>>, vector<4x8x512xf32>
    tpu.vector_store %arg12[%c0_156, %c0_157, %c0_158], %357 {strides = array<i32>} : memref<4x8x512xf32, #tpu.memory_space<vmem>>, vector<4x8x512xf32>,
    %c0_i32_159 = arith.constant 0 : i32
    %359 = arith.index_cast %c0_i32_159 : i32 to index
    %c0_160 = arith.constant 0 : index
    %c0_161 = arith.constant 0 : index
    %360 = vector.load %arg12[%359, %c0_160, %c0_161] : memref<4x8x512xf32, #tpu.memory_space<vmem>>, vector<1x8x512xf32>
    %361 = vector.shape_cast %360 : vector<1x8x512xf32> to vector<8x512xf32>
    %cst_162 = arith.constant dense<0.000000e+00> : vector<8x512xf32>
    %362 = tpu.matmul %350, %348, %cst_162 {dimension_numbers = #tpu.dot_dimension_numbers<[1], [0], [0], [1], [0, 0, 1, 1], [], []>} : vector<8x128xf32>, vector<128x512xf32>, vector<8x512xf32> -> vector<8x512xf32>
    %363 = arith.addf %361, %362 : vector<8x512xf32>
    %364 = vector.extract_strided_slice %363 {offsets = [0, 0], sizes = [8, 128], strides = [1, 1]} : vector<8x512xf32> to vector<8x128xf32>
    %cst_163 = arith.constant 5.000000e-01 : f32
    %365 = vector.broadcast %cst_163 : f32 to vector<8x128xf32>
    %366 = arith.mulf %365, %364 : vector<8x128xf32>
    %367 = math.tanh %366 : vector<8x128xf32>
    %cst_164 = arith.constant 5.000000e-01 : f32
    %368 = vector.broadcast %cst_164 : f32 to vector<8x128xf32>
    %369 = arith.mulf %368, %367 : vector<8x128xf32>
    %cst_165 = arith.constant 5.000000e-01 : f32
    %370 = vector.broadcast %cst_165 : f32 to vector<8x128xf32>
    %371 = arith.addf %369, %370 : vector<8x128xf32>
    %372 = vector.extract_strided_slice %363 {offsets = [0, 128], sizes = [8, 128], strides = [1, 1]} : vector<8x512xf32> to vector<8x128xf32>
    %cst_166 = arith.constant 5.000000e-01 : f32
    %373 = vector.broadcast %cst_166 : f32 to vector<8x128xf32>
    %374 = arith.mulf %373, %372 : vector<8x128xf32>
    %375 = math.tanh %374 : vector<8x128xf32>
    %cst_167 = arith.constant 5.000000e-01 : f32
    %376 = vector.broadcast %cst_167 : f32 to vector<8x128xf32>
    %377 = arith.mulf %376, %375 : vector<8x128xf32>
    %cst_168 = arith.constant 5.000000e-01 : f32
    %378 = vector.broadcast %cst_168 : f32 to vector<8x128xf32>
    %379 = arith.addf %377, %378 : vector<8x128xf32>
    %380 = vector.extract_strided_slice %363 {offsets = [0, 256], sizes = [8, 128], strides = [1, 1]} : vector<8x512xf32> to vector<8x128xf32>
    %381 = math.tanh %380 : vector<8x128xf32>
    %382 = vector.extract_strided_slice %363 {offsets = [0, 384], sizes = [8, 128], strides = [1, 1]} : vector<8x512xf32> to vector<8x128xf32>
    %cst_169 = arith.constant 5.000000e-01 : f32
    %383 = vector.broadcast %cst_169 : f32 to vector<8x128xf32>
    %384 = arith.mulf %383, %382 : vector<8x128xf32>
    %385 = math.tanh %384 : vector<8x128xf32>
    %cst_170 = arith.constant 5.000000e-01 : f32
    %386 = vector.broadcast %cst_170 : f32 to vector<8x128xf32>
    %387 = arith.mulf %386, %385 : vector<8x128xf32>
    %cst_171 = arith.constant 5.000000e-01 : f32
    %388 = vector.broadcast %cst_171 : f32 to vector<8x128xf32>
    %389 = arith.addf %387, %388 : vector<8x128xf32>
    %390 = arith.mulf %379, %351 : vector<8x128xf32>
    %391 = arith.mulf %371, %381 : vector<8x128xf32>
    %392 = arith.addf %390, %391 : vector<8x128xf32>
    %393 = math.tanh %392 : vector<8x128xf32>
    %394 = arith.mulf %389, %393 : vector<8x128xf32>
    %c1_i32_172 = arith.constant 1 : i32
    %395 = arith.index_cast %c1_i32_172 : i32 to index
    %c0_173 = arith.constant 0 : index
    %c0_174 = arith.constant 0 : index
    %396 = vector.load %arg12[%395, %c0_173, %c0_174] : memref<4x8x512xf32, #tpu.memory_space<vmem>>, vector<1x8x512xf32>
    %397 = vector.shape_cast %396 : vector<1x8x512xf32> to vector<8x512xf32>
    %cst_175 = arith.constant dense<0.000000e+00> : vector<8x512xf32>
    %398 = tpu.matmul %394, %348, %cst_175 {dimension_numbers = #tpu.dot_dimension_numbers<[1], [0], [0], [1], [0, 0, 1, 1], [], []>} : vector<8x128xf32>, vector<128x512xf32>, vector<8x512xf32> -> vector<8x512xf32>
    %399 = arith.addf %397, %398 : vector<8x512xf32>
    %400 = vector.extract_strided_slice %399 {offsets = [0, 0], sizes = [8, 128], strides = [1, 1]} : vector<8x512xf32> to vector<8x128xf32>
    %cst_176 = arith.constant 5.000000e-01 : f32
    %401 = vector.broadcast %cst_176 : f32 to vector<8x128xf32>
    %402 = arith.mulf %401, %400 : vector<8x128xf32>
    %403 = math.tanh %402 : vector<8x128xf32>
    %cst_177 = arith.constant 5.000000e-01 : f32
    %404 = vector.broadcast %cst_177 : f32 to vector<8x128xf32>
    %405 = arith.mulf %404, %403 : vector<8x128xf32>
    %cst_178 = arith.constant 5.000000e-01 : f32
    %406 = vector.broadcast %cst_178 : f32 to vector<8x128xf32>
    %407 = arith.addf %405, %406 : vector<8x128xf32>
    %408 = vector.extract_strided_slice %399 {offsets = [0, 128], sizes = [8, 128], strides = [1, 1]} : vector<8x512xf32> to vector<8x128xf32>
    %cst_179 = arith.constant 5.000000e-01 : f32
    %409 = vector.broadcast %cst_179 : f32 to vector<8x128xf32>
    %410 = arith.mulf %409, %408 : vector<8x128xf32>
    %411 = math.tanh %410 : vector<8x128xf32>
    %cst_180 = arith.constant 5.000000e-01 : f32
    %412 = vector.broadcast %cst_180 : f32 to vector<8x128xf32>
    %413 = arith.mulf %412, %411 : vector<8x128xf32>
    %cst_181 = arith.constant 5.000000e-01 : f32
    %414 = vector.broadcast %cst_181 : f32 to vector<8x128xf32>
    %415 = arith.addf %413, %414 : vector<8x128xf32>
    %416 = vector.extract_strided_slice %399 {offsets = [0, 256], sizes = [8, 128], strides = [1, 1]} : vector<8x512xf32> to vector<8x128xf32>
    %417 = math.tanh %416 : vector<8x128xf32>
    %418 = vector.extract_strided_slice %399 {offsets = [0, 384], sizes = [8, 128], strides = [1, 1]} : vector<8x512xf32> to vector<8x128xf32>
    %cst_182 = arith.constant 5.000000e-01 : f32
    %419 = vector.broadcast %cst_182 : f32 to vector<8x128xf32>
    %420 = arith.mulf %419, %418 : vector<8x128xf32>
    %421 = math.tanh %420 : vector<8x128xf32>
    %cst_183 = arith.constant 5.000000e-01 : f32
    %422 = vector.broadcast %cst_183 : f32 to vector<8x128xf32>
    %423 = arith.mulf %422, %421 : vector<8x128xf32>
    %cst_184 = arith.constant 5.000000e-01 : f32
    %424 = vector.broadcast %cst_184 : f32 to vector<8x128xf32>
    %425 = arith.addf %423, %424 : vector<8x128xf32>
    %426 = arith.mulf %415, %392 : vector<8x128xf32>
    %427 = arith.mulf %407, %417 : vector<8x128xf32>
    %428 = arith.addf %426, %427 : vector<8x128xf32>
    %429 = math.tanh %428 : vector<8x128xf32>
    %430 = arith.mulf %425, %429 : vector<8x128xf32>
    %c2_i32_185 = arith.constant 2 : i32
    %431 = arith.index_cast %c2_i32_185 : i32 to index
    %c0_186 = arith.constant 0 : index
    %c0_187 = arith.constant 0 : index
    %432 = vector.load %arg12[%431, %c0_186, %c0_187] : memref<4x8x512xf32, #tpu.memory_space<vmem>>, vector<1x8x512xf32>
    %433 = vector.shape_cast %432 : vector<1x8x512xf32> to vector<8x512xf32>
    %cst_188 = arith.constant dense<0.000000e+00> : vector<8x512xf32>
    %434 = tpu.matmul %430, %348, %cst_188 {dimension_numbers = #tpu.dot_dimension_numbers<[1], [0], [0], [1], [0, 0, 1, 1], [], []>} : vector<8x128xf32>, vector<128x512xf32>, vector<8x512xf32> -> vector<8x512xf32>
    %435 = arith.addf %433, %434 : vector<8x512xf32>
    %436 = vector.extract_strided_slice %435 {offsets = [0, 0], sizes = [8, 128], strides = [1, 1]} : vector<8x512xf32> to vector<8x128xf32>
    %cst_189 = arith.constant 5.000000e-01 : f32
    %437 = vector.broadcast %cst_189 : f32 to vector<8x128xf32>
    %438 = arith.mulf %437, %436 : vector<8x128xf32>
    %439 = math.tanh %438 : vector<8x128xf32>
    %cst_190 = arith.constant 5.000000e-01 : f32
    %440 = vector.broadcast %cst_190 : f32 to vector<8x128xf32>
    %441 = arith.mulf %440, %439 : vector<8x128xf32>
    %cst_191 = arith.constant 5.000000e-01 : f32
    %442 = vector.broadcast %cst_191 : f32 to vector<8x128xf32>
    %443 = arith.addf %441, %442 : vector<8x128xf32>
    %444 = vector.extract_strided_slice %435 {offsets = [0, 128], sizes = [8, 128], strides = [1, 1]} : vector<8x512xf32> to vector<8x128xf32>
    %cst_192 = arith.constant 5.000000e-01 : f32
    %445 = vector.broadcast %cst_192 : f32 to vector<8x128xf32>
    %446 = arith.mulf %445, %444 : vector<8x128xf32>
    %447 = math.tanh %446 : vector<8x128xf32>
    %cst_193 = arith.constant 5.000000e-01 : f32
    %448 = vector.broadcast %cst_193 : f32 to vector<8x128xf32>
    %449 = arith.mulf %448, %447 : vector<8x128xf32>
    %cst_194 = arith.constant 5.000000e-01 : f32
    %450 = vector.broadcast %cst_194 : f32 to vector<8x128xf32>
    %451 = arith.addf %449, %450 : vector<8x128xf32>
    %452 = vector.extract_strided_slice %435 {offsets = [0, 256], sizes = [8, 128], strides = [1, 1]} : vector<8x512xf32> to vector<8x128xf32>
    %453 = math.tanh %452 : vector<8x128xf32>
    %454 = vector.extract_strided_slice %435 {offsets = [0, 384], sizes = [8, 128], strides = [1, 1]} : vector<8x512xf32> to vector<8x128xf32>
    %cst_195 = arith.constant 5.000000e-01 : f32
    %455 = vector.broadcast %cst_195 : f32 to vector<8x128xf32>
    %456 = arith.mulf %455, %454 : vector<8x128xf32>
    %457 = math.tanh %456 : vector<8x128xf32>
    %cst_196 = arith.constant 5.000000e-01 : f32
    %458 = vector.broadcast %cst_196 : f32 to vector<8x128xf32>
    %459 = arith.mulf %458, %457 : vector<8x128xf32>
    %cst_197 = arith.constant 5.000000e-01 : f32
    %460 = vector.broadcast %cst_197 : f32 to vector<8x128xf32>
    %461 = arith.addf %459, %460 : vector<8x128xf32>
    %462 = arith.mulf %451, %428 : vector<8x128xf32>
    %463 = arith.mulf %443, %453 : vector<8x128xf32>
    %464 = arith.addf %462, %463 : vector<8x128xf32>
    %465 = math.tanh %464 : vector<8x128xf32>
    %466 = arith.mulf %461, %465 : vector<8x128xf32>
    %c3_i32_198 = arith.constant 3 : i32
    %467 = arith.index_cast %c3_i32_198 : i32 to index
    %c0_199 = arith.constant 0 : index
    %c0_200 = arith.constant 0 : index
    %468 = vector.load %arg12[%467, %c0_199, %c0_200] : memref<4x8x512xf32, #tpu.memory_space<vmem>>, vector<1x8x512xf32>
    %469 = vector.shape_cast %468 : vector<1x8x512xf32> to vector<8x512xf32>
    %cst_201 = arith.constant dense<0.000000e+00> : vector<8x512xf32>
    %470 = tpu.matmul %466, %348, %cst_201 {dimension_numbers = #tpu.dot_dimension_numbers<[1], [0], [0], [1], [0, 0, 1, 1], [], []>} : vector<8x128xf32>, vector<128x512xf32>, vector<8x512xf32> -> vector<8x512xf32>
    %471 = arith.addf %469, %470 : vector<8x512xf32>
    %472 = vector.extract_strided_slice %471 {offsets = [0, 0], sizes = [8, 128], strides = [1, 1]} : vector<8x512xf32> to vector<8x128xf32>
    %cst_202 = arith.constant 5.000000e-01 : f32
    %473 = vector.broadcast %cst_202 : f32 to vector<8x128xf32>
    %474 = arith.mulf %473, %472 : vector<8x128xf32>
    %475 = math.tanh %474 : vector<8x128xf32>
    %cst_203 = arith.constant 5.000000e-01 : f32
    %476 = vector.broadcast %cst_203 : f32 to vector<8x128xf32>
    %477 = arith.mulf %476, %475 : vector<8x128xf32>
    %cst_204 = arith.constant 5.000000e-01 : f32
    %478 = vector.broadcast %cst_204 : f32 to vector<8x128xf32>
    %479 = arith.addf %477, %478 : vector<8x128xf32>
    %480 = vector.extract_strided_slice %471 {offsets = [0, 128], sizes = [8, 128], strides = [1, 1]} : vector<8x512xf32> to vector<8x128xf32>
    %cst_205 = arith.constant 5.000000e-01 : f32
    %481 = vector.broadcast %cst_205 : f32 to vector<8x128xf32>
    %482 = arith.mulf %481, %480 : vector<8x128xf32>
    %483 = math.tanh %482 : vector<8x128xf32>
    %cst_206 = arith.constant 5.000000e-01 : f32
    %484 = vector.broadcast %cst_206 : f32 to vector<8x128xf32>
    %485 = arith.mulf %484, %483 : vector<8x128xf32>
    %cst_207 = arith.constant 5.000000e-01 : f32
    %486 = vector.broadcast %cst_207 : f32 to vector<8x128xf32>
    %487 = arith.addf %485, %486 : vector<8x128xf32>
    %488 = vector.extract_strided_slice %471 {offsets = [0, 256], sizes = [8, 128], strides = [1, 1]} : vector<8x512xf32> to vector<8x128xf32>
    %489 = math.tanh %488 : vector<8x128xf32>
    %490 = vector.extract_strided_slice %471 {offsets = [0, 384], sizes = [8, 128], strides = [1, 1]} : vector<8x512xf32> to vector<8x128xf32>
    %cst_208 = arith.constant 5.000000e-01 : f32
    %491 = vector.broadcast %cst_208 : f32 to vector<8x128xf32>
    %492 = arith.mulf %491, %490 : vector<8x128xf32>
    %493 = math.tanh %492 : vector<8x128xf32>
    %cst_209 = arith.constant 5.000000e-01 : f32
    %494 = vector.broadcast %cst_209 : f32 to vector<8x128xf32>
    %495 = arith.mulf %494, %493 : vector<8x128xf32>
    %cst_210 = arith.constant 5.000000e-01 : f32
    %496 = vector.broadcast %cst_210 : f32 to vector<8x128xf32>
    %497 = arith.addf %495, %496 : vector<8x128xf32>
    %498 = arith.mulf %487, %464 : vector<8x128xf32>
    %499 = arith.mulf %479, %489 : vector<8x128xf32>
    %500 = arith.addf %498, %499 : vector<8x128xf32>
    %501 = math.tanh %500 : vector<8x128xf32>
    %502 = arith.mulf %497, %501 : vector<8x128xf32>
    %c4_i32_211 = arith.constant 4 : i32
    %c4_212 = arith.constant 4 : index
    %c0_213 = arith.constant 0 : index
    %c0_214 = arith.constant 0 : index
    %503 = vector.load %arg11[%c4_212, %c0_213, %c0_214] : memref<8x8x128xf32, #tpu.memory_space<vmem>>, vector<4x8x128xf32>
    %504 = vector.shape_cast %503 : vector<4x8x128xf32> to vector<32x128xf32>
    %cst_215 = arith.constant dense<0.000000e+00> : vector<32x512xf32>
    %505 = tpu.matmul %504, %347, %cst_215 {dimension_numbers = #tpu.dot_dimension_numbers<[1], [0], [0], [1], [0, 0, 1, 1], [], []>} : vector<32x128xf32>, vector<128x512xf32>, vector<32x512xf32> -> vector<32x512xf32>
    %506 = vector.broadcast %349 : vector<1x512xf32> to vector<32x512xf32>
    %507 = arith.addf %505, %506 : vector<32x512xf32>
    %508 = vector.shape_cast %507 : vector<32x512xf32> to vector<4x8x512xf32>
    %c0_216 = arith.constant 0 : index
    %c0_217 = arith.constant 0 : index
    %c0_218 = arith.constant 0 : index
    %509 = vector.load %arg12[%c0_216, %c0_217, %c0_218] : memref<4x8x512xf32, #tpu.memory_space<vmem>>, vector<4x8x512xf32>
    tpu.vector_store %arg12[%c0_216, %c0_217, %c0_218], %508 {strides = array<i32>} : memref<4x8x512xf32, #tpu.memory_space<vmem>>, vector<4x8x512xf32>,
    %c0_i32_219 = arith.constant 0 : i32
    %510 = arith.index_cast %c0_i32_219 : i32 to index
    %c0_220 = arith.constant 0 : index
    %c0_221 = arith.constant 0 : index
    %511 = vector.load %arg12[%510, %c0_220, %c0_221] : memref<4x8x512xf32, #tpu.memory_space<vmem>>, vector<1x8x512xf32>
    %512 = vector.shape_cast %511 : vector<1x8x512xf32> to vector<8x512xf32>
    %cst_222 = arith.constant dense<0.000000e+00> : vector<8x512xf32>
    %513 = tpu.matmul %502, %348, %cst_222 {dimension_numbers = #tpu.dot_dimension_numbers<[1], [0], [0], [1], [0, 0, 1, 1], [], []>} : vector<8x128xf32>, vector<128x512xf32>, vector<8x512xf32> -> vector<8x512xf32>
    %514 = arith.addf %512, %513 : vector<8x512xf32>
    %515 = vector.extract_strided_slice %514 {offsets = [0, 0], sizes = [8, 128], strides = [1, 1]} : vector<8x512xf32> to vector<8x128xf32>
    %cst_223 = arith.constant 5.000000e-01 : f32
    %516 = vector.broadcast %cst_223 : f32 to vector<8x128xf32>
    %517 = arith.mulf %516, %515 : vector<8x128xf32>
    %518 = math.tanh %517 : vector<8x128xf32>
    %cst_224 = arith.constant 5.000000e-01 : f32
    %519 = vector.broadcast %cst_224 : f32 to vector<8x128xf32>
    %520 = arith.mulf %519, %518 : vector<8x128xf32>
    %cst_225 = arith.constant 5.000000e-01 : f32
    %521 = vector.broadcast %cst_225 : f32 to vector<8x128xf32>
    %522 = arith.addf %520, %521 : vector<8x128xf32>
    %523 = vector.extract_strided_slice %514 {offsets = [0, 128], sizes = [8, 128], strides = [1, 1]} : vector<8x512xf32> to vector<8x128xf32>
    %cst_226 = arith.constant 5.000000e-01 : f32
    %524 = vector.broadcast %cst_226 : f32 to vector<8x128xf32>
    %525 = arith.mulf %524, %523 : vector<8x128xf32>
    %526 = math.tanh %525 : vector<8x128xf32>
    %cst_227 = arith.constant 5.000000e-01 : f32
    %527 = vector.broadcast %cst_227 : f32 to vector<8x128xf32>
    %528 = arith.mulf %527, %526 : vector<8x128xf32>
    %cst_228 = arith.constant 5.000000e-01 : f32
    %529 = vector.broadcast %cst_228 : f32 to vector<8x128xf32>
    %530 = arith.addf %528, %529 : vector<8x128xf32>
    %531 = vector.extract_strided_slice %514 {offsets = [0, 256], sizes = [8, 128], strides = [1, 1]} : vector<8x512xf32> to vector<8x128xf32>
    %532 = math.tanh %531 : vector<8x128xf32>
    %533 = vector.extract_strided_slice %514 {offsets = [0, 384], sizes = [8, 128], strides = [1, 1]} : vector<8x512xf32> to vector<8x128xf32>
    %cst_229 = arith.constant 5.000000e-01 : f32
    %534 = vector.broadcast %cst_229 : f32 to vector<8x128xf32>
    %535 = arith.mulf %534, %533 : vector<8x128xf32>
    %536 = math.tanh %535 : vector<8x128xf32>
    %cst_230 = arith.constant 5.000000e-01 : f32
    %537 = vector.broadcast %cst_230 : f32 to vector<8x128xf32>
    %538 = arith.mulf %537, %536 : vector<8x128xf32>
    %cst_231 = arith.constant 5.000000e-01 : f32
    %539 = vector.broadcast %cst_231 : f32 to vector<8x128xf32>
    %540 = arith.addf %538, %539 : vector<8x128xf32>
    %541 = arith.mulf %530, %500 : vector<8x128xf32>
    %542 = arith.mulf %522, %532 : vector<8x128xf32>
    %543 = arith.addf %541, %542 : vector<8x128xf32>
    %544 = math.tanh %543 : vector<8x128xf32>
    %545 = arith.mulf %540, %544 : vector<8x128xf32>
    %c1_i32_232 = arith.constant 1 : i32
    %546 = arith.index_cast %c1_i32_232 : i32 to index
    %c0_233 = arith.constant 0 : index
    %c0_234 = arith.constant 0 : index
    %547 = vector.load %arg12[%546, %c0_233, %c0_234] : memref<4x8x512xf32, #tpu.memory_space<vmem>>, vector<1x8x512xf32>
    %548 = vector.shape_cast %547 : vector<1x8x512xf32> to vector<8x512xf32>
    %cst_235 = arith.constant dense<0.000000e+00> : vector<8x512xf32>
    %549 = tpu.matmul %545, %348, %cst_235 {dimension_numbers = #tpu.dot_dimension_numbers<[1], [0], [0], [1], [0, 0, 1, 1], [], []>} : vector<8x128xf32>, vector<128x512xf32>, vector<8x512xf32> -> vector<8x512xf32>
    %550 = arith.addf %548, %549 : vector<8x512xf32>
    %551 = vector.extract_strided_slice %550 {offsets = [0, 0], sizes = [8, 128], strides = [1, 1]} : vector<8x512xf32> to vector<8x128xf32>
    %cst_236 = arith.constant 5.000000e-01 : f32
    %552 = vector.broadcast %cst_236 : f32 to vector<8x128xf32>
    %553 = arith.mulf %552, %551 : vector<8x128xf32>
    %554 = math.tanh %553 : vector<8x128xf32>
    %cst_237 = arith.constant 5.000000e-01 : f32
    %555 = vector.broadcast %cst_237 : f32 to vector<8x128xf32>
    %556 = arith.mulf %555, %554 : vector<8x128xf32>
    %cst_238 = arith.constant 5.000000e-01 : f32
    %557 = vector.broadcast %cst_238 : f32 to vector<8x128xf32>
    %558 = arith.addf %556, %557 : vector<8x128xf32>
    %559 = vector.extract_strided_slice %550 {offsets = [0, 128], sizes = [8, 128], strides = [1, 1]} : vector<8x512xf32> to vector<8x128xf32>
    %cst_239 = arith.constant 5.000000e-01 : f32
    %560 = vector.broadcast %cst_239 : f32 to vector<8x128xf32>
    %561 = arith.mulf %560, %559 : vector<8x128xf32>
    %562 = math.tanh %561 : vector<8x128xf32>
    %cst_240 = arith.constant 5.000000e-01 : f32
    %563 = vector.broadcast %cst_240 : f32 to vector<8x128xf32>
    %564 = arith.mulf %563, %562 : vector<8x128xf32>
    %cst_241 = arith.constant 5.000000e-01 : f32
    %565 = vector.broadcast %cst_241 : f32 to vector<8x128xf32>
    %566 = arith.addf %564, %565 : vector<8x128xf32>
    %567 = vector.extract_strided_slice %550 {offsets = [0, 256], sizes = [8, 128], strides = [1, 1]} : vector<8x512xf32> to vector<8x128xf32>
    %568 = math.tanh %567 : vector<8x128xf32>
    %569 = vector.extract_strided_slice %550 {offsets = [0, 384], sizes = [8, 128], strides = [1, 1]} : vector<8x512xf32> to vector<8x128xf32>
    %cst_242 = arith.constant 5.000000e-01 : f32
    %570 = vector.broadcast %cst_242 : f32 to vector<8x128xf32>
    %571 = arith.mulf %570, %569 : vector<8x128xf32>
    %572 = math.tanh %571 : vector<8x128xf32>
    %cst_243 = arith.constant 5.000000e-01 : f32
    %573 = vector.broadcast %cst_243 : f32 to vector<8x128xf32>
    %574 = arith.mulf %573, %572 : vector<8x128xf32>
    %cst_244 = arith.constant 5.000000e-01 : f32
    %575 = vector.broadcast %cst_244 : f32 to vector<8x128xf32>
    %576 = arith.addf %574, %575 : vector<8x128xf32>
    %577 = arith.mulf %566, %543 : vector<8x128xf32>
    %578 = arith.mulf %558, %568 : vector<8x128xf32>
    %579 = arith.addf %577, %578 : vector<8x128xf32>
    %580 = math.tanh %579 : vector<8x128xf32>
    %581 = arith.mulf %576, %580 : vector<8x128xf32>
    %c2_i32_245 = arith.constant 2 : i32
    %582 = arith.index_cast %c2_i32_245 : i32 to index
    %c0_246 = arith.constant 0 : index
    %c0_247 = arith.constant 0 : index
    %583 = vector.load %arg12[%582, %c0_246, %c0_247] : memref<4x8x512xf32, #tpu.memory_space<vmem>>, vector<1x8x512xf32>
    %584 = vector.shape_cast %583 : vector<1x8x512xf32> to vector<8x512xf32>
    %cst_248 = arith.constant dense<0.000000e+00> : vector<8x512xf32>
    %585 = tpu.matmul %581, %348, %cst_248 {dimension_numbers = #tpu.dot_dimension_numbers<[1], [0], [0], [1], [0, 0, 1, 1], [], []>} : vector<8x128xf32>, vector<128x512xf32>, vector<8x512xf32> -> vector<8x512xf32>
    %586 = arith.addf %584, %585 : vector<8x512xf32>
    %587 = vector.extract_strided_slice %586 {offsets = [0, 0], sizes = [8, 128], strides = [1, 1]} : vector<8x512xf32> to vector<8x128xf32>
    %cst_249 = arith.constant 5.000000e-01 : f32
    %588 = vector.broadcast %cst_249 : f32 to vector<8x128xf32>
    %589 = arith.mulf %588, %587 : vector<8x128xf32>
    %590 = math.tanh %589 : vector<8x128xf32>
    %cst_250 = arith.constant 5.000000e-01 : f32
    %591 = vector.broadcast %cst_250 : f32 to vector<8x128xf32>
    %592 = arith.mulf %591, %590 : vector<8x128xf32>
    %cst_251 = arith.constant 5.000000e-01 : f32
    %593 = vector.broadcast %cst_251 : f32 to vector<8x128xf32>
    %594 = arith.addf %592, %593 : vector<8x128xf32>
    %595 = vector.extract_strided_slice %586 {offsets = [0, 128], sizes = [8, 128], strides = [1, 1]} : vector<8x512xf32> to vector<8x128xf32>
    %cst_252 = arith.constant 5.000000e-01 : f32
    %596 = vector.broadcast %cst_252 : f32 to vector<8x128xf32>
    %597 = arith.mulf %596, %595 : vector<8x128xf32>
    %598 = math.tanh %597 : vector<8x128xf32>
    %cst_253 = arith.constant 5.000000e-01 : f32
    %599 = vector.broadcast %cst_253 : f32 to vector<8x128xf32>
    %600 = arith.mulf %599, %598 : vector<8x128xf32>
    %cst_254 = arith.constant 5.000000e-01 : f32
    %601 = vector.broadcast %cst_254 : f32 to vector<8x128xf32>
    %602 = arith.addf %600, %601 : vector<8x128xf32>
    %603 = vector.extract_strided_slice %586 {offsets = [0, 256], sizes = [8, 128], strides = [1, 1]} : vector<8x512xf32> to vector<8x128xf32>
    %604 = math.tanh %603 : vector<8x128xf32>
    %605 = vector.extract_strided_slice %586 {offsets = [0, 384], sizes = [8, 128], strides = [1, 1]} : vector<8x512xf32> to vector<8x128xf32>
    %cst_255 = arith.constant 5.000000e-01 : f32
    %606 = vector.broadcast %cst_255 : f32 to vector<8x128xf32>
    %607 = arith.mulf %606, %605 : vector<8x128xf32>
    %608 = math.tanh %607 : vector<8x128xf32>
    %cst_256 = arith.constant 5.000000e-01 : f32
    %609 = vector.broadcast %cst_256 : f32 to vector<8x128xf32>
    %610 = arith.mulf %609, %608 : vector<8x128xf32>
    %cst_257 = arith.constant 5.000000e-01 : f32
    %611 = vector.broadcast %cst_257 : f32 to vector<8x128xf32>
    %612 = arith.addf %610, %611 : vector<8x128xf32>
    %613 = arith.mulf %602, %579 : vector<8x128xf32>
    %614 = arith.mulf %594, %604 : vector<8x128xf32>
    %615 = arith.addf %613, %614 : vector<8x128xf32>
    %616 = math.tanh %615 : vector<8x128xf32>
    %617 = arith.mulf %612, %616 : vector<8x128xf32>
    %c3_i32_258 = arith.constant 3 : i32
    %618 = arith.index_cast %c3_i32_258 : i32 to index
    %c0_259 = arith.constant 0 : index
    %c0_260 = arith.constant 0 : index
    %619 = vector.load %arg12[%618, %c0_259, %c0_260] : memref<4x8x512xf32, #tpu.memory_space<vmem>>, vector<1x8x512xf32>
    %620 = vector.shape_cast %619 : vector<1x8x512xf32> to vector<8x512xf32>
    %cst_261 = arith.constant dense<0.000000e+00> : vector<8x512xf32>
    %621 = tpu.matmul %617, %348, %cst_261 {dimension_numbers = #tpu.dot_dimension_numbers<[1], [0], [0], [1], [0, 0, 1, 1], [], []>} : vector<8x128xf32>, vector<128x512xf32>, vector<8x512xf32> -> vector<8x512xf32>
    %622 = arith.addf %620, %621 : vector<8x512xf32>
    %623 = vector.extract_strided_slice %622 {offsets = [0, 0], sizes = [8, 128], strides = [1, 1]} : vector<8x512xf32> to vector<8x128xf32>
    %cst_262 = arith.constant 5.000000e-01 : f32
    %624 = vector.broadcast %cst_262 : f32 to vector<8x128xf32>
    %625 = arith.mulf %624, %623 : vector<8x128xf32>
    %626 = math.tanh %625 : vector<8x128xf32>
    %cst_263 = arith.constant 5.000000e-01 : f32
    %627 = vector.broadcast %cst_263 : f32 to vector<8x128xf32>
    %628 = arith.mulf %627, %626 : vector<8x128xf32>
    %cst_264 = arith.constant 5.000000e-01 : f32
    %629 = vector.broadcast %cst_264 : f32 to vector<8x128xf32>
    %630 = arith.addf %628, %629 : vector<8x128xf32>
    %631 = vector.extract_strided_slice %622 {offsets = [0, 128], sizes = [8, 128], strides = [1, 1]} : vector<8x512xf32> to vector<8x128xf32>
    %cst_265 = arith.constant 5.000000e-01 : f32
    %632 = vector.broadcast %cst_265 : f32 to vector<8x128xf32>
    %633 = arith.mulf %632, %631 : vector<8x128xf32>
    %634 = math.tanh %633 : vector<8x128xf32>
    %cst_266 = arith.constant 5.000000e-01 : f32
    %635 = vector.broadcast %cst_266 : f32 to vector<8x128xf32>
    %636 = arith.mulf %635, %634 : vector<8x128xf32>
    %cst_267 = arith.constant 5.000000e-01 : f32
    %637 = vector.broadcast %cst_267 : f32 to vector<8x128xf32>
    %638 = arith.addf %636, %637 : vector<8x128xf32>
    %639 = vector.extract_strided_slice %622 {offsets = [0, 256], sizes = [8, 128], strides = [1, 1]} : vector<8x512xf32> to vector<8x128xf32>
    %640 = math.tanh %639 : vector<8x128xf32>
    %641 = vector.extract_strided_slice %622 {offsets = [0, 384], sizes = [8, 128], strides = [1, 1]} : vector<8x512xf32> to vector<8x128xf32>
    %cst_268 = arith.constant 5.000000e-01 : f32
    %642 = vector.broadcast %cst_268 : f32 to vector<8x128xf32>
    %643 = arith.mulf %642, %641 : vector<8x128xf32>
    %644 = math.tanh %643 : vector<8x128xf32>
    %cst_269 = arith.constant 5.000000e-01 : f32
    %645 = vector.broadcast %cst_269 : f32 to vector<8x128xf32>
    %646 = arith.mulf %645, %644 : vector<8x128xf32>
    %cst_270 = arith.constant 5.000000e-01 : f32
    %647 = vector.broadcast %cst_270 : f32 to vector<8x128xf32>
    %648 = arith.addf %646, %647 : vector<8x128xf32>
    %649 = arith.mulf %638, %615 : vector<8x128xf32>
    %650 = arith.mulf %630, %640 : vector<8x128xf32>
    %651 = arith.addf %649, %650 : vector<8x128xf32>
    %652 = math.tanh %651 : vector<8x128xf32>
    %653 = arith.mulf %648, %652 : vector<8x128xf32>
    %c4_i32_271 = arith.constant 4 : i32
    %c0_272 = arith.constant 0 : index
    %c0_273 = arith.constant 0 : index
    %654 = vector.load %arg8[%c0_272, %c0_273] : memref<1x128xf32, #tpu.memory_space<vmem>>, vector<1x128xf32>
    %655 = vector.broadcast %654 : vector<1x128xf32> to vector<8x128xf32>
    %656 = arith.mulf %653, %655 : vector<8x128xf32>
    %cst_274 = arith.constant dense<0.000000e+00> : vector<8xf32>
    %657 = vector.multi_reduction <add>, %656, %cst_274 [1] : vector<8x128xf32> to vector<8xf32>
    %658 = vector.shape_cast %657 : vector<8xf32> to vector<8x1xf32>
    %c0_275 = arith.constant 0 : index
    %c0_276 = arith.constant 0 : index
    %659 = vector.load %arg9[%c0_275, %c0_276] : memref<1x1xf32, #tpu.memory_space<vmem>>, vector<1x1xf32>
    %660 = vector.broadcast %659 : vector<1x1xf32> to vector<8x1xf32>
    %661 = arith.addf %658, %660 : vector<8x1xf32>
    %c0_277 = arith.constant 0 : index
    %c0_278 = arith.constant 0 : index
    %662 = vector.load %arg10[%c0_277, %c0_278] : memref<8x1xf32, #tpu.memory_space<vmem>>, vector<8x1xf32>
    tpu.vector_store %arg10[%c0_277, %c0_278], %661 {strides = array<i32>} : memref<8x1xf32, #tpu.memory_space<vmem>>, vector<8x1xf32>,
    return
  }
  func.func @transform_0(%arg0: i32) -> (i32, i32, i32) {
    %c0_i32 = arith.constant 0 : i32
    %c0_i32_0 = arith.constant 0 : i32
    %c0_i32_1 = arith.constant 0 : i32
    return %c0_i32, %arg0, %c0_i32_0 : i32, i32, i32
  }
  func.func @transform_1(%arg0: i32) -> (i32, i32) {
    %c0_i32 = arith.constant 0 : i32
    %c0_i32_0 = arith.constant 0 : i32
    %c0_i32_1 = arith.constant 0 : i32
    return %c0_i32, %c0_i32_0 : i32, i32
  }
  func.func @transform_2(%arg0: i32) -> (i32, i32) {
    %c0_i32 = arith.constant 0 : i32
    %c0_i32_0 = arith.constant 0 : i32
    %c0_i32_1 = arith.constant 0 : i32
    return %c0_i32, %c0_i32_0 : i32, i32
  }
  func.func @transform_3(%arg0: i32) -> (i32, i32) {
    %c0_i32 = arith.constant 0 : i32
    %c0_i32_0 = arith.constant 0 : i32
    %c0_i32_1 = arith.constant 0 : i32
    return %c0_i32, %c0_i32_0 : i32, i32
  }
  func.func @transform_4(%arg0: i32) -> (i32, i32) {
    %c0_i32 = arith.constant 0 : i32
    %c0_i32_0 = arith.constant 0 : i32
    %c0_i32_1 = arith.constant 0 : i32
    return %c0_i32, %c0_i32_0 : i32, i32
  }
  func.func @transform_5(%arg0: i32) -> (i32, i32) {
    %c0_i32 = arith.constant 0 : i32
    %c0_i32_0 = arith.constant 0 : i32
    %c0_i32_1 = arith.constant 0 : i32
    return %c0_i32, %c0_i32_0 : i32, i32
  }
  func.func @transform_6(%arg0: i32) -> (i32, i32) {
    %c0_i32 = arith.constant 0 : i32
    %c0_i32_0 = arith.constant 0 : i32
    %c0_i32_1 = arith.constant 0 : i32
    return %c0_i32, %c0_i32_0 : i32, i32
  }
  func.func @transform_7(%arg0: i32) -> (i32, i32) {
    %c0_i32 = arith.constant 0 : i32
    %c0_i32_0 = arith.constant 0 : i32
    %c0_i32_1 = arith.constant 0 : i32
    return %c0_i32, %c0_i32_0 : i32, i32
  }
  func.func @transform_8(%arg0: i32) -> (i32, i32) {
    %c0_i32 = arith.constant 0 : i32
    %c0_i32_0 = arith.constant 0 : i32
    %c0_i32_1 = arith.constant 0 : i32
    return %c0_i32, %c0_i32_0 : i32, i32
  }
  func.func @transform_9(%arg0: i32) -> (i32, i32) {
    %c0_i32 = arith.constant 0 : i32
    %c0_i32_0 = arith.constant 0 : i32
    return %arg0, %c0_i32 : i32, i32
  }
}

</mosaic_0001>

<bundles_post_ra>
// kernel: tpu_custom_call.1
= control target key start
LH: loop header
LB: loop body
LE: loop exit
PB: predicated region body
PF: predicated region fallthrough
CT: control target
= control target key end

     0   :  { %s6687_s0 = inlined_call_operand.hbm [shape: f32[8,8,8], index: 0, kind: input, shape index: {}]   ;;  %s6688_s1 = inlined_call_operand.hbm [shape: f32[8,512], index: 1, kind: input, shape index: {}]   ;;  %s6689_s2 = inlined_call_operand.hbm [shape: f32[128,512], index: 2, kind: input, shape index: {}]   ;;  %s6690_s3 = inlined_call_operand.vmem [shape: f32[1,512], index: 3, kind: input, shape index: {}]   ;;  %s6691_s4 = inlined_call_operand.hbm [shape: f32[128,512], index: 4, kind: input, shape index: {}]   ;;  %s6692_s5 = inlined_call_operand.hbm [shape: f32[128,512], index: 5, kind: input, shape index: {}]   ;;  %s6693_s6 = inlined_call_operand.vmem [shape: f32[1,512], index: 6, kind: input, shape index: {}]   ;;  %s6694_s7 = inlined_call_operand.vmem [shape: f32[1,128], index: 7, kind: input, shape index: {}]   ;;  %s6695_s8 = inlined_call_operand.<no memory space> [shape: f32[1,1], index: 8, kind: input, shape index: {}]   ;;  %s6696_s9 = inlined_call_operand.vmem [shape: f32[8,1], index: 9, kind: output, shape index: {}]  }
   0x1   :  { %v14_v0 = vstv %s6695_s8 }
   0x2   :  { %15 = vst [vmem:[#allocation4] sm:$0x1] %v14_v0 }
   0x3   :  { %16 = vsyncpa [#allocation6], 0 }
   0x4   :  { %17 = vsyncpa [#allocation8], 0 }
   0x5   :  { %18 = vsyncpa [#allocation11], 0  ;;  %s5475_s11 = smov [#allocation7]   ;;  %s5359_s15 = scalar_lea.hbm %s6688_s1, 512 }
   0x6   :  { %s37_s12 = sshll.u32 %s5475_s11, 4  ;;  %p5360_p0 = scmp.ne.s32.totalorder %s6688_s1, %s5359_s15  ;;  %s38_s12 = int_to_ptr.vmem [resolvable:$true] %s37_s12 }
   0x7   :  { %p5363_p1 = scmp.lt.u32.totalorder %s5359_s15, %s6688_s1 }
   0x9   :  { %p5365_p2 = pnand %p5363_p1, %p5360_p0 }
   0xb   :  { %5368 = shalt.err (!%p5365_p2)
}
   0xc   :  { %s5369_s8 = scalar_lea.vmem %s38_s12, 512  ;;  %p5374_p4 = scmp.lt.s32.totalorder %s38_s12, %s38_s12 }
   0xd   :  { %p5370_p3 = scmp.ne.s32.totalorder %s38_s12, %s5369_s8  ;;  %p5375_p5 = scmp.lt.s32.totalorder %s5369_s8, %s5369_s8 }
   0xf   :  { %p5376_p6 = por %p5375_p5, %p5374_p4 }
  0x11   :  { %p5377_p7 = pnand %p5376_p6, %p5370_p3 }
  0x13   :  { %5380 = shalt.err (!%p5377_p7)
}
  0x14   :  { %40 = dma.hbm_to_vmem [thread:$0]  %s6688_s1, 512, %s38_s12, [#allocation8]  }
  0x15   :  { %s5476_s22 = smov [#allocation10]   ;;  %s5477_s24 = smov [#allocation5]  }
  0x16   :  { %s60_s23 = sshll.u32 %s5476_s22, 4  ;;  %s24_s25 = sshll.u32 %s5477_s24, 4  ;;  %s61_s23 = int_to_ptr.vmem [resolvable:$true] %s60_s23  ;;  %s25_s25 = int_to_ptr.vmem [resolvable:$true] %s24_s25 }
  0x17   :  { %s5381_s28 = scalar_lea.hbm %s6691_s4, 8192 }
  0x18   :  { %p5382_p8 = scmp.ne.s32.totalorder %s6691_s4, %s5381_s28  ;;  %p5385_p9 = scmp.lt.u32.totalorder %s5381_s28, %s6691_s4 }
  0x1a   :  { %p5387_p10 = pnand %p5385_p9, %p5382_p8 }
  0x1c   :  { %5390 = shalt.err (!%p5387_p10)
}
  0x1d   :  { %s5391_s1 = scalar_lea.vmem %s61_s23, 8192  ;;  %p5396_p12 = scmp.lt.s32.totalorder %s61_s23, %s61_s23 }
  0x1e   :  { %p5392_p11 = scmp.ne.s32.totalorder %s61_s23, %s5391_s1  ;;  %p5397_p13 = scmp.lt.s32.totalorder %s5391_s1, %s5391_s1 }
  0x20   :  { %p5398_p0 = por %p5397_p13, %p5396_p12 }
  0x22   :  { %p5399_p1 = pnand %p5398_p0, %p5392_p11 }
  0x24   :  { %5402 = shalt.err (!%p5399_p1)
}
  0x25   :  { %s5478_s12 = smov 512   ;;  %s5479_s13 = smov 32  }
  0x26   :  { %66 = dma.hbm_to_vmem [thread:$0]  %s6691_s4, 8192, %s61_s23, [#allocation11], %s5478_s12, %s5478_s12, %s5479_s13  }
  0x27   :  { %s5403_s18 = scalar_lea.hbm %s6687_s0, 1024 }
  0x28   :  { %p5404_p2 = scmp.ne.s32.totalorder %s6687_s0, %s5403_s18  ;;  %p5407_p3 = scmp.lt.u32.totalorder %s5403_s18, %s6687_s0 }
  0x2a   :  { %p5409_p4 = pnand %p5407_p3, %p5404_p2 }
  0x2c   :  { %5412 = shalt.err (!%p5409_p4)
}
  0x2d   :  { %s5413_s22 = scalar_lea.vmem %s25_s25, 1024  ;;  %p5418_p6 = scmp.lt.s32.totalorder %s25_s25, %s25_s25 }
  0x2e   :  { %p5414_p5 = scmp.ne.s32.totalorder %s25_s25, %s5413_s22  ;;  %p5419_p7 = scmp.lt.s32.totalorder %s5413_s22, %s5413_s22 }
  0x30   :  { %p5420_p8 = por %p5419_p7, %p5418_p6 }
  0x32   :  { %p5421_p9 = pnand %p5420_p8, %p5414_p5 }
  0x34   :  { %5424 = shalt.err (!%p5421_p9)
}
  0x35   :  { %s5480_s4 = smov 128   ;;  %s5481_s23 = smov 8  }
  0x36   :  { %30 = dma.hbm_to_vmem [thread:$0]  %s6687_s0, 1024, %s25_s25, [#allocation6], %s5480_s4, %s5480_s4, %s5481_s23  }
  0x37   :  { %s5482_s27 = smov [#allocation9]   ;;  %s5483_s29 = smov [#allocation12]  }
  0x38   :  { %s46_s28 = sshll.u32 %s5482_s27, 4  ;;  %s72_s30 = sshll.u32 %s5483_s29, 4  ;;  %s47_s28 = int_to_ptr.vmem [resolvable:$true] %s46_s28  ;;  %s73_s30 = int_to_ptr.vmem [resolvable:$true] %s72_s30 }
  0x39   :  { %s5425_s1 = scalar_lea.hbm %s6689_s2, 8192 }
  0x3a   :  { %p5426_p10 = scmp.ne.s32.totalorder %s6689_s2, %s5425_s1  ;;  %p5429_p11 = scmp.lt.u32.totalorder %s5425_s1, %s6689_s2 }
  0x3c   :  { %p5431_p12 = pnand %p5429_p11, %p5426_p10 }
  0x3e   :  { %5434 = shalt.err (!%p5431_p12)
}
  0x3f   :  { %s5435_s0 = scalar_lea.vmem %s47_s28, 8192  ;;  %p5440_p0 = scmp.lt.s32.totalorder %s47_s28, %s47_s28 }
  0x40   :  { %p5436_p13 = scmp.ne.s32.totalorder %s47_s28, %s5435_s0  ;;  %p5441_p1 = scmp.lt.s32.totalorder %s5435_s0, %s5435_s0 }
  0x42   :  { %p5442_p2 = por %p5441_p1, %p5440_p0 }
  0x44   :  { %p5443_p3 = pnand %p5442_p2, %p5436_p13 }
  0x46   :  { %5446 = shalt.err (!%p5443_p3)
}
  0x47   :  { %52 = dma.hbm_to_vmem [thread:$0]  %s6689_s2, 8192, %s47_s28, [#allocation8], %s5478_s12, %s5478_s12, %s5479_s13  }
  0x48   :  { %s5447_s20 = scalar_lea.hbm %s6692_s5, 8192 }
  0x49   :  { %p5448_p4 = scmp.ne.s32.totalorder %s6692_s5, %s5447_s20  ;;  %p5451_p5 = scmp.lt.u32.totalorder %s5447_s20, %s6692_s5 }
  0x4b   :  { %p5453_p6 = pnand %p5451_p5, %p5448_p4 }
  0x4d   :  { %5456 = shalt.err (!%p5453_p6)
}
  0x4e   :  { %s5457_s24 = scalar_lea.vmem %s73_s30, 8192  ;;  %p5462_p8 = scmp.lt.s32.totalorder %s73_s30, %s73_s30 }
  0x4f   :  { %p5458_p7 = scmp.ne.s32.totalorder %s73_s30, %s5457_s24  ;;  %p5463_p9 = scmp.lt.s32.totalorder %s5457_s24, %s5457_s24 }
  0x51   :  { %p5464_p10 = por %p5463_p9, %p5462_p8 }
  0x53   :  { %p5465_p11 = pnand %p5464_p10, %p5458_p7 }
  0x55   :  { %5468 = shalt.err (!%p5465_p11)
}
  0x56   :  { %78 = dma.hbm_to_vmem [thread:$0]  %s6692_s5, 8192, %s73_s30, [#allocation11], %s5478_s12, %s5478_s12, %s5479_s13  }
  0x57   :  { %5469 = dma.done.wait [#allocation6], 1024  }
  0x58   :  { %5470 = vsyncadd [#allocation6], 4294966272 }
  0x59   :  { %5471 = dma.done.wait [#allocation8], 8704  }
  0x5a   :  { %5472 = vsyncadd [#allocation8], 4294958592 }
  0x5b   :  { %5473 = dma.done.wait [#allocation11], 16384  }
  0x5c   :  { %5474 = vsyncadd [#allocation11], 4294950912  ;;  %v6701_v1 = vmov 0.0   ;;  %v5609_v2 = vld [vmem:[#allocation7 + $0x8] sm:$0xff]  ;;  %v5611_v3 = vld [vmem:[#allocation7 + $0x18] sm:$0xff]  ;;  %vm194_vm0 = vcmask 64512  }
  0x5d   :  { %271 = vmatprep.mubr.f32.mxu0 %v6701_v1  ;;  %360 = vmatprep.mubr.f32.mxu1 %v6701_v1  ;;  %v5613_v4 = vld [vmem:[#allocation7] sm:$0xff]  ;;  %v5617_v5 = vld [vmem:[#allocation7 + $0x10] sm:$0xff]  ;;  %v105_v6 = vld [vmem:[#allocation9 + $0x8] sm:$0xff]  ;;  %vm3882_vm1 = vcmask 7168  }
  0x5e   :  { %207 = vmatprep.subr.mxu0 %v5609_v2  ;;  %296 = vmatprep.subr.mxu1 %v5611_v3  ;;  %v109_v7 = vld [vmem:[#allocation9 + $0x28] sm:$0xff]  ;;  %v107_v9 = vld [vmem:[#allocation9 + $0x18] sm:$0xff]  ;;  %v169_v11 = vld [vmem:[#allocation5] sm:$0xff] }
  0x5f   :  { %208 = vmatpush1.msra.mxu0 %v5613_v4  ;;  %297 = vmatpush1.msra.mxu1 %v5617_v5  ;;  %v5621_v8 = vpack.c.bf16 %v109_v7, %v105_v6  ;;  %v111_v10 = vld [vmem:[#allocation9 + $0x38] sm:$0xff]  ;;  %v104_v13 = vld [vmem:[#allocation9] sm:$0xff]  ;;  %v106_v15 = vld [vmem:[#allocation9 + $0x10] sm:$0xff] }
  0x60   :  { %v5623_v12 = vpack.c.bf16 %v111_v10, %v107_v9  ;;  %3891 = vmatmul.mubr.msk.f32.vlgmr.msra.gmra.mrb[0].mxu0 %vm194_vm0, %v169_v11  ;;  %3895 = vmatmul.mubr.msk.f32.vlgmr.msra.gmra.mrb[0].mxu1 %vm194_vm0, %v169_v11  ;;  %v108_v14 = vld [vmem:[#allocation9 + $0x20] sm:$0xff]  ;;  %v110_v17 = vld [vmem:[#allocation9 + $0x30] sm:$0xff]  ;;  %v113_v18 = vld [vmem:[#allocation9 + $0x48] sm:$0xff] }
  0x61   :  { %3910 = vmatprep.subr.bf16.mxu0 %v5621_v8  ;;  %v5628_v16 = vpack.c.bf16 %v108_v14, %v104_v13  ;;  %v117_v19 = vld [vmem:[#allocation9 + $0x68] sm:$0xff]  ;;  %277 = vmatprep.mubr.f32.mxu0 %v6701_v1  ;;  %v5632_v20 = vpack.c.bf16 %v110_v17, %v106_v15  ;;  %v115_v22 = vld [vmem:[#allocation9 + $0x58] sm:$0xff]  ;;  %v112_v24 = vld [vmem:[#allocation9 + $0x40] sm:$0xff] }
  0x62   :  { %3942 = vmatprep.subr.bf16.mxu1 %v5623_v12  ;;  %v5634_v21 = vpack.c.bf16 %v117_v19, %v113_v18  ;;  %v119_v23 = vld [vmem:[#allocation9 + $0x78] sm:$0xff]  ;;  %366 = vmatprep.mubr.f32.mxu1 %v6701_v1  ;;  %v116_v26 = vld [vmem:[#allocation9 + $0x60] sm:$0xff]  ;;  %v114_v27 = vld [vmem:[#allocation9 + $0x50] sm:$0xff] }
  0x63   :  { %3912 = vmatpush1.bf16.msra.mxu0 %v5628_v16  ;;  %v5638_v25 = vpack.c.bf16 %v119_v23, %v115_v22  ;;  %v118_v28 = vld [vmem:[#allocation9 + $0x70] sm:$0xff]  ;;  %3944 = vmatpush1.bf16.msra.mxu1 %v5632_v20  ;;  %v5642_v29 = vpack.c.bf16 %v116_v26, %v112_v24  ;;  %v121_v31 = vld [vmem:[#allocation9 + $0x88] sm:$0xff]  ;;  %v123_v33 = vld [vmem:[#allocation9 + $0x98] sm:$0xff] }
  0x64   :  { %3914 = vmatprep.subr.bf16.mxu0 %v5634_v21  ;;  %v5644_v30 = vpack.c.bf16 %v118_v28, %v114_v27  ;;  %v125_v32 = vld [vmem:[#allocation9 + $0xa8] sm:$0xff]  ;;  %v127_v35 = vld [vmem:[#allocation9 + $0xb8] sm:$0xff]  ;;  %v120_v36 = vld [vmem:[#allocation9 + $0x80] sm:$0xff] }
  0x65   :  { %3946 = vmatprep.subr.bf16.mxu1 %v5638_v25  ;;  %v5647_v34 = vpack.c.bf16 %v125_v32, %v121_v31  ;;  %v124_v37 = vld [vmem:[#allocation9 + $0xa0] sm:$0xff]  ;;  %v5649_v38 = vpack.c.bf16 %v127_v35, %v123_v33  ;;  %v122_v39 = vld [vmem:[#allocation9 + $0x90] sm:$0xff]  ;;  %v129_v41 = vld [vmem:[#allocation9 + $0xc8] sm:$0xff] }
  0x66   :  { %v126_v40 = vld [vmem:[#allocation9 + $0xb0] sm:$0xff]  ;;  %v5652_v42 = vpack.c.bf16 %v124_v37, %v120_v36  ;;  %v133_v43 = vld [vmem:[#allocation9 + $0xe8] sm:$0xff]  ;;  %v131_v44 = vld [vmem:[#allocation9 + $0xd8] sm:$0xff] }
  0x67   :  { %3916 = vmatpush1.bf16.msra.mxu0 %v5642_v29  ;;  %v135_v45 = vld [vmem:[#allocation9 + $0xf8] sm:$0xff]  ;;  %3948 = vmatpush1.bf16.msra.mxu1 %v5644_v30  ;;  %v5656_v46 = vpack.c.bf16 %v126_v40, %v122_v39  ;;  %v5658_v47 = vpack.c.bf16 %v133_v43, %v129_v41  ;;  %v128_v48 = vld [vmem:[#allocation9 + $0xc0] sm:$0xff]  ;;  %v130_v50 = vld [vmem:[#allocation9 + $0xd0] sm:$0xff] }
  0x68   :  { %3918 = vmatprep.subr.bf16.mxu0 %v5647_v34  ;;  %v132_v49 = vld [vmem:[#allocation9 + $0xe0] sm:$0xff]  ;;  %3950 = vmatprep.subr.bf16.mxu1 %v5649_v38  ;;  %v5661_v51 = vpack.c.bf16 %v135_v45, %v131_v44  ;;  %v134_v52 = vld [vmem:[#allocation9 + $0xf0] sm:$0xff]  ;;  %v137_v53 = vld [vmem:[#allocation9 + $0x108] sm:$0xff] }
  0x69   :  { %v141_v54 = vld [vmem:[#allocation9 + $0x128] sm:$0xff]  ;;  %v139_v55 = vld [vmem:[#allocation9 + $0x118] sm:$0xff]  ;;  %v5664_v57 = vpack.c.bf16 %v132_v49, %v128_v48  ;;  %v136_v58 = vld [vmem:[#allocation9 + $0x100] sm:$0xff]  ;;  %v5668_v59 = vpack.c.bf16 %v134_v52, %v130_v50 }
  0x6a   :  { %v143_v56 = vld [vmem:[#allocation9 + $0x138] sm:$0xff]  ;;  %v5670_v60 = vpack.c.bf16 %v141_v54, %v137_v53  ;;  %v140_v61 = vld [vmem:[#allocation9 + $0x120] sm:$0xff]  ;;  %v138_v62 = vld [vmem:[#allocation9 + $0x110] sm:$0xff] }
  0x6b   :  { %3920 = vmatpush1.bf16.msra.mxu0 %v5652_v42  ;;  %3952 = vmatpush1.bf16.msra.mxu1 %v5656_v46  ;;  %v170_v63 = vld [vmem:[#allocation5 + $0x8] sm:$0xff]  ;;  %v5673_v0 = vpack.c.bf16 %v143_v56, %v139_v55  ;;  %v142_v6 = vld [vmem:[#allocation9 + $0x130] sm:$0xff]  ;;  %v147_v10 = vld [vmem:[#allocation9 + $0x158] sm:$0xff]  ;;  %v5679_v13 = vpack.c.bf16 %v140_v61, %v136_v58 }
  0x6c   :  { %3922 = vmatprep.subr.bf16.mxu0 %v5658_v47  ;;  %3954 = vmatprep.subr.bf16.mxu1 %v5661_v51  ;;  %v145_v7 = vld [vmem:[#allocation9 + $0x148] sm:$0xff]  ;;  %v151_v11 = vld [vmem:[#allocation9 + $0x178] sm:$0xff]  ;;  %v171_v14 = vld [vmem:[#allocation5 + $0x10] sm:$0xff]  ;;  %v5684_v15 = vpack.c.bf16 %v142_v6, %v138_v62  ;;  %v174_v6 = vlaneseq }
  0x6d   :  { %3892 = vmatmul.mubr.msk.f32.gmra.mrb[2].mxu0 %vm194_vm0, %v170_v63  ;;  %v149_v9 = vld [vmem:[#allocation9 + $0x168] sm:$0xff]  ;;  %3896 = vmatmul.mubr.msk.f32.gmra.mrb[2].mxu1 %vm194_vm0, %v170_v63  ;;  %v144_v18 = vld [vmem:[#allocation9 + $0x140] sm:$0xff]  ;;  %v146_v22 = vld [vmem:[#allocation9 + $0x150] sm:$0xff]  ;;  %v5689_v23 = vpack.c.bf16 %v151_v11, %v147_v10 }
  0x6e   :  { %283 = vmatprep.mubr.f32.mxu0 %v6701_v1  ;;  %372 = vmatprep.mubr.f32.mxu1 %v6701_v1  ;;  %v5686_v17 = vpack.c.bf16 %v149_v9, %v145_v7  ;;  %v148_v19 = vld [vmem:[#allocation9 + $0x160] sm:$0xff]  ;;  %v150_v24 = vld [vmem:[#allocation9 + $0x170] sm:$0xff]  ;;  %v153_v26 = vld [vmem:[#allocation9 + $0x188] sm:$0xff]  ;;  %v5771_v7 = vshrl.u32 %v174_v6, 7 }
  0x6f   :  { %3924 = vmatpush1.bf16.msra.mxu0 %v5664_v57  ;;  %3956 = vmatpush1.bf16.msra.mxu1 %v5668_v59  ;;  %v157_v27 = vld [vmem:[#allocation9 + $0x1a8] sm:$0xff]  ;;  %v155_v28 = vld [vmem:[#allocation9 + $0x198] sm:$0xff]  ;;  %v5695_v33 = vpack.c.bf16 %v148_v19, %v144_v18  ;;  %v5700_v35 = vpack.c.bf16 %v150_v24, %v146_v22  ;;  %v152_v37 = vld [vmem:[#allocation9 + $0x180] sm:$0xff] }
  0x70   :  { %3926 = vmatprep.subr.bf16.mxu0 %v5670_v60  ;;  %3958 = vmatprep.subr.bf16.mxu1 %v5673_v0  ;;  %v159_v31 = vld [vmem:[#allocation9 + $0x1b8] sm:$0xff]  ;;  %v5702_v36 = vpack.c.bf16 %v157_v27, %v153_v26  ;;  %v156_v39 = vld [vmem:[#allocation9 + $0x1a0] sm:$0xff]  ;;  %v154_v40 = vld [vmem:[#allocation9 + $0x190] sm:$0xff]  ;;  %v6700_v9 = vsub.s32 0, %v5771_v7  ;;  %v6699_v11 = vsub.s32 1, %v5771_v7  ;;  %v6698_v18 = vsub.s32 2, %v5771_v7 }
  0x71   :  { %3893 = vmatmul.mubr.msk.f32.gmra.mrb[4].mxu0 %vm194_vm0, %v171_v14  ;;  %3897 = vmatmul.mubr.msk.f32.gmra.mrb[4].mxu1 %vm194_vm0, %v171_v14  ;;  %v172_v32 = vld [vmem:[#allocation5 + $0x18] sm:$0xff]  ;;  %v5705_v41 = vpack.c.bf16 %v159_v31, %v155_v28  ;;  %v158_v43 = vld [vmem:[#allocation9 + $0x1b0] sm:$0xff]  ;;  %v161_v44 = vld [vmem:[#allocation9 + $0x1c8] sm:$0xff]  ;;  %v5711_v50 = vpack.c.bf16 %v156_v39, %v152_v37  ;;  %v6697_v31 = vsub.s32 3, %v5771_v7 }
  0x72   :  { %289 = vmatprep.mubr.f32.mxu0 %v6701_v1  ;;  %378 = vmatprep.mubr.f32.mxu1 %v6701_v1  ;;  %v165_v45 = vld [vmem:[#allocation9 + $0x1e8] sm:$0xff]  ;;  %v163_v48 = vld [vmem:[#allocation9 + $0x1d8] sm:$0xff]  ;;  %v5716_v52 = vpack.c.bf16 %v158_v43, %v154_v40  ;;  %v160_v54 = vld [vmem:[#allocation9 + $0x1c0] sm:$0xff] }
  0x73   :  { %3928 = vmatpush1.bf16.msra.mxu0 %v5679_v13  ;;  %3960 = vmatpush1.bf16.msra.mxu1 %v5684_v15  ;;  %v167_v49 = vld [vmem:[#allocation9 + $0x1f8] sm:$0xff]  ;;  %v5718_v53 = vpack.c.bf16 %v165_v45, %v161_v44  ;;  %v164_v55 = vld [vmem:[#allocation9 + $0x1e0] sm:$0xff]  ;;  %v162_v58 = vld [vmem:[#allocation9 + $0x1d0] sm:$0xff] }
  0x74   :  { %3930 = vmatprep.subr.bf16.mxu0 %v5686_v17  ;;  %3962 = vmatprep.subr.bf16.mxu1 %v5689_v23  ;;  %v5721_v56 = vpack.c.bf16 %v167_v49, %v163_v48  ;;  %v166_v61 = vld [vmem:[#allocation9 + $0x1f0] sm:$0xff]  ;;  %v5724_v62 = vpack.c.bf16 %v164_v55, %v160_v54  ;;  %v168_v10 = vld [vmem:[%s6690_s3] sm:$0xf] }
  0x75   :  { %3894 = vmatmul.mubr.msk.f32.gmra.mrb[6].mxu0 %vm194_vm0, %v172_v32  ;;  %3898 = vmatmul.mubr.msk.f32.gmra.mrb[6].mxu1 %vm194_vm0, %v172_v32  ;;  %v5728_v63 = vpack.c.bf16 %v166_v61, %v162_v58  ;;  %v5780_v14 = vrot.slane %v168_v10, %v6700_v9  ;;  %v5785_v19 = vrot.slane %v168_v10, %v6699_v11  ;;  %v2049_v11 = vld [vmem:[#allocation12 + $0x58] sm:$0xff] }
  0x76   :  { %469 = vmatprep.mubr.f32.mxu0 %v6701_v1  ;;  %540 = vmatprep.mubr.f32.mxu1 %v6701_v1  ;;  %v5790_v26 = vrot.slane %v168_v10, %v6698_v18  ;;  %v5797_v44 = vrot.slane %v168_v10, %v6697_v31  ;;  %v2053_v9 = vld [vmem:[#allocation12 + $0x78] sm:$0xff] }
  0x77   :  { %3932 = vmatpush1.bf16.msra.mxu0 %v5695_v33  ;;  %3964 = vmatpush1.bf16.msra.mxu1 %v5700_v35 }
  0x78   :  { %3934 = vmatprep.subr.bf16.mxu0 %v5702_v36  ;;  %3966 = vmatprep.subr.bf16.mxu1 %v5705_v41 }
  0x7b   :  { %3936 = vmatpush1.bf16.msra.mxu0 %v5711_v50  ;;  %3968 = vmatpush1.bf16.msra.mxu1 %v5716_v52 }
  0x7c   :  { %3938 = vmatprep.subr.bf16.mxu0 %v5718_v53  ;;  %3970 = vmatprep.subr.bf16.mxu1 %v5721_v56 }
  0x7f   :  { %3940 = vmatpush1.bf16.msra.mxu0 %v5724_v62  ;;  %3972 = vmatpush1.bf16.msra.mxu1 %v5728_v63 }
  0x80   :  { %3974 = vmatprep.subr.bf16.mxu0 %v5621_v8  ;;  %4006 = vmatprep.subr.bf16.mxu1 %v5623_v12 }
  0x82   :  { %470 = vmatmul.mubr.f32.vlgmr.msra.gmra.mrb[0].mxu0 %v6701_v1  ;;  %541 = vmatmul.mubr.f32.vlgmr.msra.gmra.mrb[0].mxu1 %v6701_v1 }
  0x83   :  { %3976 = vmatpush1.bf16.msra.mxu0 %v5628_v16  ;;  %4008 = vmatpush1.bf16.msra.mxu1 %v5632_v20 }
  0x84   :  { %3978 = vmatprep.subr.bf16.mxu0 %v5634_v21  ;;  %4010 = vmatprep.subr.bf16.mxu1 %v5638_v25 }
  0x85   :  { %639 = vmatprep.mubr.f32.mxu0 %v6701_v1  ;;  %710 = vmatprep.mubr.f32.mxu1 %v6701_v1 }
  0x87   :  { %3980 = vmatpush1.bf16.msra.mxu0 %v5642_v29  ;;  %4012 = vmatpush1.bf16.msra.mxu1 %v5644_v30 }
  0x88   :  { %3982 = vmatprep.subr.bf16.mxu0 %v5647_v34  ;;  %4014 = vmatprep.subr.bf16.mxu1 %v5649_v38 }
  0x8b   :  { %3984 = vmatpush1.bf16.msra.mxu0 %v5652_v42  ;;  %4016 = vmatpush1.bf16.msra.mxu1 %v5656_v46 }
  0x8c   :  { %3986 = vmatprep.subr.bf16.mxu0 %v5658_v47  ;;  %4018 = vmatprep.subr.bf16.mxu1 %v5661_v51 }
  0x8f   :  { %3988 = vmatpush1.bf16.msra.mxu0 %v5664_v57  ;;  %4020 = vmatpush1.bf16.msra.mxu1 %v5668_v59 }
  0x90   :  { %3990 = vmatprep.subr.bf16.mxu0 %v5670_v60  ;;  %4022 = vmatprep.subr.bf16.mxu1 %v5673_v0 }
  0x93   :  { %3992 = vmatpush1.bf16.msra.mxu0 %v5679_v13  ;;  %4024 = vmatpush1.bf16.msra.mxu1 %v5684_v15 }
  0x94   :  { %3994 = vmatprep.subr.bf16.mxu0 %v5686_v17  ;;  %4026 = vmatprep.subr.bf16.mxu1 %v5689_v23 }
  0x97   :  { %3996 = vmatpush1.bf16.msra.mxu0 %v5695_v33  ;;  %4028 = vmatpush1.bf16.msra.mxu1 %v5700_v35 }
  0x98   :  { %3998 = vmatprep.subr.bf16.mxu0 %v5702_v36  ;;  %4030 = vmatprep.subr.bf16.mxu1 %v5705_v41 }
  0x9b   :  { %4000 = vmatpush1.bf16.msra.mxu0 %v5711_v50  ;;  %4032 = vmatpush1.bf16.msra.mxu1 %v5716_v52 }
  0x9c   :  { %4002 = vmatprep.subr.bf16.mxu0 %v5718_v53  ;;  %4034 = vmatprep.subr.bf16.mxu1 %v5721_v56 }
  0x9f   :  { %4004 = vmatpush1.bf16.msra.mxu0 %v5724_v62  ;;  %4036 = vmatpush1.bf16.msra.mxu1 %v5728_v63 }
  0xa0   :  { %4038 = vmatprep.subr.bf16.mxu0 %v5621_v8  ;;  %4070 = vmatprep.subr.bf16.mxu1 %v5623_v12 }
 0x155   :  { %v471_v22 = vpop.f32.mrb[0].mxu0  ;;  %v542_v27 = vpop.f32.mrb[0].mxu1 }
 0x156   :  { %v5061_v24 = vadd.f32 %v471_v22, %v5780_v14  ;;  %v473_v28 = vpop.f32.mrb[1].mxu0  ;;  %v544_v37 = vpop.f32.mrb[1].mxu1  ;;  %v5069_v43 = vadd.f32 %v542_v27, %v5790_v26 }
 0x157   :  { %v5062_v32 = vadd.f32 %v473_v28, %v5785_v19  ;;  %v5070_v45 = vadd.f32 %v544_v37, %v5797_v44 }
 0x158   :  { %v551_v39 = vmul.f32 0.5, %v5061_v24 }
 0x159   :  { %v555_v40 = vmul.f32 0.5, %v5062_v32  ;;  %v560_v48 = vmul.f32 0.5, %v5070_v45 }
 0x15a   :  { %5199 = vtanh.f32 %v551_v39 }
 0x15b   :  { %5201 = vtanh.f32 %v555_v40 }
 0x15c   :  { %5203 = vtanh.f32 %v5069_v43 }
 0x15d   :  { %5205 = vtanh.f32 %v560_v48 }
 0x164   :  { %v5200_v49 = vpop.eup %5199 }
 0x165   :  { %v5202_v54 = vpop.eup %5201  ;;  %v553_v55 = vmul.f32 0.5, %v5200_v49 }
 0x166   :  { %v557_v58 = vmul.f32 0.5, %v5202_v54  ;;  %v5204_v6 = vpop.eup %5203 }
 0x167   :  { %v554_v61 = vadd.f32 0.5, %v553_v55  ;;  %v5206_v10 = vpop.eup %5205 }
 0x168   :  { %v558_v22 = vadd.f32 0.5, %v557_v58  ;;  %v562_v32 = vmul.f32 0.5, %v5206_v10 }
 0x169   :  { %v565_v24 = vmul.f32 %v5204_v6, %v554_v61 }
 0x16a   :  { %v564_v28 = vmul.f32 0.0, %v558_v22  ;;  %v563_v39 = vadd.f32 0.5, %v562_v32 }
 0x16c   :  { %v5800_v27 = vadd.f32 %v565_v24, %v564_v28 }
 0x16e   :  { %5207 = vtanh.f32 %v5800_v27 }
 0x178   :  { %v5208_v40 = vpop.eup %5207 }
 0x179   :  { %v5803_v37 = vmul.f32 %v5208_v40, %v563_v39 }
 0x17b   :  { %640 = vmatmul.mubr.f32.vlgmr.msra.gmra.mrb[2].mxu0 %v5803_v37  ;;  %711 = vmatmul.mubr.f32.vlgmr.msra.gmra.mrb[2].mxu1 %v5803_v37 }
 0x17c   :  { %4040 = vmatpush1.bf16.msra.mxu0 %v5628_v16  ;;  %4072 = vmatpush1.bf16.msra.mxu1 %v5632_v20 }
 0x17d   :  { %4042 = vmatprep.subr.bf16.mxu0 %v5634_v21  ;;  %4074 = vmatprep.subr.bf16.mxu1 %v5638_v25 }
 0x17e   :  { %810 = vmatprep.mubr.f32.mxu0 %v6701_v1  ;;  %881 = vmatprep.mubr.f32.mxu1 %v6701_v1 }
 0x180   :  { %4044 = vmatpush1.bf16.msra.mxu0 %v5642_v29  ;;  %4076 = vmatpush1.bf16.msra.mxu1 %v5644_v30 }
 0x181   :  { %4046 = vmatprep.subr.bf16.mxu0 %v5647_v34  ;;  %4078 = vmatprep.subr.bf16.mxu1 %v5649_v38 }
 0x184   :  { %4048 = vmatpush1.bf16.msra.mxu0 %v5652_v42  ;;  %4080 = vmatpush1.bf16.msra.mxu1 %v5656_v46 }
 0x185   :  { %4050 = vmatprep.subr.bf16.mxu0 %v5658_v47  ;;  %4082 = vmatprep.subr.bf16.mxu1 %v5661_v51 }
 0x188   :  { %4052 = vmatpush1.bf16.msra.mxu0 %v5664_v57  ;;  %4084 = vmatpush1.bf16.msra.mxu1 %v5668_v59 }
 0x189   :  { %4054 = vmatprep.subr.bf16.mxu0 %v5670_v60  ;;  %4086 = vmatprep.subr.bf16.mxu1 %v5673_v0 }
 0x18c   :  { %4056 = vmatpush1.bf16.msra.mxu0 %v5679_v13  ;;  %4088 = vmatpush1.bf16.msra.mxu1 %v5684_v15 }
 0x18d   :  { %4058 = vmatprep.subr.bf16.mxu0 %v5686_v17  ;;  %4090 = vmatprep.subr.bf16.mxu1 %v5689_v23 }
 0x190   :  { %4060 = vmatpush1.bf16.msra.mxu0 %v5695_v33  ;;  %4092 = vmatpush1.bf16.msra.mxu1 %v5700_v35 }
 0x191   :  { %4062 = vmatprep.subr.bf16.mxu0 %v5702_v36  ;;  %4094 = vmatprep.subr.bf16.mxu1 %v5705_v41 }
 0x194   :  { %4064 = vmatpush1.bf16.msra.mxu0 %v5711_v50  ;;  %4096 = vmatpush1.bf16.msra.mxu1 %v5716_v52 }
 0x195   :  { %4066 = vmatprep.subr.bf16.mxu0 %v5718_v53  ;;  %4098 = vmatprep.subr.bf16.mxu1 %v5721_v56 }
 0x198   :  { %4068 = vmatpush1.bf16.msra.mxu0 %v5724_v62  ;;  %4100 = vmatpush1.bf16.msra.mxu1 %v5728_v63 }
 0x199   :  { %4102 = vmatprep.subr.bf16.mxu0 %v5621_v8  ;;  %4134 = vmatprep.subr.bf16.mxu1 %v5623_v12 }
 0x24e   :  { %v641_v43 = vpop.f32.mrb[2].mxu0  ;;  %v712_v45 = vpop.f32.mrb[2].mxu1 }
 0x24f   :  { %v5063_v48 = vadd.f32 %v641_v43, %v5780_v14  ;;  %v643_v49 = vpop.f32.mrb[3].mxu0  ;;  %v714_v54 = vpop.f32.mrb[3].mxu1  ;;  %v5071_v6 = vadd.f32 %v712_v45, %v5790_v26 }
 0x250   :  { %v5064_v55 = vadd.f32 %v643_v49, %v5785_v19  ;;  %v5072_v22 = vadd.f32 %v714_v54, %v5797_v44 }
 0x251   :  { %v721_v58 = vmul.f32 0.5, %v5063_v48 }
 0x252   :  { %v725_v61 = vmul.f32 0.5, %v5064_v55  ;;  %v730_v24 = vmul.f32 0.5, %v5072_v22 }
 0x253   :  { %5209 = vtanh.f32 %v721_v58 }
 0x254   :  { %5211 = vtanh.f32 %v725_v61 }
 0x255   :  { %5213 = vtanh.f32 %v5071_v6 }
 0x256   :  { %5215 = vtanh.f32 %v730_v24 }
 0x25d   :  { %v5210_v28 = vpop.eup %5209 }
 0x25e   :  { %v5212_v10 = vpop.eup %5211  ;;  %v723_v32 = vmul.f32 0.5, %v5210_v28 }
 0x25f   :  { %v727_v39 = vmul.f32 0.5, %v5212_v10  ;;  %v5214_v43 = vpop.eup %5213 }
 0x260   :  { %v724_v40 = vadd.f32 0.5, %v723_v32  ;;  %v5216_v45 = vpop.eup %5215 }
 0x261   :  { %v728_v31 = vadd.f32 0.5, %v727_v39  ;;  %v732_v55 = vmul.f32 0.5, %v5216_v45 }
 0x262   :  { %v735_v18 = vmul.f32 %v5214_v43, %v724_v40 }
 0x263   :  { %v734_v48 = vmul.f32 %v728_v31, %v5800_v27  ;;  %v733_v58 = vadd.f32 0.5, %v732_v55 }
 0x265   :  { %v5846_v49 = vadd.f32 %v735_v18, %v734_v48 }
 0x267   :  { %5217 = vtanh.f32 %v5846_v49 }
 0x271   :  { %v5218_v54 = vpop.eup %5217 }
 0x272   :  { %v5849_v61 = vmul.f32 %v5218_v54, %v733_v58 }
 0x274   :  { %811 = vmatmul.mubr.f32.vlgmr.msra.gmra.mrb[4].mxu0 %v5849_v61  ;;  %882 = vmatmul.mubr.f32.vlgmr.msra.gmra.mrb[4].mxu1 %v5849_v61 }
 0x275   :  { %4104 = vmatpush1.bf16.msra.mxu0 %v5628_v16  ;;  %4136 = vmatpush1.bf16.msra.mxu1 %v5632_v20 }
 0x276   :  { %4106 = vmatprep.subr.bf16.mxu0 %v5634_v21  ;;  %4138 = vmatprep.subr.bf16.mxu1 %v5638_v25 }
 0x277   :  { %981 = vmatprep.mubr.f32.mxu0 %v6701_v1  ;;  %1052 = vmatprep.mubr.f32.mxu1 %v6701_v1 }
 0x279   :  { %4108 = vmatpush1.bf16.msra.mxu0 %v5642_v29  ;;  %4140 = vmatpush1.bf16.msra.mxu1 %v5644_v30 }
 0x27a   :  { %4110 = vmatprep.subr.bf16.mxu0 %v5647_v34  ;;  %4142 = vmatprep.subr.bf16.mxu1 %v5649_v38 }
 0x27d   :  { %4112 = vmatpush1.bf16.msra.mxu0 %v5652_v42  ;;  %4144 = vmatpush1.bf16.msra.mxu1 %v5656_v46 }
 0x27e   :  { %4114 = vmatprep.subr.bf16.mxu0 %v5658_v47  ;;  %4146 = vmatprep.subr.bf16.mxu1 %v5661_v51 }
 0x281   :  { %4116 = vmatpush1.bf16.msra.mxu0 %v5664_v57  ;;  %4148 = vmatpush1.bf16.msra.mxu1 %v5668_v59 }
 0x282   :  { %4118 = vmatprep.subr.bf16.mxu0 %v5670_v60  ;;  %4150 = vmatprep.subr.bf16.mxu1 %v5673_v0 }
 0x285   :  { %4120 = vmatpush1.bf16.msra.mxu0 %v5679_v13  ;;  %4152 = vmatpush1.bf16.msra.mxu1 %v5684_v15 }
 0x286   :  { %4122 = vmatprep.subr.bf16.mxu0 %v5686_v17  ;;  %4154 = vmatprep.subr.bf16.mxu1 %v5689_v23 }
 0x289   :  { %4124 = vmatpush1.bf16.msra.mxu0 %v5695_v33  ;;  %4156 = vmatpush1.bf16.msra.mxu1 %v5700_v35 }
 0x28a   :  { %4126 = vmatprep.subr.bf16.mxu0 %v5702_v36  ;;  %4158 = vmatprep.subr.bf16.mxu1 %v5705_v41 }
 0x28d   :  { %4128 = vmatpush1.bf16.msra.mxu0 %v5711_v50  ;;  %4160 = vmatpush1.bf16.msra.mxu1 %v5716_v52 }
 0x28e   :  { %4130 = vmatprep.subr.bf16.mxu0 %v5718_v53  ;;  %4162 = vmatprep.subr.bf16.mxu1 %v5721_v56 }
 0x291   :  { %4132 = vmatpush1.bf16.msra.mxu0 %v5724_v62  ;;  %4164 = vmatpush1.bf16.msra.mxu1 %v5728_v63 }
 0x292   :  { %1100 = vmatprep.subr.mxu0 %v5609_v2  ;;  %1189 = vmatprep.subr.mxu1 %v5611_v3 }
 0x347   :  { %v812_v18 = vpop.f32.mrb[4].mxu0  ;;  %v883_v31 = vpop.f32.mrb[4].mxu1 }
 0x348   :  { %v5065_v27 = vadd.f32 %v812_v18, %v5780_v14  ;;  %v814_v6 = vpop.f32.mrb[5].mxu0  ;;  %v885_v22 = vpop.f32.mrb[5].mxu1  ;;  %v5073_v32 = vadd.f32 %v883_v31, %v5790_v26 }
 0x349   :  { %v5066_v24 = vadd.f32 %v814_v6, %v5785_v19  ;;  %v5074_v39 = vadd.f32 %v885_v22, %v5797_v44 }
 0x34a   :  { %v892_v28 = vmul.f32 0.5, %v5065_v27 }
 0x34b   :  { %v896_v10 = vmul.f32 0.5, %v5066_v24  ;;  %v901_v2 = vmul.f32 0.5, %v5074_v39 }
 0x34c   :  { %5219 = vtanh.f32 %v892_v28 }
 0x34d   :  { %5221 = vtanh.f32 %v896_v10  ;;  %v1087_v10 = vld [vmem:[#allocation5 + $0x38] sm:$0xff] }
 0x34e   :  { %5223 = vtanh.f32 %v5073_v32 }
 0x34f   :  { %5225 = vtanh.f32 %v901_v2 }
 0x356   :  { %v5220_v40 = vpop.eup %5219 }
 0x357   :  { %v5222_v3 = vpop.eup %5221  ;;  %v894_v43 = vmul.f32 0.5, %v5220_v40 }
 0x358   :  { %v898_v48 = vmul.f32 0.5, %v5222_v3  ;;  %v5224_v55 = vpop.eup %5223 }
 0x359   :  { %v895_v45 = vadd.f32 0.5, %v894_v43  ;;  %v5226_v31 = vpop.eup %5225 }
 0x35a   :  { %v899_v58 = vadd.f32 0.5, %v898_v48  ;;  %v903_v6 = vmul.f32 0.5, %v5226_v31 }
 0x35b   :  { %v906_v54 = vmul.f32 %v5224_v55, %v895_v45 }
 0x35c   :  { %v905_v18 = vmul.f32 %v899_v58, %v5846_v49  ;;  %v904_v24 = vadd.f32 0.5, %v903_v6  ;;  %v1084_v49 = vld [vmem:[#allocation5 + $0x20] sm:$0xff] }
 0x35e   :  { %v5892_v27 = vadd.f32 %v906_v54, %v905_v18 }
 0x360   :  { %5227 = vtanh.f32 %v5892_v27 }
 0x36a   :  { %v5228_v22 = vpop.eup %5227 }
 0x36b   :  { %v5895_v28 = vmul.f32 %v5228_v22, %v904_v24 }
 0x36d   :  { %982 = vmatmul.mubr.f32.vlgmr.msra.gmra.mrb[6].mxu0 %v5895_v28  ;;  %1053 = vmatmul.mubr.f32.vlgmr.msra.gmra.mrb[6].mxu1 %v5895_v28 }
 0x36e   :  { %1101 = vmatpush1.msra.mxu0 %v5613_v4  ;;  %1190 = vmatpush1.msra.mxu1 %v5617_v5  ;;  %v1085_v4 = vld [vmem:[#allocation5 + $0x28] sm:$0xff]  ;;  %v1086_v5 = vld [vmem:[#allocation5 + $0x30] sm:$0xff] }
 0x36f   :  { %1164 = vmatprep.mubr.f32.mxu0 %v6701_v1  ;;  %1253 = vmatprep.mubr.f32.mxu1 %v6701_v1 }
 0x370   :  { %4166 = vmatprep.subr.bf16.mxu0 %v5621_v8  ;;  %4198 = vmatprep.subr.bf16.mxu1 %v5623_v12 }
 0x371   :  { %3899 = vmatmul.mubr.msk.f32.vlgmr.msra.gmra.mrb[8].mxu0 %vm194_vm0, %v1084_v49  ;;  %3903 = vmatmul.mubr.msk.f32.vlgmr.msra.gmra.mrb[8].mxu1 %vm194_vm0, %v1084_v49 }
 0x372   :  { %4168 = vmatpush1.bf16.msra.mxu0 %v5628_v16  ;;  %4200 = vmatpush1.bf16.msra.mxu1 %v5632_v20 }
 0x373   :  { %4170 = vmatprep.subr.bf16.mxu0 %v5634_v21  ;;  %4202 = vmatprep.subr.bf16.mxu1 %v5638_v25 }
 0x374   :  { %1170 = vmatprep.mubr.f32.mxu0 %v6701_v1  ;;  %1259 = vmatprep.mubr.f32.mxu1 %v6701_v1 }
 0x375   :  { %3900 = vmatmul.mubr.msk.f32.gmra.mrb[10].mxu0 %vm194_vm0, %v1085_v4  ;;  %3904 = vmatmul.mubr.msk.f32.gmra.mrb[10].mxu1 %vm194_vm0, %v1085_v4 }
 0x376   :  { %4172 = vmatpush1.bf16.msra.mxu0 %v5642_v29  ;;  %4204 = vmatpush1.bf16.msra.mxu1 %v5644_v30 }
 0x377   :  { %4174 = vmatprep.subr.bf16.mxu0 %v5647_v34  ;;  %4206 = vmatprep.subr.bf16.mxu1 %v5649_v38 }
 0x378   :  { %1176 = vmatprep.mubr.f32.mxu0 %v6701_v1  ;;  %1265 = vmatprep.mubr.f32.mxu1 %v6701_v1 }
 0x379   :  { %3901 = vmatmul.mubr.msk.f32.gmra.mrb[12].mxu0 %vm194_vm0, %v1086_v5  ;;  %3905 = vmatmul.mubr.msk.f32.gmra.mrb[12].mxu1 %vm194_vm0, %v1086_v5 }
 0x37a   :  { %4176 = vmatpush1.bf16.msra.mxu0 %v5652_v42  ;;  %4208 = vmatpush1.bf16.msra.mxu1 %v5656_v46 }
 0x37b   :  { %4178 = vmatprep.subr.bf16.mxu0 %v5658_v47  ;;  %4210 = vmatprep.subr.bf16.mxu1 %v5661_v51 }
 0x37c   :  { %1182 = vmatprep.mubr.f32.mxu0 %v6701_v1  ;;  %1271 = vmatprep.mubr.f32.mxu1 %v6701_v1 }
 0x37d   :  { %3902 = vmatmul.mubr.msk.f32.gmra.mrb[14].mxu0 %vm194_vm0, %v1087_v10  ;;  %3906 = vmatmul.mubr.msk.f32.gmra.mrb[14].mxu1 %vm194_vm0, %v1087_v10 }
 0x37e   :  { %4180 = vmatpush1.bf16.msra.mxu0 %v5664_v57  ;;  %4212 = vmatpush1.bf16.msra.mxu1 %v5668_v59 }
 0x37f   :  { %4182 = vmatprep.subr.bf16.mxu0 %v5670_v60  ;;  %4214 = vmatprep.subr.bf16.mxu1 %v5673_v0 }
 0x380   :  { %1362 = vmatprep.mubr.f32.mxu0 %v6701_v1  ;;  %1433 = vmatprep.mubr.f32.mxu1 %v6701_v1 }
 0x382   :  { %4184 = vmatpush1.bf16.msra.mxu0 %v5679_v13  ;;  %4216 = vmatpush1.bf16.msra.mxu1 %v5684_v15 }
 0x383   :  { %4186 = vmatprep.subr.bf16.mxu0 %v5686_v17  ;;  %4218 = vmatprep.subr.bf16.mxu1 %v5689_v23 }
 0x386   :  { %4188 = vmatpush1.bf16.msra.mxu0 %v5695_v33  ;;  %4220 = vmatpush1.bf16.msra.mxu1 %v5700_v35 }
 0x387   :  { %4190 = vmatprep.subr.bf16.mxu0 %v5702_v36  ;;  %4222 = vmatprep.subr.bf16.mxu1 %v5705_v41 }
 0x38a   :  { %4192 = vmatpush1.bf16.msra.mxu0 %v5711_v50  ;;  %4224 = vmatpush1.bf16.msra.mxu1 %v5716_v52 }
 0x38b   :  { %4194 = vmatprep.subr.bf16.mxu0 %v5718_v53  ;;  %4226 = vmatprep.subr.bf16.mxu1 %v5721_v56 }
 0x38e   :  { %4196 = vmatpush1.bf16.msra.mxu0 %v5724_v62  ;;  %4228 = vmatpush1.bf16.msra.mxu1 %v5728_v63 }
 0x38f   :  { %4230 = vmatprep.subr.bf16.mxu0 %v5621_v8  ;;  %4262 = vmatprep.subr.bf16.mxu1 %v5623_v12 }
 0x440   :  { %v983_v32 = vpop.f32.mrb[6].mxu0  ;;  %v1054_v39 = vpop.f32.mrb[6].mxu1 }
 0x441   :  { %v5067_v2 = vadd.f32 %v983_v32, %v5780_v14  ;;  %v985_v40 = vpop.f32.mrb[7].mxu0  ;;  %v1056_v3 = vpop.f32.mrb[7].mxu1  ;;  %v5075_v55 = vadd.f32 %v1054_v39, %v5790_v26 }
 0x442   :  { %v5068_v43 = vadd.f32 %v985_v40, %v5785_v19  ;;  %v5076_v58 = vadd.f32 %v1056_v3, %v5797_v44 }
 0x443   :  { %v1063_v48 = vmul.f32 0.5, %v5067_v2 }
 0x444   :  { %v1067_v45 = vmul.f32 0.5, %v5068_v43  ;;  %v1072_v54 = vmul.f32 0.5, %v5076_v58 }
 0x445   :  { %5229 = vtanh.f32 %v1063_v48 }
 0x446   :  { %5231 = vtanh.f32 %v1067_v45 }
 0x447   :  { %5233 = vtanh.f32 %v5075_v55 }
 0x448   :  { %5235 = vtanh.f32 %v1072_v54 }
 0x44f   :  { %v5230_v18 = vpop.eup %5229 }
 0x450   :  { %v5232_v31 = vpop.eup %5231  ;;  %v1065_v6 = vmul.f32 0.5, %v5230_v18 }
 0x451   :  { %v1069_v24 = vmul.f32 0.5, %v5232_v31  ;;  %v5234_v49 = vpop.eup %5233 }
 0x452   :  { %v1066_v22 = vadd.f32 0.5, %v1065_v6  ;;  %v5236_v39 = vpop.eup %5235 }
 0x453   :  { %v1070_v4 = vadd.f32 0.5, %v1069_v24  ;;  %v1074_v2 = vmul.f32 0.5, %v5236_v39 }
 0x454   :  { %v1077_v5 = vmul.f32 %v5234_v49, %v1066_v22 }
 0x455   :  { %v1076_v10 = vmul.f32 %v1070_v4, %v5892_v27  ;;  %v1075_v40 = vadd.f32 0.5, %v1074_v2 }
 0x457   :  { %v5958_v32 = vadd.f32 %v1077_v5, %v1076_v10 }
 0x459   :  { %5237 = vtanh.f32 %v5958_v32 }
 0x463   :  { %v5238_v3 = vpop.eup %5237 }
 0x464   :  { %v5961_v43 = vmul.f32 %v5238_v3, %v1075_v40 }
 0x466   :  { %1363 = vmatmul.mubr.f32.vlgmr.msra.gmra.mrb[8].mxu0 %v5961_v43  ;;  %1434 = vmatmul.mubr.f32.vlgmr.msra.gmra.mrb[8].mxu1 %v5961_v43 }
 0x467   :  { %4232 = vmatpush1.bf16.msra.mxu0 %v5628_v16  ;;  %4264 = vmatpush1.bf16.msra.mxu1 %v5632_v20 }
 0x468   :  { %4234 = vmatprep.subr.bf16.mxu0 %v5634_v21  ;;  %4266 = vmatprep.subr.bf16.mxu1 %v5638_v25 }
 0x469   :  { %1532 = vmatprep.mubr.f32.mxu0 %v6701_v1  ;;  %1603 = vmatprep.mubr.f32.mxu1 %v6701_v1 }
 0x46b   :  { %4236 = vmatpush1.bf16.msra.mxu0 %v5642_v29  ;;  %4268 = vmatpush1.bf16.msra.mxu1 %v5644_v30 }
 0x46c   :  { %4238 = vmatprep.subr.bf16.mxu0 %v5647_v34  ;;  %4270 = vmatprep.subr.bf16.mxu1 %v5649_v38 }
 0x46f   :  { %4240 = vmatpush1.bf16.msra.mxu0 %v5652_v42  ;;  %4272 = vmatpush1.bf16.msra.mxu1 %v5656_v46 }
 0x470   :  { %4242 = vmatprep.subr.bf16.mxu0 %v5658_v47  ;;  %4274 = vmatprep.subr.bf16.mxu1 %v5661_v51 }
 0x473   :  { %4244 = vmatpush1.bf16.msra.mxu0 %v5664_v57  ;;  %4276 = vmatpush1.bf16.msra.mxu1 %v5668_v59 }
 0x474   :  { %4246 = vmatprep.subr.bf16.mxu0 %v5670_v60  ;;  %4278 = vmatprep.subr.bf16.mxu1 %v5673_v0 }
 0x477   :  { %4248 = vmatpush1.bf16.msra.mxu0 %v5679_v13  ;;  %4280 = vmatpush1.bf16.msra.mxu1 %v5684_v15 }
 0x478   :  { %4250 = vmatprep.subr.bf16.mxu0 %v5686_v17  ;;  %4282 = vmatprep.subr.bf16.mxu1 %v5689_v23 }
 0x47b   :  { %4252 = vmatpush1.bf16.msra.mxu0 %v5695_v33  ;;  %4284 = vmatpush1.bf16.msra.mxu1 %v5700_v35 }
 0x47c   :  { %4254 = vmatprep.subr.bf16.mxu0 %v5702_v36  ;;  %4286 = vmatprep.subr.bf16.mxu1 %v5705_v41 }
 0x47f   :  { %4256 = vmatpush1.bf16.msra.mxu0 %v5711_v50  ;;  %4288 = vmatpush1.bf16.msra.mxu1 %v5716_v52 }
 0x480   :  { %4258 = vmatprep.subr.bf16.mxu0 %v5718_v53  ;;  %4290 = vmatprep.subr.bf16.mxu1 %v5721_v56 }
 0x483   :  { %4260 = vmatpush1.bf16.msra.mxu0 %v5724_v62  ;;  %4292 = vmatpush1.bf16.msra.mxu1 %v5728_v63 }
 0x484   :  { %4294 = vmatprep.subr.bf16.mxu0 %v5621_v8  ;;  %4326 = vmatprep.subr.bf16.mxu1 %v5623_v12 }
 0x539   :  { %v1364_v27 = vpop.f32.mrb[8].mxu0  ;;  %v1435_v48 = vpop.f32.mrb[8].mxu1 }
 0x53a   :  { %v5077_v45 = vadd.f32 %v1364_v27, %v5780_v14  ;;  %v1366_v55 = vpop.f32.mrb[9].mxu0  ;;  %v1437_v58 = vpop.f32.mrb[9].mxu1  ;;  %v5085_v6 = vadd.f32 %v1435_v48, %v5790_v26 }
 0x53b   :  { %v5078_v54 = vadd.f32 %v1366_v55, %v5785_v19  ;;  %v5086_v24 = vadd.f32 %v1437_v58, %v5797_v44 }
 0x53c   :  { %v1444_v18 = vmul.f32 0.5, %v5077_v45 }
 0x53d   :  { %v1448_v31 = vmul.f32 0.5, %v5078_v54  ;;  %v1453_v22 = vmul.f32 0.5, %v5086_v24 }
 0x53e   :  { %5239 = vtanh.f32 %v1444_v18 }
 0x53f   :  { %5241 = vtanh.f32 %v1448_v31 }
 0x540   :  { %5243 = vtanh.f32 %v5085_v6 }
 0x541   :  { %5245 = vtanh.f32 %v1453_v22 }
 0x548   :  { %v5240_v49 = vpop.eup %5239 }
 0x549   :  { %v5242_v4 = vpop.eup %5241  ;;  %v1446_v5 = vmul.f32 0.5, %v5240_v49 }
 0x54a   :  { %v1450_v10 = vmul.f32 0.5, %v5242_v4  ;;  %v5244_v2 = vpop.eup %5243 }
 0x54b   :  { %v1447_v39 = vadd.f32 0.5, %v1446_v5  ;;  %v5246_v48 = vpop.eup %5245 }
 0x54c   :  { %v1451_v40 = vadd.f32 0.5, %v1450_v10  ;;  %v1455_v55 = vmul.f32 0.5, %v5246_v48 }
 0x54d   :  { %v1458_v3 = vmul.f32 %v5244_v2, %v1447_v39 }
 0x54e   :  { %v1457_v27 = vmul.f32 %v1451_v40, %v5958_v32  ;;  %v1456_v54 = vadd.f32 0.5, %v1455_v55 }
 0x550   :  { %v6004_v45 = vadd.f32 %v1458_v3, %v1457_v27 }
 0x552   :  { %5247 = vtanh.f32 %v6004_v45 }
 0x55c   :  { %v5248_v58 = vpop.eup %5247 }
 0x55d   :  { %v6007_v18 = vmul.f32 %v5248_v58, %v1456_v54 }
 0x55f   :  { %6734 = vst [vmem:[#allocation16_spill] sm:$0xff] %v6007_v18  ;;  %1533 = vmatmul.mubr.f32.vlgmr.msra.gmra.mrb[10].mxu0 %v6007_v18  ;;  %1604 = vmatmul.mubr.f32.vlgmr.msra.gmra.mrb[10].mxu1 %v6007_v18 }
 0x560   :  { %4296 = vmatpush1.bf16.msra.mxu0 %v5628_v16  ;;  %4328 = vmatpush1.bf16.msra.mxu1 %v5632_v20 }
 0x561   :  { %4298 = vmatprep.subr.bf16.mxu0 %v5634_v21  ;;  %4330 = vmatprep.subr.bf16.mxu1 %v5638_v25 }
 0x562   :  { %1702 = vmatprep.mubr.f32.mxu0 %v6701_v1  ;;  %1773 = vmatprep.mubr.f32.mxu1 %v6701_v1 }
 0x564   :  { %4300 = vmatpush1.bf16.msra.mxu0 %v5642_v29  ;;  %4332 = vmatpush1.bf16.msra.mxu1 %v5644_v30 }
 0x565   :  { %4302 = vmatprep.subr.bf16.mxu0 %v5647_v34  ;;  %4334 = vmatprep.subr.bf16.mxu1 %v5649_v38 }
 0x568   :  { %4304 = vmatpush1.bf16.msra.mxu0 %v5652_v42  ;;  %4336 = vmatpush1.bf16.msra.mxu1 %v5656_v46 }
 0x569   :  { %4306 = vmatprep.subr.bf16.mxu0 %v5658_v47  ;;  %4338 = vmatprep.subr.bf16.mxu1 %v5661_v51 }
 0x56c   :  { %4308 = vmatpush1.bf16.msra.mxu0 %v5664_v57  ;;  %4340 = vmatpush1.bf16.msra.mxu1 %v5668_v59 }
 0x56d   :  { %4310 = vmatprep.subr.bf16.mxu0 %v5670_v60  ;;  %4342 = vmatprep.subr.bf16.mxu1 %v5673_v0 }
 0x570   :  { %4312 = vmatpush1.bf16.msra.mxu0 %v5679_v13  ;;  %4344 = vmatpush1.bf16.msra.mxu1 %v5684_v15 }
 0x571   :  { %4314 = vmatprep.subr.bf16.mxu0 %v5686_v17  ;;  %4346 = vmatprep.subr.bf16.mxu1 %v5689_v23 }
 0x574   :  { %4316 = vmatpush1.bf16.msra.mxu0 %v5695_v33  ;;  %4348 = vmatpush1.bf16.msra.mxu1 %v5700_v35 }
 0x575   :  { %4318 = vmatprep.subr.bf16.mxu0 %v5702_v36  ;;  %4350 = vmatprep.subr.bf16.mxu1 %v5705_v41 }
 0x578   :  { %4320 = vmatpush1.bf16.msra.mxu0 %v5711_v50  ;;  %4352 = vmatpush1.bf16.msra.mxu1 %v5716_v52 }
 0x579   :  { %4322 = vmatprep.subr.bf16.mxu0 %v5718_v53  ;;  %4354 = vmatprep.subr.bf16.mxu1 %v5721_v56 }
 0x57c   :  { %4324 = vmatpush1.bf16.msra.mxu0 %v5724_v62  ;;  %4356 = vmatpush1.bf16.msra.mxu1 %v5728_v63 }
 0x57d   :  { %4358 = vmatprep.subr.bf16.mxu0 %v5621_v8  ;;  %4390 = vmatprep.subr.bf16.mxu1 %v5623_v12 }
 0x632   :  { %v1534_v32 = vpop.f32.mrb[10].mxu0  ;;  %v1605_v31 = vpop.f32.mrb[10].mxu1 }
 0x633   :  { %v5079_v6 = vadd.f32 %v1534_v32, %v5780_v14  ;;  %v1536_v24 = vpop.f32.mrb[11].mxu0  ;;  %v1607_v22 = vpop.f32.mrb[11].mxu1  ;;  %v5087_v10 = vadd.f32 %v1605_v31, %v5790_v26 }
 0x634   :  { %v5080_v49 = vadd.f32 %v1536_v24, %v5785_v19  ;;  %v5088_v39 = vadd.f32 %v1607_v22, %v5797_v44 }
 0x635   :  { %v1614_v4 = vmul.f32 0.5, %v5079_v6 }
 0x636   :  { %v1618_v5 = vmul.f32 0.5, %v5080_v49  ;;  %v1623_v8 = vmul.f32 0.5, %v5088_v39  ;;  %v1987_v39 = vld [vmem:[#allocation10 + $0x68] sm:$0xff] }
 0x637   :  { %5249 = vtanh.f32 %v1614_v4  ;;  %v1976_v4 = vld [vmem:[#allocation10 + $0x10] sm:$0xff] }
 0x638   :  { %5251 = vtanh.f32 %v1618_v5  ;;  %v1980_v5 = vld [vmem:[#allocation10 + $0x30] sm:$0xff] }
 0x639   :  { %5253 = vtanh.f32 %v5087_v10  ;;  %v1983_v10 = vld [vmem:[#allocation10 + $0x48] sm:$0xff] }
 0x63a   :  { %5255 = vtanh.f32 %v1623_v8  ;;  %v1985_v8 = vld [vmem:[#allocation10 + $0x58] sm:$0xff] }
 0x641   :  { %v5250_v2 = vpop.eup %5249 }
 0x642   :  { %v5252_v12 = vpop.eup %5251  ;;  %v1616_v40 = vmul.f32 0.5, %v5250_v2  ;;  %v1989_v2 = vld [vmem:[#allocation10 + $0x78] sm:$0xff] }
 0x643   :  { %v1620_v3 = vmul.f32 0.5, %v5252_v12  ;;  %v5254_v48 = vpop.eup %5253 }
 0x644   :  { %v1617_v27 = vadd.f32 0.5, %v1616_v40  ;;  %v5256_v31 = vpop.eup %5255 }
 0x645   :  { %v1621_v55 = vadd.f32 0.5, %v1620_v3  ;;  %v1625_v6 = vmul.f32 0.5, %v5256_v31  ;;  %v1984_v31 = vld [vmem:[#allocation10 + $0x50] sm:$0xff] }
 0x646   :  { %v1628_v54 = vmul.f32 %v5254_v48, %v1617_v27  ;;  %v6105_v27 = vpack.c.bf16 %v1980_v5, %v1976_v4  ;;  %v1982_v48 = vld [vmem:[#allocation10 + $0x40] sm:$0xff] }
 0x647   :  { %v1627_v58 = vmul.f32 %v1621_v55, %v6004_v45  ;;  %v1626_v24 = vadd.f32 0.5, %v1625_v6  ;;  %v1978_v45 = vld [vmem:[#allocation10 + $0x20] sm:$0xff]  ;;  %v1988_v6 = vld [vmem:[#allocation10 + $0x70] sm:$0xff] }
 0x648   :  { %v1986_v55 = vld [vmem:[#allocation10 + $0x60] sm:$0xff] }
 0x649   :  { %v6050_v32 = vadd.f32 %v1628_v54, %v1627_v58  ;;  %v6109_v58 = vpack.c.bf16 %v1987_v39, %v1983_v10  ;;  %v2006_v4 = vld [vmem:[#allocation10 + $0x100] sm:$0xff] }
 0x64a   :  { %v2010_v5 = vld [vmem:[#allocation10 + $0x120] sm:$0xff] }
 0x64b   :  { %5257 = vtanh.f32 %v6050_v32 }
 0x655   :  { %v5258_v22 = vpop.eup %5257 }
 0x656   :  { %v6053_v49 = vmul.f32 %v5258_v22, %v1626_v24  ;;  %v1991_v24 = vld [vmem:[#allocation10 + $0x88] sm:$0xff] }
 0x657   :  { %v1995_v22 = vld [vmem:[#allocation10 + $0xa8] sm:$0xff] }
 0x658   :  { %6735 = vst [vmem:[#allocation17_spill] sm:$0xff] %v6053_v49  ;;  %1703 = vmatmul.mubr.f32.vlgmr.msra.gmra.mrb[12].mxu0 %v6053_v49  ;;  %1774 = vmatmul.mubr.f32.vlgmr.msra.gmra.mrb[12].mxu1 %v6053_v49  ;;  %v2060_v49 = vld [vmem:[#allocation12 + $0xb0] sm:$0xff] }
 0x659   :  { %4360 = vmatpush1.bf16.msra.mxu0 %v5628_v16  ;;  %4392 = vmatpush1.bf16.msra.mxu1 %v5632_v20  ;;  %v1975_v16 = vld [vmem:[#allocation10 + $0x8] sm:$0xff] }
 0x65a   :  { %4362 = vmatprep.subr.bf16.mxu0 %v5634_v21  ;;  %4394 = vmatprep.subr.bf16.mxu1 %v5638_v25  ;;  %v1979_v20 = vld [vmem:[#allocation10 + $0x28] sm:$0xff]  ;;  %v1977_v21 = vld [vmem:[#allocation10 + $0x18] sm:$0xff] }
 0x65b   :  { %1872 = vmatprep.mubr.f32.mxu0 %v6701_v1  ;;  %1943 = vmatprep.mubr.f32.mxu1 %v6701_v1  ;;  %v6089_v25 = vpack.c.bf16 %v1979_v20, %v1975_v16  ;;  %v1993_v16 = vld [vmem:[#allocation10 + $0x98] sm:$0xff] }
 0x65c   :  { %v1997_v20 = vld [vmem:[#allocation10 + $0xb8] sm:$0xff] }
 0x65d   :  { %4364 = vmatpush1.bf16.msra.mxu0 %v5642_v29  ;;  %4396 = vmatpush1.bf16.msra.mxu1 %v5644_v30  ;;  %v1981_v29 = vld [vmem:[#allocation10 + $0x38] sm:$0xff] }
 0x65e   :  { %4366 = vmatprep.subr.bf16.mxu0 %v5647_v34  ;;  %4398 = vmatprep.subr.bf16.mxu1 %v5649_v38  ;;  %v6091_v30 = vpack.c.bf16 %v1981_v29, %v1977_v21  ;;  %v6117_v21 = vpack.c.bf16 %v1986_v55, %v1982_v48  ;;  %v6119_v29 = vpack.c.bf16 %v1988_v6, %v1984_v31  ;;  %v2017_v48 = vld [vmem:[#allocation10 + $0x158] sm:$0xff] }
 0x65f   :  { %v2021_v55 = vld [vmem:[#allocation10 + $0x178] sm:$0xff]  ;;  %v6155_v31 = vpack.c.bf16 %v2010_v5, %v2006_v4 }
 0x660   :  { %v2033_v4 = vld [vmem:[#allocation10 + $0x1d8] sm:$0xff] }
 0x661   :  { %4368 = vmatpush1.bf16.msra.mxu0 %v5652_v42  ;;  %4400 = vmatpush1.bf16.msra.mxu1 %v5656_v46  ;;  %6747 = vst [vmem:[#allocation29_spill] sm:$0xff] %v6155_v31  ;;  %v2037_v5 = vld [vmem:[#allocation10 + $0x1f8] sm:$0xff] }
 0x662   :  { %4370 = vmatprep.subr.bf16.mxu0 %v5658_v47  ;;  %4402 = vmatprep.subr.bf16.mxu1 %v5661_v51 }
 0x665   :  { %4372 = vmatpush1.bf16.msra.mxu0 %v5664_v57  ;;  %4404 = vmatpush1.bf16.msra.mxu1 %v5668_v59 }
 0x666   :  { %4374 = vmatprep.subr.bf16.mxu0 %v5670_v60  ;;  %4406 = vmatprep.subr.bf16.mxu1 %v5673_v0 }
 0x669   :  { %4376 = vmatpush1.bf16.msra.mxu0 %v5679_v13  ;;  %4408 = vmatpush1.bf16.msra.mxu1 %v5684_v15 }
 0x66a   :  { %4378 = vmatprep.subr.bf16.mxu0 %v5686_v17  ;;  %4410 = vmatprep.subr.bf16.mxu1 %v5689_v23 }
 0x66d   :  { %4380 = vmatpush1.bf16.msra.mxu0 %v5695_v33  ;;  %4412 = vmatpush1.bf16.msra.mxu1 %v5700_v35 }
 0x66e   :  { %4382 = vmatprep.subr.bf16.mxu0 %v5702_v36  ;;  %4414 = vmatprep.subr.bf16.mxu1 %v5705_v41 }
 0x671   :  { %4384 = vmatpush1.bf16.msra.mxu0 %v5711_v50  ;;  %4416 = vmatpush1.bf16.msra.mxu1 %v5716_v52 }
 0x672   :  { %4386 = vmatprep.subr.bf16.mxu0 %v5718_v53  ;;  %4418 = vmatprep.subr.bf16.mxu1 %v5721_v56 }
 0x675   :  { %4388 = vmatpush1.bf16.msra.mxu0 %v5724_v62  ;;  %4420 = vmatpush1.bf16.msra.mxu1 %v5728_v63  ;;  %v1974_v63 = vld [vmem:[#allocation10] sm:$0xff] }
 0x676   :  { %4422 = vmatprep.subr.bf16.mxu0 %v6089_v25  ;;  %4454 = vmatprep.subr.bf16.mxu1 %v6091_v30  ;;  %v6103_v3 = vpack.c.bf16 %v1978_v45, %v1974_v63 }
 0x72b   :  { %v1704_v34 = vpop.f32.mrb[12].mxu0  ;;  %v1775_v38 = vpop.f32.mrb[12].mxu1 }
 0x72c   :  { %v5081_v42 = vadd.f32 %v1704_v34, %v5780_v14  ;;  %v1706_v46 = vpop.f32.mrb[13].mxu0  ;;  %v1777_v47 = vpop.f32.mrb[13].mxu1  ;;  %v5089_v60 = vadd.f32 %v1775_v38, %v5790_v26  ;;  %v1990_v34 = vld [vmem:[#allocation10 + $0x80] sm:$0xff] }
 0x72d   :  { %v5082_v51 = vadd.f32 %v1706_v46, %v5785_v19  ;;  %v5090_v0 = vadd.f32 %v1777_v47, %v5797_v44  ;;  %v1994_v38 = vld [vmem:[#allocation10 + $0xa0] sm:$0xff]  ;;  %v6125_v46 = vpack.c.bf16 %v1997_v20, %v1993_v16  ;;  %v1992_v47 = vld [vmem:[#allocation10 + $0x90] sm:$0xff]  ;;  %v6163_v20 = vpack.c.bf16 %v2021_v55, %v2017_v48 }
 0x72e   :  { %v1784_v57 = vmul.f32 0.5, %v5081_v42  ;;  %v6123_v42 = vpack.c.bf16 %v1995_v22, %v1991_v24  ;;  %v2014_v24 = vld [vmem:[#allocation10 + $0x140] sm:$0xff]  ;;  %v6187_v55 = vpack.c.bf16 %v2037_v5, %v2033_v4  ;;  %v2047_v4 = vld [vmem:[#allocation12 + $0x48] sm:$0xff] }
 0x72f   :  { %v1788_v59 = vmul.f32 0.5, %v5082_v51  ;;  %v1793_v13 = vmul.f32 0.5, %v5090_v0  ;;  %6738 = vst [vmem:[#allocation20_spill] sm:$0xff] %v6125_v46  ;;  %v1996_v51 = vld [vmem:[#allocation10 + $0xb0] sm:$0xff]  ;;  %v2005_v0 = vld [vmem:[#allocation10 + $0xf8] sm:$0xff]  ;;  %v2018_v22 = vld [vmem:[#allocation10 + $0x160] sm:$0xff] }
 0x730   :  { %5259 = vtanh.f32 %v1784_v57  ;;  %6737 = vst [vmem:[#allocation19_spill] sm:$0xff] %v6123_v42  ;;  %v1999_v57 = vld [vmem:[#allocation10 + $0xc8] sm:$0xff]  ;;  %6750 = vst [vmem:[#allocation32_spill] sm:$0xff] %v6163_v20 }
 0x731   :  { %5261 = vtanh.f32 %v1788_v59  ;;  %v2003_v59 = vld [vmem:[#allocation10 + $0xe8] sm:$0xff]  ;;  %6758 = vst [vmem:[#allocation40_spill] sm:$0xff] %v6187_v55 }
 0x732   :  { %5263 = vtanh.f32 %v5089_v60  ;;  %v2001_v60 = vld [vmem:[#allocation10 + $0xd8] sm:$0xff]  ;;  %v2051_v5 = vld [vmem:[#allocation12 + $0x68] sm:$0xff] }
 0x733   :  { %5265 = vtanh.f32 %v1793_v13  ;;  %v6131_v13 = vpack.c.bf16 %v1994_v38, %v1990_v34  ;;  %v2016_v34 = vld [vmem:[#allocation10 + $0x150] sm:$0xff] }
 0x734   :  { %v2020_v38 = vld [vmem:[#allocation10 + $0x170] sm:$0xff] }
 0x735   :  { %6739 = vst [vmem:[#allocation21_spill] sm:$0xff] %v6131_v13 }
 0x73a   :  { %v5260_v15 = vpop.eup %5259 }
 0x73b   :  { %v5262_v17 = vpop.eup %5261  ;;  %v1786_v23 = vmul.f32 0.5, %v5260_v15  ;;  %v6133_v15 = vpack.c.bf16 %v1996_v51, %v1992_v47  ;;  %v2023_v47 = vld [vmem:[#allocation10 + $0x188] sm:$0xff] }
 0x73c   :  { %v1790_v33 = vmul.f32 0.5, %v5262_v17  ;;  %v5264_v36 = vpop.eup %5263  ;;  %v1998_v17 = vld [vmem:[#allocation10 + $0xc0] sm:$0xff]  ;;  %v2027_v51 = vld [vmem:[#allocation10 + $0x1a8] sm:$0xff] }
 0x73d   :  { %v1787_v35 = vadd.f32 0.5, %v1786_v23  ;;  %v5266_v56 = vpop.eup %5265  ;;  %6740 = vst [vmem:[#allocation22_spill] sm:$0xff] %v6133_v15  ;;  %v2002_v23 = vld [vmem:[#allocation10 + $0xe0] sm:$0xff] }
 0x73e   :  { %v1791_v41 = vadd.f32 0.5, %v1790_v33  ;;  %v1795_v62 = vmul.f32 0.5, %v5266_v56  ;;  %v6137_v33 = vpack.c.bf16 %v2003_v59, %v1999_v57  ;;  %v2009_v56 = vld [vmem:[#allocation10 + $0x118] sm:$0xff]  ;;  %v6143_v63 = vpack.c.bf16 %v2002_v23, %v1998_v17  ;;  %v2022_v17 = vld [vmem:[#allocation10 + $0x180] sm:$0xff] }
 0x73f   :  { %v1798_v50 = vmul.f32 %v5264_v36, %v1787_v35  ;;  %v6139_v35 = vpack.c.bf16 %v2005_v0, %v2001_v60  ;;  %v2000_v36 = vld [vmem:[#allocation10 + $0xd0] sm:$0xff]  ;;  %v2025_v57 = vld [vmem:[#allocation10 + $0x198] sm:$0xff]  ;;  %v6167_v60 = vpack.c.bf16 %v2018_v22, %v2014_v24  ;;  %v6169_v0 = vpack.c.bf16 %v2020_v38, %v2016_v34  ;;  %v2026_v23 = vld [vmem:[#allocation10 + $0x1a0] sm:$0xff] }
 0x740   :  { %v1797_v52 = vmul.f32 %v1791_v41, %v6050_v32  ;;  %v1796_v12 = vadd.f32 0.5, %v1795_v62  ;;  %v6111_v32 = vpack.c.bf16 %v1989_v2, %v1985_v8  ;;  %6741 = vst [vmem:[#allocation23_spill] sm:$0xff] %v6137_v33  ;;  %v2004_v41 = vld [vmem:[#allocation10 + $0xf0] sm:$0xff]  ;;  %v2013_v62 = vld [vmem:[#allocation10 + $0x138] sm:$0xff]  ;;  %6743 = vst [vmem:[#allocation25_spill] sm:$0xff] %v6143_v63 }
 0x741   :  { %6742 = vst [vmem:[#allocation24_spill] sm:$0xff] %v6139_v35  ;;  %v6145_v45 = vpack.c.bf16 %v2004_v41, %v2000_v36  ;;  %v6151_v39 = vpack.c.bf16 %v2013_v62, %v2009_v56  ;;  %v2008_v8 = vld [vmem:[#allocation10 + $0x110] sm:$0xff]  ;;  %v2029_v59 = vld [vmem:[#allocation10 + $0x1b8] sm:$0xff]  ;;  %6751 = vst [vmem:[#allocation33_spill] sm:$0xff] %v6167_v60  ;;  %v6173_v36 = vpack.c.bf16 %v2027_v51, %v2023_v47 }
 0x742   :  { %v6100_v53 = vadd.f32 %v1798_v50, %v1797_v52  ;;  %v2007_v50 = vld [vmem:[#allocation10 + $0x108] sm:$0xff]  ;;  %v2012_v2 = vld [vmem:[#allocation10 + $0x130] sm:$0xff]  ;;  %6752 = vst [vmem:[#allocation34_spill] sm:$0xff] %v6169_v0  ;;  %v6175_v41 = vpack.c.bf16 %v2029_v59, %v2025_v57  ;;  %v2041_v47 = vld [vmem:[#allocation12 + $0x18] sm:$0xff] }
 0x743   :  { %v2011_v52 = vld [vmem:[#allocation10 + $0x128] sm:$0xff]  ;;  %6744 = vst [vmem:[#allocation26_spill] sm:$0xff] %v6145_v45  ;;  %6746 = vst [vmem:[#allocation28_spill] sm:$0xff] %v6151_v39  ;;  %v6157_v6 = vpack.c.bf16 %v2012_v2, %v2008_v8  ;;  %v6179_v8 = vpack.c.bf16 %v2026_v23, %v2022_v17  ;;  %v2032_v24 = vld [vmem:[#allocation10 + $0x1d0] sm:$0xff] }
 0x744   :  { %5267 = vtanh.f32 %v6100_v53  ;;  %v6149_v10 = vpack.c.bf16 %v2011_v52, %v2007_v50  ;;  %6753 = vst [vmem:[#allocation35_spill] sm:$0xff] %v6173_v36  ;;  %6754 = vst [vmem:[#allocation36_spill] sm:$0xff] %v6175_v41  ;;  %v2024_v50 = vld [vmem:[#allocation10 + $0x190] sm:$0xff]  ;;  %v2031_v56 = vld [vmem:[#allocation10 + $0x1c8] sm:$0xff] }
 0x745   :  { %6748 = vst [vmem:[#allocation30_spill] sm:$0xff] %v6157_v6  ;;  %v2028_v52 = vld [vmem:[#allocation10 + $0x1b0] sm:$0xff]  ;;  %v2035_v62 = vld [vmem:[#allocation10 + $0x1e8] sm:$0xff]  ;;  %6755 = vst [vmem:[#allocation37_spill] sm:$0xff] %v6179_v8 }
 0x746   :  { %6745 = vst [vmem:[#allocation27_spill] sm:$0xff] %v6149_v10  ;;  %v6181_v2 = vpack.c.bf16 %v2028_v52, %v2024_v50  ;;  %v6185_v48 = vpack.c.bf16 %v2035_v62, %v2031_v56  ;;  %v2036_v22 = vld [vmem:[#allocation10 + $0x1f0] sm:$0xff]  ;;  %v2039_v34 = vld [vmem:[#allocation12 + $0x8] sm:$0xff]  ;;  %v2045_v51 = vld [vmem:[#allocation12 + $0x38] sm:$0xff] }
 0x747   :  { %v2043_v38 = vld [vmem:[#allocation12 + $0x28] sm:$0xff]  ;;  %v6193_v59 = vpack.c.bf16 %v2036_v22, %v2032_v24  ;;  %v2038_v17 = vld [vmem:[#allocation12] sm:$0xff]  ;;  %v6199_v50 = vpack.c.bf16 %v2045_v51, %v2041_v47  ;;  %v2040_v56 = vld [vmem:[#allocation12 + $0x10] sm:$0xff]  ;;  %v6209_v47 = vpack.c.bf16 %v2051_v5, %v2047_v4  ;;  %v6211_v51 = vpack.c.bf16 %v2053_v9, %v2049_v11 }
 0x748   :  { %6756 = vst [vmem:[#allocation38_spill] sm:$0xff] %v6181_v2  ;;  %6757 = vst [vmem:[#allocation39_spill] sm:$0xff] %v6185_v48  ;;  %v6197_v23 = vpack.c.bf16 %v2043_v38, %v2039_v34  ;;  %v2042_v52 = vld [vmem:[#allocation12 + $0x20] sm:$0xff]  ;;  %v2044_v62 = vld [vmem:[#allocation12 + $0x30] sm:$0xff]  ;;  %v6761_v5 = vmov 0.0  }
 0x749   :  { %6760 = vst [vmem:[#allocation42_spill] sm:$0xff] %v6193_v59  ;;  %v2046_v24 = vld [vmem:[#allocation12 + $0x40] sm:$0xff]  ;;  %v2048_v34 = vld [vmem:[#allocation12 + $0x50] sm:$0xff] }
 0x74a   :  { %v2050_v22 = vld [vmem:[#allocation12 + $0x60] sm:$0xff]  ;;  %v2052_v38 = vld [vmem:[#allocation12 + $0x70] sm:$0xff] }
 0x74b   :  { %v2054_v4 = vld [vmem:[#allocation12 + $0x80] sm:$0xff]  ;;  %v2056_v11 = vld [vmem:[#allocation12 + $0x90] sm:$0xff] }
 0x74c   :  { %v2058_v9 = vld [vmem:[#allocation12 + $0xa0] sm:$0xff] }
 0x74e   :  { %v5268_v40 = vpop.eup %5267 }
 0x74f   :  { %v6107_v54 = vmul.f32 %v5268_v40, %v1796_v12  ;;  %v2015_v12 = vld [vmem:[#allocation10 + $0x148] sm:$0xff] }
 0x750   :  { %v2019_v40 = vld [vmem:[#allocation10 + $0x168] sm:$0xff] }
 0x751   :  { %6736 = vst [vmem:[#allocation18_spill] sm:$0xff] %v6107_v54  ;;  %1873 = vmatmul.mubr.f32.vlgmr.msra.gmra.mrb[14].mxu0 %v6107_v54  ;;  %1944 = vmatmul.mubr.f32.vlgmr.msra.gmra.mrb[14].mxu1 %v6107_v54  ;;  %v6161_v16 = vpack.c.bf16 %v2019_v40, %v2015_v12  ;;  %v2030_v12 = vld [vmem:[#allocation10 + $0x1c0] sm:$0xff]  ;;  %v6219_v54 = vpack.c.bf16 %v2052_v38, %v2048_v34  ;;  %v2065_v34 = vld [vmem:[#allocation12 + $0xd8] sm:$0xff] }
 0x752   :  { %4424 = vmatpush1.bf16.msra.mxu0 %v6103_v3  ;;  %4456 = vmatpush1.bf16.msra.mxu1 %v6105_v27  ;;  %v2034_v40 = vld [vmem:[#allocation10 + $0x1e0] sm:$0xff]  ;;  %v2069_v38 = vld [vmem:[#allocation12 + $0xf8] sm:$0xff] }
 0x753   :  { %4426 = vmatprep.subr.bf16.mxu0 %v6109_v58  ;;  %4458 = vmatprep.subr.bf16.mxu1 %v6111_v32  ;;  %6749 = vst [vmem:[#allocation31_spill] sm:$0xff] %v6161_v16  ;;  %v6191_v57 = vpack.c.bf16 %v2034_v40, %v2030_v12  ;;  %v6203_v12 = vpack.c.bf16 %v2042_v52, %v2038_v17  ;;  %v2059_v17 = vld [vmem:[#allocation12 + $0xa8] sm:$0xff]  ;;  %v2057_v52 = vld [vmem:[#allocation12 + $0x98] sm:$0xff] }
 0x754   :  { %2192 = vmatprep.mubr.f32.mxu0 %v6701_v1  ;;  %2281 = vmatprep.mubr.f32.mxu1 %v6701_v1  ;;  %v6205_v40 = vpack.c.bf16 %v2044_v62, %v2040_v56  ;;  %v2055_v1 = vld [vmem:[#allocation12 + $0x88] sm:$0xff]  ;;  %v2061_v56 = vld [vmem:[#allocation12 + $0xb8] sm:$0xff]  ;;  %v6217_v62 = vpack.c.bf16 %v2050_v22, %v2046_v24 }
 0x755   :  { %6759 = vst [vmem:[#allocation41_spill] sm:$0xff] %v6191_v57  ;;  %v6227_v18 = vpack.c.bf16 %v2061_v56, %v2057_v52  ;;  %v2063_v24 = vld [vmem:[#allocation12 + $0xc8] sm:$0xff]  ;;  %v2064_v52 = vld [vmem:[#allocation12 + $0xd0] sm:$0xff] }
 0x756   :  { %4428 = vmatpush1.bf16.msra.mxu0 %v6117_v21  ;;  %4460 = vmatpush1.bf16.msra.mxu1 %v6119_v29  ;;  %v2067_v22 = vld [vmem:[#allocation12 + $0xe8] sm:$0xff]  ;;  %v2068_v56 = vld [vmem:[#allocation12 + $0xf0] sm:$0xff] }
 0x757   :  { %4430 = vmatprep.subr.bf16.mxu0 %v6123_v42  ;;  %4462 = vmatprep.subr.bf16.mxu1 %v6125_v46 }
 0x75a   :  { %4432 = vmatpush1.bf16.msra.mxu0 %v6131_v13  ;;  %4464 = vmatpush1.bf16.msra.mxu1 %v6133_v15 }
 0x75b   :  { %4434 = vmatprep.subr.bf16.mxu0 %v6137_v33  ;;  %4466 = vmatprep.subr.bf16.mxu1 %v6139_v35 }
 0x75e   :  { %4436 = vmatpush1.bf16.msra.mxu0 %v6143_v63  ;;  %4468 = vmatpush1.bf16.msra.mxu1 %v6145_v45  ;;  %v2101_v45 = vld [vmem:[#allocation12 + $0x1f8] sm:$0xff] }
 0x75f   :  { %4438 = vmatprep.subr.bf16.mxu0 %v6149_v10  ;;  %4470 = vmatprep.subr.bf16.mxu1 %v6151_v39  ;;  %v2099_v39 = vld [vmem:[#allocation12 + $0x1e8] sm:$0xff]  ;;  %v2097_v10 = vld [vmem:[#allocation12 + $0x1d8] sm:$0xff] }
 0x762   :  { %4440 = vmatpush1.bf16.msra.mxu0 %v6155_v31  ;;  %4472 = vmatpush1.bf16.msra.mxu1 %v6157_v6  ;;  %v2093_v6 = vld [vmem:[#allocation12 + $0x1b8] sm:$0xff]  ;;  %v2095_v31 = vld [vmem:[#allocation12 + $0x1c8] sm:$0xff] }
 0x763   :  { %4442 = vmatprep.subr.bf16.mxu0 %v6161_v16  ;;  %4474 = vmatprep.subr.bf16.mxu1 %v6163_v20  ;;  %v2091_v20 = vld [vmem:[#allocation12 + $0x1a8] sm:$0xff]  ;;  %v2089_v16 = vld [vmem:[#allocation12 + $0x198] sm:$0xff] }
 0x766   :  { %4444 = vmatpush1.bf16.msra.mxu0 %v6167_v60  ;;  %4476 = vmatpush1.bf16.msra.mxu1 %v6169_v0  ;;  %v2080_v0 = vld [vmem:[#allocation12 + $0x150] sm:$0xff]  ;;  %v2087_v60 = vld [vmem:[#allocation12 + $0x188] sm:$0xff] }
 0x767   :  { %4446 = vmatprep.subr.bf16.mxu0 %v6173_v36  ;;  %4478 = vmatprep.subr.bf16.mxu1 %v6175_v41  ;;  %v2079_v41 = vld [vmem:[#allocation12 + $0x148] sm:$0xff] }
 0x76a   :  { %4448 = vmatpush1.bf16.msra.mxu0 %v6179_v8  ;;  %4480 = vmatpush1.bf16.msra.mxu1 %v6181_v2  ;;  %v6251_v2 = vpack.c.bf16 %v2068_v56, %v2064_v52  ;;  %v2070_v8 = vld [vmem:[#allocation12 + $0x100] sm:$0xff]  ;;  %v2085_v52 = vld [vmem:[#allocation12 + $0x178] sm:$0xff] }
 0x76b   :  { %4450 = vmatprep.subr.bf16.mxu0 %v6185_v48  ;;  %4482 = vmatprep.subr.bf16.mxu1 %v6187_v55  ;;  %v6241_v55 = vpack.c.bf16 %v2067_v22, %v2063_v24  ;;  %v6243_v48 = vpack.c.bf16 %v2069_v38, %v2065_v34  ;;  %v2074_v24 = vld [vmem:[#allocation12 + $0x120] sm:$0xff]  ;;  %v2072_v38 = vld [vmem:[#allocation12 + $0x110] sm:$0xff] }
 0x76c   :  { %v6265_v56 = vpack.c.bf16 %v2074_v24, %v2070_v8  ;;  %v2086_v24 = vld [vmem:[#allocation12 + $0x180] sm:$0xff] }
 0x76e   :  { %4452 = vmatpush1.bf16.msra.mxu0 %v6191_v57  ;;  %4484 = vmatpush1.bf16.msra.mxu1 %v6193_v59  ;;  %v6233_v59 = vpack.c.bf16 %v2058_v9, %v2054_v4  ;;  %v6235_v57 = vpack.c.bf16 %v2060_v49, %v2056_v11  ;;  %v2075_v4 = vld [vmem:[#allocation12 + $0x128] sm:$0xff]  ;;  %v2073_v49 = vld [vmem:[#allocation12 + $0x118] sm:$0xff] }
 0x76f   :  { %4486 = vmatprep.subr.bf16.mxu0 %v6197_v23  ;;  %4518 = vmatprep.subr.bf16.mxu1 %v6199_v50  ;;  %v2077_v9 = vld [vmem:[#allocation12 + $0x138] sm:$0xff] }
 0x770   :  { %v6257_v34 = vpack.c.bf16 %v2077_v9, %v2073_v49  ;;  %v2082_v49 = vld [vmem:[#allocation12 + $0x160] sm:$0xff] }
 0x771   :  { %2193 = vmatmul.mubr.f32.vlgmr.msra.gmra.mrb[16].mxu0 %v5803_v37  ;;  %2282 = vmatmul.mubr.f32.vlgmr.msra.gmra.mrb[16].mxu1 %v5803_v37  ;;  %v6225_v37 = vpack.c.bf16 %v2059_v17, %v2055_v1  ;;  %v2062_v1 = vld [vmem:[#allocation12 + $0xc0] sm:$0xff] }
 0x772   :  { %4488 = vmatpush1.bf16.msra.mxu0 %v6203_v12  ;;  %4520 = vmatpush1.bf16.msra.mxu1 %v6205_v40  ;;  %v2066_v17 = vld [vmem:[#allocation12 + $0xe0] sm:$0xff] }
 0x773   :  { %2198 = vmatprep.mubr.f32.mxu0 %v6761_v5  ;;  %2287 = vmatprep.mubr.f32.mxu1 %v6761_v5  ;;  %v6249_v11 = vpack.c.bf16 %v2066_v17, %v2062_v1  ;;  %v2083_v1 = vld [vmem:[#allocation12 + $0x168] sm:$0xff]  ;;  %v2081_v17 = vld [vmem:[#allocation12 + $0x158] sm:$0xff] }
 0x774   :  { %4490 = vmatprep.subr.bf16.mxu0 %v6209_v47  ;;  %4522 = vmatprep.subr.bf16.mxu1 %v6211_v51  ;;  %v6271_v9 = vpack.c.bf16 %v2083_v1, %v2079_v41  ;;  %v6273_v36 = vpack.c.bf16 %v2085_v52, %v2081_v17  ;;  %v6287_v1 = vpack.c.bf16 %v2093_v6, %v2089_v16  ;;  %v2088_v17 = vld [vmem:[#allocation12 + $0x190] sm:$0xff] }
 0x775   :  { %2199 = vmatmul.mubr.f32.gmra.mrb[18].mxu0 %v5849_v61  ;;  %2288 = vmatmul.mubr.f32.gmra.mrb[18].mxu1 %v5849_v61  ;;  %v2071_v61 = vld [vmem:[#allocation12 + $0x108] sm:$0xff]  ;;  %v2092_v52 = vld [vmem:[#allocation12 + $0x1b0] sm:$0xff]  ;;  %v6297_v6 = vpack.c.bf16 %v2099_v39, %v2095_v31  ;;  %v6299_v16 = vpack.c.bf16 %v2101_v45, %v2097_v10 }
 0x776   :  { %4492 = vmatpush1.bf16.msra.mxu0 %v6217_v62  ;;  %4524 = vmatpush1.bf16.msra.mxu1 %v6219_v54  ;;  %v6255_v22 = vpack.c.bf16 %v2075_v4, %v2071_v61  ;;  %v2078_v4 = vld [vmem:[#allocation12 + $0x140] sm:$0xff] }
 0x777   :  { %2204 = vmatprep.mubr.f32.mxu0 %v6761_v5  ;;  %2293 = vmatprep.mubr.f32.mxu1 %v6761_v5  ;;  %v6279_v8 = vpack.c.bf16 %v2082_v49, %v2078_v4  ;;  %v6293_v4 = vpack.c.bf16 %v2092_v52, %v2088_v17  ;;  %v2094_v49 = vld [vmem:[#allocation12 + $0x1c0] sm:$0xff] }
 0x778   :  { %4494 = vmatprep.subr.bf16.mxu0 %v6225_v37  ;;  %4526 = vmatprep.subr.bf16.mxu1 %v6227_v18 }
 0x779   :  { %2205 = vmatmul.mubr.f32.gmra.mrb[20].mxu0 %v5895_v28  ;;  %2294 = vmatmul.mubr.f32.gmra.mrb[20].mxu1 %v5895_v28  ;;  %v2076_v28 = vld [vmem:[#allocation12 + $0x130] sm:$0xff] }
 0x77a   :  { %4496 = vmatpush1.bf16.msra.mxu0 %v6233_v59  ;;  %4528 = vmatpush1.bf16.msra.mxu1 %v6235_v57  ;;  %v6267_v61 = vpack.c.bf16 %v2076_v28, %v2072_v38  ;;  %v2090_v38 = vld [vmem:[#allocation12 + $0x1a0] sm:$0xff]  ;;  %v6285_v28 = vpack.c.bf16 %v2091_v20, %v2087_v60  ;;  %v2096_v60 = vld [vmem:[#allocation12 + $0x1d0] sm:$0xff] }
 0x77b   :  { %2210 = vmatprep.mubr.f32.mxu0 %v6761_v5  ;;  %2299 = vmatprep.mubr.f32.mxu1 %v6761_v5  ;;  %v2098_v20 = vld [vmem:[#allocation12 + $0x1e0] sm:$0xff] }
 0x77c   :  { %4498 = vmatprep.subr.bf16.mxu0 %v6241_v55  ;;  %4530 = vmatprep.subr.bf16.mxu1 %v6243_v48 }
 0x77d   :  { %2211 = vmatmul.mubr.f32.gmra.mrb[22].mxu0 %v5961_v43  ;;  %2300 = vmatmul.mubr.f32.gmra.mrb[22].mxu1 %v5961_v43  ;;  %v2084_v43 = vld [vmem:[#allocation12 + $0x170] sm:$0xff] }
 0x77e   :  { %4500 = vmatpush1.bf16.msra.mxu0 %v6249_v11  ;;  %4532 = vmatpush1.bf16.msra.mxu1 %v6251_v2  ;;  %v6281_v41 = vpack.c.bf16 %v2084_v43, %v2080_v0  ;;  %v6291_v0 = vpack.c.bf16 %v2090_v38, %v2086_v24  ;;  %v2100_v43 = vld [vmem:[#allocation12 + $0x1f0] sm:$0xff]  ;;  %v6303_v24 = vpack.c.bf16 %v2098_v20, %v2094_v49 }
 0x77f   :  { %4502 = vmatprep.subr.bf16.mxu0 %v6255_v22  ;;  %4534 = vmatprep.subr.bf16.mxu1 %v6257_v34  ;;  %v6305_v38 = vpack.c.bf16 %v2100_v43, %v2096_v60 }
 0x780   :  { %2390 = vmatprep.mubr.f32.mxu0 %v6761_v5  ;;  %2461 = vmatprep.mubr.f32.mxu1 %v6761_v5 }
 0x782   :  { %4504 = vmatpush1.bf16.msra.mxu0 %v6265_v56  ;;  %4536 = vmatpush1.bf16.msra.mxu1 %v6267_v61 }
 0x783   :  { %4506 = vmatprep.subr.bf16.mxu0 %v6271_v9  ;;  %4538 = vmatprep.subr.bf16.mxu1 %v6273_v36 }
 0x786   :  { %4508 = vmatpush1.bf16.msra.mxu0 %v6279_v8  ;;  %4540 = vmatpush1.bf16.msra.mxu1 %v6281_v41 }
 0x787   :  { %4510 = vmatprep.subr.bf16.mxu0 %v6285_v28  ;;  %4542 = vmatprep.subr.bf16.mxu1 %v6287_v1 }
 0x78a   :  { %4512 = vmatpush1.bf16.msra.mxu0 %v6291_v0  ;;  %4544 = vmatpush1.bf16.msra.mxu1 %v6293_v4 }
 0x78b   :  { %4514 = vmatprep.subr.bf16.mxu0 %v6297_v6  ;;  %4546 = vmatprep.subr.bf16.mxu1 %v6299_v16 }
 0x78e   :  { %4516 = vmatpush1.bf16.msra.mxu0 %v6303_v24  ;;  %4548 = vmatpush1.bf16.msra.mxu1 %v6305_v38 }
 0x78f   :  { %4550 = vmatprep.subr.bf16.mxu0 %v6197_v23  ;;  %4582 = vmatprep.subr.bf16.mxu1 %v6199_v50 }
 0x791   :  { %2391 = vmatmul.mubr.f32.vlgmr.msra.gmra.mrb[16].mxu0 %v6761_v5  ;;  %2462 = vmatmul.mubr.f32.vlgmr.msra.gmra.mrb[16].mxu1 %v6761_v5 }
 0x792   :  { %4552 = vmatpush1.bf16.msra.mxu0 %v6203_v12  ;;  %4584 = vmatpush1.bf16.msra.mxu1 %v6205_v40 }
 0x793   :  { %4554 = vmatprep.subr.bf16.mxu0 %v6209_v47  ;;  %4586 = vmatprep.subr.bf16.mxu1 %v6211_v51 }
 0x794   :  { %2558 = vmatprep.mubr.f32.mxu0 %v6761_v5  ;;  %2629 = vmatprep.mubr.f32.mxu1 %v6761_v5 }
 0x796   :  { %4556 = vmatpush1.bf16.msra.mxu0 %v6217_v62  ;;  %4588 = vmatpush1.bf16.msra.mxu1 %v6219_v54 }
 0x797   :  { %4558 = vmatprep.subr.bf16.mxu0 %v6225_v37  ;;  %4590 = vmatprep.subr.bf16.mxu1 %v6227_v18 }
 0x79a   :  { %4560 = vmatpush1.bf16.msra.mxu0 %v6233_v59  ;;  %4592 = vmatpush1.bf16.msra.mxu1 %v6235_v57 }
 0x79b   :  { %4562 = vmatprep.subr.bf16.mxu0 %v6241_v55  ;;  %4594 = vmatprep.subr.bf16.mxu1 %v6243_v48 }
 0x79e   :  { %4564 = vmatpush1.bf16.msra.mxu0 %v6249_v11  ;;  %4596 = vmatpush1.bf16.msra.mxu1 %v6251_v2 }
 0x79f   :  { %4566 = vmatprep.subr.bf16.mxu0 %v6255_v22  ;;  %4598 = vmatprep.subr.bf16.mxu1 %v6257_v34 }
 0x7a2   :  { %4568 = vmatpush1.bf16.msra.mxu0 %v6265_v56  ;;  %4600 = vmatpush1.bf16.msra.mxu1 %v6267_v61 }
 0x7a3   :  { %4570 = vmatprep.subr.bf16.mxu0 %v6271_v9  ;;  %4602 = vmatprep.subr.bf16.mxu1 %v6273_v36 }
 0x7a6   :  { %4572 = vmatpush1.bf16.msra.mxu0 %v6279_v8  ;;  %4604 = vmatpush1.bf16.msra.mxu1 %v6281_v41 }
 0x7a7   :  { %4574 = vmatprep.subr.bf16.mxu0 %v6285_v28  ;;  %4606 = vmatprep.subr.bf16.mxu1 %v6287_v1 }
 0x7aa   :  { %4576 = vmatpush1.bf16.msra.mxu0 %v6291_v0  ;;  %4608 = vmatpush1.bf16.msra.mxu1 %v6293_v4 }
 0x7ab   :  { %4578 = vmatprep.subr.bf16.mxu0 %v6297_v6  ;;  %4610 = vmatprep.subr.bf16.mxu1 %v6299_v16 }
 0x7ae   :  { %4580 = vmatpush1.bf16.msra.mxu0 %v6303_v24  ;;  %4612 = vmatpush1.bf16.msra.mxu1 %v6305_v38 }
 0x7af   :  { %4614 = vmatprep.subr.bf16.mxu0 %v6197_v23  ;;  %4646 = vmatprep.subr.bf16.mxu1 %v6199_v50 }
 0x824   :  { %v1874_v45 = vpop.f32.mrb[14].mxu0  ;;  %v1945_v10 = vpop.f32.mrb[14].mxu1 }
 0x825   :  { %v5083_v39 = vadd.f32 %v1874_v45, %v5780_v14  ;;  %v1876_v31 = vpop.f32.mrb[15].mxu0  ;;  %v1947_v17 = vpop.f32.mrb[15].mxu1  ;;  %v5091_v60 = vadd.f32 %v1945_v10, %v5790_v26 }
 0x826   :  { %v5084_v52 = vadd.f32 %v1876_v31, %v5785_v19  ;;  %v5092_v43 = vadd.f32 %v1947_v17, %v5797_v44  ;;  %v2102_v44 = vld [vmem:[%s6693_s6] sm:$0xf] }
 0x827   :  { %v1954_v49 = vmul.f32 0.5, %v5083_v39 }
 0x828   :  { %v1958_v20 = vmul.f32 0.5, %v5084_v52  ;;  %v1963_v63 = vmul.f32 0.5, %v5092_v43 }
 0x829   :  { %5269 = vtanh.f32 %v1954_v49 }
 0x82a   :  { %5271 = vtanh.f32 %v1958_v20 }
 0x82b   :  { %5273 = vtanh.f32 %v5091_v60 }
 0x82c   :  { %5275 = vtanh.f32 %v1963_v63  ;;  %v6765_v63 = vsub.s32 2, %v5771_v7 }
 0x82e   :  { %v6370_v17 = vrot.slane %v2102_v44, %v6765_v63 }
 0x833   :  { %v5270_v35 = vpop.eup %5269 }
 0x834   :  { %v5272_v33 = vpop.eup %5271  ;;  %v1956_v15 = vmul.f32 0.5, %v5270_v35 }
 0x835   :  { %v1960_v13 = vmul.f32 0.5, %v5272_v33  ;;  %v5274_v45 = vpop.eup %5273  ;;  %v6763_v33 = vsub.s32 0, %v5771_v7 }
 0x836   :  { %v1957_v14 = vadd.f32 0.5, %v1956_v15  ;;  %v5276_v31 = vpop.eup %5275 }
 0x837   :  { %v1961_v46 = vadd.f32 0.5, %v1960_v13  ;;  %v1965_v26 = vmul.f32 0.5, %v5276_v31  ;;  %v6361_v15 = vrot.slane %v2102_v44, %v6763_v33  ;;  %v6764_v13 = vsub.s32 1, %v5771_v7 }
 0x838   :  { %v1968_v42 = vmul.f32 %v5274_v45, %v1957_v14 }
 0x839   :  { %v1967_v19 = vmul.f32 %v1961_v46, %v6100_v53  ;;  %v1966_v10 = vadd.f32 0.5, %v1965_v26  ;;  %v6365_v35 = vrot.slane %v2102_v44, %v6764_v13 }
 0x83b   :  { %v1969_v39 = vadd.f32 %v1968_v42, %v1967_v19 }
 0x83d   :  { %5277 = vtanh.f32 %v1969_v39  ;;  %v6766_v39 = vsub.s32 3, %v5771_v7 }
 0x83f   :  { %v6376_v31 = vrot.slane %v2102_v44, %v6766_v39 }
 0x847   :  { %v5278_v52 = vpop.eup %5277 }
 0x848   :  { %v6354_v49 = vmul.f32 %v5278_v52, %v1966_v10 }
 0x84a   :  { %6762 = vst [vmem:[#allocation43_spill] sm:$0xff] %v6354_v49 }
 0x864   :  { %v2392_v53 = vpop.f32.mrb[16].mxu0  ;;  %v2463_v42 = vpop.f32.mrb[16].mxu1 }
 0x865   :  { %v5093_v46 = vadd.f32 %v2392_v53, %v6361_v15  ;;  %v2394_v20 = vpop.f32.mrb[17].mxu0  ;;  %v2465_v60 = vpop.f32.mrb[17].mxu1  ;;  %v5101_v19 = vadd.f32 %v2463_v42, %v6370_v17 }
 0x866   :  { %v5094_v43 = vadd.f32 %v2394_v20, %v6365_v35  ;;  %v5102_v26 = vadd.f32 %v2465_v60, %v6376_v31 }
 0x867   :  { %v2472_v14 = vmul.f32 0.5, %v5093_v46 }
 0x868   :  { %v2476_v45 = vmul.f32 0.5, %v5094_v43  ;;  %v2481_v10 = vmul.f32 0.5, %v5102_v26 }
 0x869   :  { %5279 = vtanh.f32 %v2472_v14 }
 0x86a   :  { %5281 = vtanh.f32 %v2476_v45 }
 0x86b   :  { %5283 = vtanh.f32 %v5101_v19 }
 0x86c   :  { %5285 = vtanh.f32 %v2481_v10 }
 0x873   :  { %v5280_v52 = vpop.eup %5279 }
 0x874   :  { %v5282_v33 = vpop.eup %5281  ;;  %v2474_v13 = vmul.f32 0.5, %v5280_v52 }
 0x875   :  { %v2478_v53 = vmul.f32 0.5, %v5282_v33  ;;  %v5284_v46 = vpop.eup %5283 }
 0x876   :  { %v2475_v63 = vadd.f32 0.5, %v2474_v13  ;;  %v5286_v7 = vpop.eup %5285 }
 0x877   :  { %v2479_v20 = vadd.f32 0.5, %v2478_v53  ;;  %v2483_v44 = vmul.f32 0.5, %v5286_v7 }
 0x878   :  { %v2486_v43 = vmul.f32 %v5284_v46, %v2475_v63 }
 0x879   :  { %v2485_v14 = vmul.f32 0.0, %v2479_v20  ;;  %v2484_v45 = vadd.f32 0.5, %v2483_v44 }
 0x87b   :  { %v6379_v42 = vadd.f32 %v2486_v43, %v2485_v14 }
 0x87d   :  { %5287 = vtanh.f32 %v6379_v42 }
 0x887   :  { %v5288_v19 = vpop.eup %5287 }
 0x888   :  { %v2489_v60 = vmul.f32 %v5288_v19, %v2484_v45 }
 0x88a   :  { %2559 = vmatmul.mubr.f32.vlgmr.msra.gmra.mrb[18].mxu0 %v2489_v60  ;;  %2630 = vmatmul.mubr.f32.vlgmr.msra.gmra.mrb[18].mxu1 %v2489_v60 }
 0x88b   :  { %4616 = vmatpush1.bf16.msra.mxu0 %v6203_v12  ;;  %4648 = vmatpush1.bf16.msra.mxu1 %v6205_v40 }
 0x88c   :  { %4618 = vmatprep.subr.bf16.mxu0 %v6209_v47  ;;  %4650 = vmatprep.subr.bf16.mxu1 %v6211_v51 }
 0x88d   :  { %2726 = vmatprep.mubr.f32.mxu0 %v6761_v5  ;;  %2797 = vmatprep.mubr.f32.mxu1 %v6761_v5 }
 0x88f   :  { %4620 = vmatpush1.bf16.msra.mxu0 %v6217_v62  ;;  %4652 = vmatpush1.bf16.msra.mxu1 %v6219_v54 }
 0x890   :  { %4622 = vmatprep.subr.bf16.mxu0 %v6225_v37  ;;  %4654 = vmatprep.subr.bf16.mxu1 %v6227_v18 }
 0x893   :  { %4624 = vmatpush1.bf16.msra.mxu0 %v6233_v59  ;;  %4656 = vmatpush1.bf16.msra.mxu1 %v6235_v57 }
 0x894   :  { %4626 = vmatprep.subr.bf16.mxu0 %v6241_v55  ;;  %4658 = vmatprep.subr.bf16.mxu1 %v6243_v48 }
 0x897   :  { %4628 = vmatpush1.bf16.msra.mxu0 %v6249_v11  ;;  %4660 = vmatpush1.bf16.msra.mxu1 %v6251_v2 }
 0x898   :  { %4630 = vmatprep.subr.bf16.mxu0 %v6255_v22  ;;  %4662 = vmatprep.subr.bf16.mxu1 %v6257_v34 }
 0x89b   :  { %4632 = vmatpush1.bf16.msra.mxu0 %v6265_v56  ;;  %4664 = vmatpush1.bf16.msra.mxu1 %v6267_v61 }
 0x89c   :  { %4634 = vmatprep.subr.bf16.mxu0 %v6271_v9  ;;  %4666 = vmatprep.subr.bf16.mxu1 %v6273_v36 }
 0x89f   :  { %4636 = vmatpush1.bf16.msra.mxu0 %v6279_v8  ;;  %4668 = vmatpush1.bf16.msra.mxu1 %v6281_v41 }
 0x8a0   :  { %4638 = vmatprep.subr.bf16.mxu0 %v6285_v28  ;;  %4670 = vmatprep.subr.bf16.mxu1 %v6287_v1 }
 0x8a3   :  { %4640 = vmatpush1.bf16.msra.mxu0 %v6291_v0  ;;  %4672 = vmatpush1.bf16.msra.mxu1 %v6293_v4 }
 0x8a4   :  { %4642 = vmatprep.subr.bf16.mxu0 %v6297_v6  ;;  %4674 = vmatprep.subr.bf16.mxu1 %v6299_v16 }
 0x8a7   :  { %4644 = vmatpush1.bf16.msra.mxu0 %v6303_v24  ;;  %4676 = vmatpush1.bf16.msra.mxu1 %v6305_v38 }
 0x8a8   :  { %4678 = vmatprep.subr.bf16.mxu0 %v6197_v23  ;;  %4710 = vmatprep.subr.bf16.mxu1 %v6199_v50 }
 0x95d   :  { %v2560_v39 = vpop.f32.mrb[18].mxu0  ;;  %v2631_v26 = vpop.f32.mrb[18].mxu1 }
 0x95e   :  { %v5095_v10 = vadd.f32 %v2560_v39, %v6361_v15  ;;  %v2562_v52 = vpop.f32.mrb[19].mxu0  ;;  %v2633_v33 = vpop.f32.mrb[19].mxu1  ;;  %v5103_v46 = vadd.f32 %v2631_v26, %v6370_v17 }
 0x95f   :  { %v5096_v13 = vadd.f32 %v2562_v52, %v6365_v35  ;;  %v5104_v20 = vadd.f32 %v2633_v33, %v6376_v31 }
 0x960   :  { %v2640_v53 = vmul.f32 0.5, %v5095_v10 }
 0x961   :  { %v2644_v63 = vmul.f32 0.5, %v5096_v13  ;;  %v2649_v43 = vmul.f32 0.5, %v5104_v20 }
 0x962   :  { %5289 = vtanh.f32 %v2640_v53 }
 0x963   :  { %5291 = vtanh.f32 %v2644_v63 }
 0x964   :  { %5293 = vtanh.f32 %v5103_v46 }
 0x965   :  { %5295 = vtanh.f32 %v2649_v43 }
 0x96c   :  { %v5290_v14 = vpop.eup %5289 }
 0x96d   :  { %v5292_v7 = vpop.eup %5291  ;;  %v2642_v44 = vmul.f32 0.5, %v5290_v14 }
 0x96e   :  { %v2646_v45 = vmul.f32 0.5, %v5292_v7  ;;  %v5294_v60 = vpop.eup %5293 }
 0x96f   :  { %v2643_v19 = vadd.f32 0.5, %v2642_v44  ;;  %v5296_v26 = vpop.eup %5295 }
 0x970   :  { %v2647_v39 = vadd.f32 0.5, %v2646_v45  ;;  %v2651_v13 = vmul.f32 0.5, %v5296_v26 }
 0x971   :  { %v2654_v49 = vmul.f32 %v5294_v60, %v2643_v19 }
 0x972   :  { %v2653_v10 = vmul.f32 %v2647_v39, %v6379_v42  ;;  %v2652_v53 = vadd.f32 0.5, %v2651_v13 }
 0x974   :  { %v6421_v52 = vadd.f32 %v2654_v49, %v2653_v10 }
 0x976   :  { %5297 = vtanh.f32 %v6421_v52 }
 0x980   :  { %v5298_v33 = vpop.eup %5297 }
 0x981   :  { %v2657_v63 = vmul.f32 %v5298_v33, %v2652_v53 }
 0x983   :  { %2727 = vmatmul.mubr.f32.vlgmr.msra.gmra.mrb[20].mxu0 %v2657_v63  ;;  %2798 = vmatmul.mubr.f32.vlgmr.msra.gmra.mrb[20].mxu1 %v2657_v63 }
 0x984   :  { %4680 = vmatpush1.bf16.msra.mxu0 %v6203_v12  ;;  %4712 = vmatpush1.bf16.msra.mxu1 %v6205_v40 }
 0x985   :  { %4682 = vmatprep.subr.bf16.mxu0 %v6209_v47  ;;  %4714 = vmatprep.subr.bf16.mxu1 %v6211_v51 }
 0x986   :  { %2894 = vmatprep.mubr.f32.mxu0 %v6761_v5  ;;  %2965 = vmatprep.mubr.f32.mxu1 %v6761_v5 }
 0x988   :  { %4684 = vmatpush1.bf16.msra.mxu0 %v6217_v62  ;;  %4716 = vmatpush1.bf16.msra.mxu1 %v6219_v54 }
 0x989   :  { %4686 = vmatprep.subr.bf16.mxu0 %v6225_v37  ;;  %4718 = vmatprep.subr.bf16.mxu1 %v6227_v18 }
 0x98c   :  { %4688 = vmatpush1.bf16.msra.mxu0 %v6233_v59  ;;  %4720 = vmatpush1.bf16.msra.mxu1 %v6235_v57 }
 0x98d   :  { %4690 = vmatprep.subr.bf16.mxu0 %v6241_v55  ;;  %4722 = vmatprep.subr.bf16.mxu1 %v6243_v48 }
 0x990   :  { %4692 = vmatpush1.bf16.msra.mxu0 %v6249_v11  ;;  %4724 = vmatpush1.bf16.msra.mxu1 %v6251_v2 }
 0x991   :  { %4694 = vmatprep.subr.bf16.mxu0 %v6255_v22  ;;  %4726 = vmatprep.subr.bf16.mxu1 %v6257_v34 }
 0x994   :  { %4696 = vmatpush1.bf16.msra.mxu0 %v6265_v56  ;;  %4728 = vmatpush1.bf16.msra.mxu1 %v6267_v61 }
 0x995   :  { %4698 = vmatprep.subr.bf16.mxu0 %v6271_v9  ;;  %4730 = vmatprep.subr.bf16.mxu1 %v6273_v36 }
 0x998   :  { %4700 = vmatpush1.bf16.msra.mxu0 %v6279_v8  ;;  %4732 = vmatpush1.bf16.msra.mxu1 %v6281_v41 }
 0x999   :  { %4702 = vmatprep.subr.bf16.mxu0 %v6285_v28  ;;  %4734 = vmatprep.subr.bf16.mxu1 %v6287_v1 }
 0x99c   :  { %4704 = vmatpush1.bf16.msra.mxu0 %v6291_v0  ;;  %4736 = vmatpush1.bf16.msra.mxu1 %v6293_v4 }
 0x99d   :  { %4706 = vmatprep.subr.bf16.mxu0 %v6297_v6  ;;  %4738 = vmatprep.subr.bf16.mxu1 %v6299_v16 }
 0x9a0   :  { %4708 = vmatpush1.bf16.msra.mxu0 %v6303_v24  ;;  %4740 = vmatpush1.bf16.msra.mxu1 %v6305_v38 }
 0x9a1   :  { %4742 = vmatprep.subr.bf16.mxu0 %v6089_v25  ;;  %4774 = vmatprep.subr.bf16.mxu1 %v6091_v30 }
 0xa56   :  { %v2728_v49 = vpop.f32.mrb[20].mxu0  ;;  %v2799_v42 = vpop.f32.mrb[20].mxu1 }
 0xa57   :  { %v5097_v46 = vadd.f32 %v2728_v49, %v6361_v15  ;;  %v2730_v20 = vpop.f32.mrb[21].mxu0  ;;  %v2801_v43 = vpop.f32.mrb[21].mxu1  ;;  %v5105_v45 = vadd.f32 %v2799_v42, %v6370_v17 }
 0xa58   :  { %v5098_v14 = vadd.f32 %v2730_v20, %v6365_v35  ;;  %v5106_v19 = vadd.f32 %v2801_v43, %v6376_v31 }
 0xa59   :  { %v2808_v7 = vmul.f32 0.5, %v5097_v46 }
 0xa5a   :  { %v2812_v44 = vmul.f32 0.5, %v5098_v14  ;;  %v2817_v25 = vmul.f32 0.5, %v5106_v19  ;;  %v6775_v19 = vld [vmem:[#allocation27_spill] sm:$0xff] }
 0xa5b   :  { %5299 = vtanh.f32 %v2808_v7  ;;  %v6768_v7 = vld [vmem:[#allocation20_spill] sm:$0xff] }
 0xa5c   :  { %5301 = vtanh.f32 %v2812_v44  ;;  %v6769_v44 = vld [vmem:[#allocation21_spill] sm:$0xff] }
 0xa5d   :  { %5303 = vtanh.f32 %v5105_v45  ;;  %v6774_v45 = vld [vmem:[#allocation26_spill] sm:$0xff] }
 0xa5e   :  { %5305 = vtanh.f32 %v2817_v25  ;;  %v6778_v25 = vld [vmem:[#allocation30_spill] sm:$0xff] }
 0xa65   :  { %v5300_v60 = vpop.eup %5299 }
 0xa66   :  { %v5302_v30 = vpop.eup %5301  ;;  %v2810_v39 = vmul.f32 0.5, %v5300_v60  ;;  %v6779_v60 = vld [vmem:[#allocation31_spill] sm:$0xff] }
 0xa67   :  { %v2814_v10 = vmul.f32 0.5, %v5302_v30  ;;  %v5304_v13 = vpop.eup %5303  ;;  %v6780_v30 = vld [vmem:[#allocation32_spill] sm:$0xff] }
 0xa68   :  { %v2811_v26 = vadd.f32 0.5, %v2810_v39  ;;  %v5306_v42 = vpop.eup %5305  ;;  %v6781_v39 = vld [vmem:[#allocation33_spill] sm:$0xff] }
 0xa69   :  { %v2815_v53 = vadd.f32 0.5, %v2814_v10  ;;  %v2819_v46 = vmul.f32 0.5, %v5306_v42  ;;  %v6782_v10 = vld [vmem:[#allocation34_spill] sm:$0xff]  ;;  %v6788_v42 = vld [vmem:[#allocation40_spill] sm:$0xff] }
 0xa6a   :  { %v2822_v33 = vmul.f32 %v5304_v13, %v2811_v26  ;;  %v6783_v26 = vld [vmem:[#allocation35_spill] sm:$0xff]  ;;  %v6784_v13 = vld [vmem:[#allocation36_spill] sm:$0xff] }
 0xa6b   :  { %v2821_v63 = vmul.f32 %v2815_v53, %v6421_v52  ;;  %v2820_v20 = vadd.f32 0.5, %v2819_v46  ;;  %v6767_v52 = vld [vmem:[#allocation19_spill] sm:$0xff]  ;;  %v6785_v53 = vld [vmem:[#allocation37_spill] sm:$0xff] }
 0xa6c   :  { %v6789_v46 = vld [vmem:[#allocation41_spill] sm:$0xff] }
 0xa6d   :  { %v6463_v49 = vadd.f32 %v2822_v33, %v2821_v63  ;;  %v6786_v33 = vld [vmem:[#allocation38_spill] sm:$0xff]  ;;  %v6787_v63 = vld [vmem:[#allocation39_spill] sm:$0xff] }
 0xa6f   :  { %5307 = vtanh.f32 %v6463_v49 }
 0xa79   :  { %v5308_v43 = vpop.eup %5307 }
 0xa7a   :  { %v2825_v14 = vmul.f32 %v5308_v43, %v2820_v20  ;;  %v6790_v20 = vld [vmem:[#allocation42_spill] sm:$0xff]  ;;  %v6791_v43 = vld [vmem:[#allocation16_spill] sm:$0xff] }
 0xa7c   :  { %2895 = vmatmul.mubr.f32.vlgmr.msra.gmra.mrb[22].mxu0 %v2825_v14  ;;  %2966 = vmatmul.mubr.f32.vlgmr.msra.gmra.mrb[22].mxu1 %v2825_v14  ;;  %v6792_v14 = vld [vmem:[#allocation17_spill] sm:$0xff] }
 0xa7d   :  { %4744 = vmatpush1.bf16.msra.mxu0 %v6103_v3  ;;  %4776 = vmatpush1.bf16.msra.mxu1 %v6105_v27  ;;  %v6770_v3 = vld [vmem:[#allocation22_spill] sm:$0xff]  ;;  %v6771_v27 = vld [vmem:[#allocation23_spill] sm:$0xff] }
 0xa7e   :  { %4746 = vmatprep.subr.bf16.mxu0 %v6109_v58  ;;  %4778 = vmatprep.subr.bf16.mxu1 %v6111_v32  ;;  %v6772_v58 = vld [vmem:[#allocation24_spill] sm:$0xff]  ;;  %v6773_v32 = vld [vmem:[#allocation25_spill] sm:$0xff] }
 0xa7f   :  { %3062 = vmatprep.mubr.f32.mxu0 %v6761_v5  ;;  %3151 = vmatprep.mubr.f32.mxu1 %v6761_v5 }
 0xa81   :  { %4748 = vmatpush1.bf16.msra.mxu0 %v6117_v21  ;;  %4780 = vmatpush1.bf16.msra.mxu1 %v6119_v29  ;;  %v6776_v21 = vld [vmem:[#allocation28_spill] sm:$0xff]  ;;  %v6777_v29 = vld [vmem:[#allocation29_spill] sm:$0xff] }
 0xa82   :  { %4750 = vmatprep.subr.bf16.mxu0 %v6767_v52  ;;  %4782 = vmatprep.subr.bf16.mxu1 %v6768_v7  ;;  %v6793_v52 = vld [vmem:[#allocation18_spill] sm:$0xff]  ;;  %v6794_v7 = vld [vmem:[#allocation43_spill] sm:$0xff] }
 0xa85   :  { %4752 = vmatpush1.bf16.msra.mxu0 %v6769_v44  ;;  %4784 = vmatpush1.bf16.msra.mxu1 %v6770_v3 }
 0xa86   :  { %4754 = vmatprep.subr.bf16.mxu0 %v6771_v27  ;;  %4786 = vmatprep.subr.bf16.mxu1 %v6772_v58 }
 0xa89   :  { %4756 = vmatpush1.bf16.msra.mxu0 %v6773_v32  ;;  %4788 = vmatpush1.bf16.msra.mxu1 %v6774_v45 }
 0xa8a   :  { %4758 = vmatprep.subr.bf16.mxu0 %v6775_v19  ;;  %4790 = vmatprep.subr.bf16.mxu1 %v6776_v21 }
 0xa8d   :  { %4760 = vmatpush1.bf16.msra.mxu0 %v6777_v29  ;;  %4792 = vmatpush1.bf16.msra.mxu1 %v6778_v25 }
 0xa8e   :  { %4762 = vmatprep.subr.bf16.mxu0 %v6779_v60  ;;  %4794 = vmatprep.subr.bf16.mxu1 %v6780_v30 }
 0xa91   :  { %4764 = vmatpush1.bf16.msra.mxu0 %v6781_v39  ;;  %4796 = vmatpush1.bf16.msra.mxu1 %v6782_v10 }
 0xa92   :  { %4766 = vmatprep.subr.bf16.mxu0 %v6783_v26  ;;  %4798 = vmatprep.subr.bf16.mxu1 %v6784_v13 }
 0xa95   :  { %4768 = vmatpush1.bf16.msra.mxu0 %v6785_v53  ;;  %4800 = vmatpush1.bf16.msra.mxu1 %v6786_v33 }
 0xa96   :  { %4770 = vmatprep.subr.bf16.mxu0 %v6787_v63  ;;  %4802 = vmatprep.subr.bf16.mxu1 %v6788_v42 }
 0xa99   :  { %4772 = vmatpush1.bf16.msra.mxu0 %v6789_v46  ;;  %4804 = vmatpush1.bf16.msra.mxu1 %v6790_v20 }
 0xa9a   :  { %4806 = vmatprep.subr.bf16.mxu0 %v6197_v23  ;;  %4838 = vmatprep.subr.bf16.mxu1 %v6199_v50 }
 0xa9c   :  { %3063 = vmatmul.mubr.f32.vlgmr.msra.gmra.mrb[24].mxu0 %v6791_v43  ;;  %3152 = vmatmul.mubr.f32.vlgmr.msra.gmra.mrb[24].mxu1 %v6791_v43 }
 0xa9d   :  { %3068 = vmatprep.mubr.f32.mxu0 %v6761_v5  ;;  %3157 = vmatprep.mubr.f32.mxu1 %v6761_v5 }
 0xa9e   :  { %4808 = vmatpush1.bf16.msra.mxu0 %v6203_v12  ;;  %4840 = vmatpush1.bf16.msra.mxu1 %v6205_v40 }
 0xa9f   :  { %4810 = vmatprep.subr.bf16.mxu0 %v6209_v47  ;;  %4842 = vmatprep.subr.bf16.mxu1 %v6211_v51 }
 0xaa0   :  { %3069 = vmatmul.mubr.f32.gmra.mrb[26].mxu0 %v6792_v14  ;;  %3158 = vmatmul.mubr.f32.gmra.mrb[26].mxu1 %v6792_v14 }
 0xaa1   :  { %3074 = vmatprep.mubr.f32.mxu0 %v6761_v5  ;;  %3163 = vmatprep.mubr.f32.mxu1 %v6761_v5 }
 0xaa2   :  { %4812 = vmatpush1.bf16.msra.mxu0 %v6217_v62  ;;  %4844 = vmatpush1.bf16.msra.mxu1 %v6219_v54 }
 0xaa3   :  { %4814 = vmatprep.subr.bf16.mxu0 %v6225_v37  ;;  %4846 = vmatprep.subr.bf16.mxu1 %v6227_v18 }
 0xaa4   :  { %3075 = vmatmul.mubr.f32.gmra.mrb[28].mxu0 %v6793_v52  ;;  %3164 = vmatmul.mubr.f32.gmra.mrb[28].mxu1 %v6793_v52 }
 0xaa5   :  { %3080 = vmatprep.mubr.f32.mxu0 %v6761_v5  ;;  %3169 = vmatprep.mubr.f32.mxu1 %v6761_v5 }
 0xaa6   :  { %4816 = vmatpush1.bf16.msra.mxu0 %v6233_v59  ;;  %4848 = vmatpush1.bf16.msra.mxu1 %v6235_v57 }
 0xaa7   :  { %4818 = vmatprep.subr.bf16.mxu0 %v6241_v55  ;;  %4850 = vmatprep.subr.bf16.mxu1 %v6243_v48 }
 0xaa8   :  { %3081 = vmatmul.mubr.f32.gmra.mrb[30].mxu0 %v6794_v7  ;;  %3170 = vmatmul.mubr.f32.gmra.mrb[30].mxu1 %v6794_v7 }
 0xaa9   :  { %3260 = vmatprep.mubr.f32.mxu0 %v6761_v5  ;;  %3331 = vmatprep.mubr.f32.mxu1 %v6761_v5 }
 0xaaa   :  { %4820 = vmatpush1.bf16.msra.mxu0 %v6249_v11  ;;  %4852 = vmatpush1.bf16.msra.mxu1 %v6251_v2 }
 0xaab   :  { %4822 = vmatprep.subr.bf16.mxu0 %v6255_v22  ;;  %4854 = vmatprep.subr.bf16.mxu1 %v6257_v34 }
 0xaae   :  { %4824 = vmatpush1.bf16.msra.mxu0 %v6265_v56  ;;  %4856 = vmatpush1.bf16.msra.mxu1 %v6267_v61 }
 0xaaf   :  { %4826 = vmatprep.subr.bf16.mxu0 %v6271_v9  ;;  %4858 = vmatprep.subr.bf16.mxu1 %v6273_v36 }
 0xab2   :  { %4828 = vmatpush1.bf16.msra.mxu0 %v6279_v8  ;;  %4860 = vmatpush1.bf16.msra.mxu1 %v6281_v41 }
 0xab3   :  { %4830 = vmatprep.subr.bf16.mxu0 %v6285_v28  ;;  %4862 = vmatprep.subr.bf16.mxu1 %v6287_v1 }
 0xab6   :  { %4832 = vmatpush1.bf16.msra.mxu0 %v6291_v0  ;;  %4864 = vmatpush1.bf16.msra.mxu1 %v6293_v4 }
 0xab7   :  { %4834 = vmatprep.subr.bf16.mxu0 %v6297_v6  ;;  %4866 = vmatprep.subr.bf16.mxu1 %v6299_v16 }
 0xaba   :  { %4836 = vmatpush1.bf16.msra.mxu0 %v6303_v24  ;;  %4868 = vmatpush1.bf16.msra.mxu1 %v6305_v38 }
 0xabb   :  { %4870 = vmatprep.subr.bf16.mxu0 %v6197_v23  ;;  %4902 = vmatprep.subr.bf16.mxu1 %v6199_v50 }
 0xb4f   :  { %v2896_v44 = vpop.f32.mrb[22].mxu0  ;;  %v2967_v3 = vpop.f32.mrb[22].mxu1 }
 0xb50   :  { %v5099_v27 = vadd.f32 %v2896_v44, %v6361_v15  ;;  %v2898_v58 = vpop.f32.mrb[23].mxu0  ;;  %v2969_v32 = vpop.f32.mrb[23].mxu1  ;;  %v5107_v29 = vadd.f32 %v2967_v3, %v6370_v17 }
 0xb51   :  { %v5100_v45 = vadd.f32 %v2898_v58, %v6365_v35  ;;  %v5108_v25 = vadd.f32 %v2969_v32, %v6376_v31 }
 0xb52   :  { %v2976_v19 = vmul.f32 0.5, %v5099_v27 }
 0xb53   :  { %v2980_v21 = vmul.f32 0.5, %v5100_v45  ;;  %v2985_v60 = vmul.f32 0.5, %v5108_v25 }
 0xb54   :  { %5309 = vtanh.f32 %v2976_v19 }
 0xb55   :  { %5311 = vtanh.f32 %v2980_v21 }
 0xb56   :  { %5313 = vtanh.f32 %v5107_v29 }
 0xb57   :  { %5315 = vtanh.f32 %v2985_v60 }
 0xb5e   :  { %v5310_v30 = vpop.eup %5309 }
 0xb5f   :  { %v5312_v39 = vpop.eup %5311  ;;  %v2978_v10 = vmul.f32 0.5, %v5310_v30 }
 0xb60   :  { %v2982_v26 = vmul.f32 0.5, %v5312_v39  ;;  %v5314_v53 = vpop.eup %5313 }
 0xb61   :  { %v2979_v13 = vadd.f32 0.5, %v2978_v10  ;;  %v5316_v20 = vpop.eup %5315 }
 0xb62   :  { %v2983_v33 = vadd.f32 0.5, %v2982_v26  ;;  %v2987_v43 = vmul.f32 0.5, %v5316_v20 }
 0xb63   :  { %v2990_v63 = vmul.f32 %v5314_v53, %v2979_v13 }
 0xb64   :  { %v2989_v42 = vmul.f32 %v2983_v33, %v6463_v49  ;;  %v2988_v14 = vadd.f32 0.5, %v2987_v43 }
 0xb66   :  { %v6553_v46 = vadd.f32 %v2990_v63, %v2989_v42 }
 0xb68   :  { %5317 = vtanh.f32 %v6553_v46 }
 0xb72   :  { %v5318_v52 = vpop.eup %5317 }
 0xb73   :  { %v2993_v7 = vmul.f32 %v5318_v52, %v2988_v14 }
 0xb75   :  { %3261 = vmatmul.mubr.f32.vlgmr.msra.gmra.mrb[24].mxu0 %v2993_v7  ;;  %3332 = vmatmul.mubr.f32.vlgmr.msra.gmra.mrb[24].mxu1 %v2993_v7 }
 0xb76   :  { %4872 = vmatpush1.bf16.msra.mxu0 %v6203_v12  ;;  %4904 = vmatpush1.bf16.msra.mxu1 %v6205_v40 }
 0xb77   :  { %4874 = vmatprep.subr.bf16.mxu0 %v6209_v47  ;;  %4906 = vmatprep.subr.bf16.mxu1 %v6211_v51 }
 0xb78   :  { %3428 = vmatprep.mubr.f32.mxu0 %v6761_v5  ;;  %3499 = vmatprep.mubr.f32.mxu1 %v6761_v5 }
 0xb7a   :  { %4876 = vmatpush1.bf16.msra.mxu0 %v6217_v62  ;;  %4908 = vmatpush1.bf16.msra.mxu1 %v6219_v54 }
 0xb7b   :  { %4878 = vmatprep.subr.bf16.mxu0 %v6225_v37  ;;  %4910 = vmatprep.subr.bf16.mxu1 %v6227_v18 }
 0xb7e   :  { %4880 = vmatpush1.bf16.msra.mxu0 %v6233_v59  ;;  %4912 = vmatpush1.bf16.msra.mxu1 %v6235_v57 }
 0xb7f   :  { %4882 = vmatprep.subr.bf16.mxu0 %v6241_v55  ;;  %4914 = vmatprep.subr.bf16.mxu1 %v6243_v48 }
 0xb82   :  { %4884 = vmatpush1.bf16.msra.mxu0 %v6249_v11  ;;  %4916 = vmatpush1.bf16.msra.mxu1 %v6251_v2 }
 0xb83   :  { %4886 = vmatprep.subr.bf16.mxu0 %v6255_v22  ;;  %4918 = vmatprep.subr.bf16.mxu1 %v6257_v34 }
 0xb86   :  { %4888 = vmatpush1.bf16.msra.mxu0 %v6265_v56  ;;  %4920 = vmatpush1.bf16.msra.mxu1 %v6267_v61 }
 0xb87   :  { %4890 = vmatprep.subr.bf16.mxu0 %v6271_v9  ;;  %4922 = vmatprep.subr.bf16.mxu1 %v6273_v36 }
 0xb8a   :  { %4892 = vmatpush1.bf16.msra.mxu0 %v6279_v8  ;;  %4924 = vmatpush1.bf16.msra.mxu1 %v6281_v41 }
 0xb8b   :  { %4894 = vmatprep.subr.bf16.mxu0 %v6285_v28  ;;  %4926 = vmatprep.subr.bf16.mxu1 %v6287_v1 }
 0xb8e   :  { %4896 = vmatpush1.bf16.msra.mxu0 %v6291_v0  ;;  %4928 = vmatpush1.bf16.msra.mxu1 %v6293_v4 }
 0xb8f   :  { %4898 = vmatprep.subr.bf16.mxu0 %v6297_v6  ;;  %4930 = vmatprep.subr.bf16.mxu1 %v6299_v16 }
 0xb92   :  { %4900 = vmatpush1.bf16.msra.mxu0 %v6303_v24  ;;  %4932 = vmatpush1.bf16.msra.mxu1 %v6305_v38 }
 0xb93   :  { %4934 = vmatprep.subr.bf16.mxu0 %v6197_v23  ;;  %4966 = vmatprep.subr.bf16.mxu1 %v6199_v50 }
 0xc48   :  { %v3262_v49 = vpop.f32.mrb[24].mxu0  ;;  %v3333_v44 = vpop.f32.mrb[24].mxu1 }
 0xc49   :  { %v5109_v3 = vadd.f32 %v3262_v49, %v6361_v15  ;;  %v3264_v27 = vpop.f32.mrb[25].mxu0  ;;  %v3335_v58 = vpop.f32.mrb[25].mxu1  ;;  %v5117_v21 = vadd.f32 %v3333_v44, %v6370_v17 }
 0xc4a   :  { %v5110_v32 = vadd.f32 %v3264_v27, %v6365_v35  ;;  %v5118_v29 = vadd.f32 %v3335_v58, %v6376_v31 }
 0xc4b   :  { %v3342_v45 = vmul.f32 0.5, %v5109_v3 }
 0xc4c   :  { %v3346_v19 = vmul.f32 0.5, %v5110_v32  ;;  %v3351_v25 = vmul.f32 0.5, %v5118_v29 }
 0xc4d   :  { %5319 = vtanh.f32 %v3342_v45 }
 0xc4e   :  { %5321 = vtanh.f32 %v3346_v19 }
 0xc4f   :  { %5323 = vtanh.f32 %v5117_v21 }
 0xc50   :  { %5325 = vtanh.f32 %v3351_v25 }
 0xc57   :  { %v5320_v60 = vpop.eup %5319 }
 0xc58   :  { %v5322_v30 = vpop.eup %5321  ;;  %v3344_v39 = vmul.f32 0.5, %v5320_v60 }
 0xc59   :  { %v3348_v10 = vmul.f32 0.5, %v5322_v30  ;;  %v5324_v13 = vpop.eup %5323 }
 0xc5a   :  { %v3345_v26 = vadd.f32 0.5, %v3344_v39  ;;  %v5326_v20 = vpop.eup %5325 }
 0xc5b   :  { %v3349_v53 = vadd.f32 0.5, %v3348_v10  ;;  %v3353_v43 = vmul.f32 0.5, %v5326_v20 }
 0xc5c   :  { %v3356_v33 = vmul.f32 %v5324_v13, %v3345_v26 }
 0xc5d   :  { %v3355_v63 = vmul.f32 %v3349_v53, %v6553_v46  ;;  %v3354_v14 = vadd.f32 0.5, %v3353_v43 }
 0xc5f   :  { %v6595_v42 = vadd.f32 %v3356_v33, %v3355_v63 }
 0xc61   :  { %5327 = vtanh.f32 %v6595_v42 }
 0xc6b   :  { %v5328_v52 = vpop.eup %5327 }
 0xc6c   :  { %v3359_v7 = vmul.f32 %v5328_v52, %v3354_v14 }
 0xc6e   :  { %3429 = vmatmul.mubr.f32.vlgmr.msra.gmra.mrb[26].mxu0 %v3359_v7  ;;  %3500 = vmatmul.mubr.f32.vlgmr.msra.gmra.mrb[26].mxu1 %v3359_v7 }
 0xc6f   :  { %4936 = vmatpush1.bf16.msra.mxu0 %v6203_v12  ;;  %4968 = vmatpush1.bf16.msra.mxu1 %v6205_v40 }
 0xc70   :  { %4938 = vmatprep.subr.bf16.mxu0 %v6209_v47  ;;  %4970 = vmatprep.subr.bf16.mxu1 %v6211_v51 }
 0xc71   :  { %3596 = vmatprep.mubr.f32.mxu0 %v6761_v5  ;;  %3667 = vmatprep.mubr.f32.mxu1 %v6761_v5 }
 0xc73   :  { %4940 = vmatpush1.bf16.msra.mxu0 %v6217_v62  ;;  %4972 = vmatpush1.bf16.msra.mxu1 %v6219_v54 }
 0xc74   :  { %4942 = vmatprep.subr.bf16.mxu0 %v6225_v37  ;;  %4974 = vmatprep.subr.bf16.mxu1 %v6227_v18 }
 0xc77   :  { %4944 = vmatpush1.bf16.msra.mxu0 %v6233_v59  ;;  %4976 = vmatpush1.bf16.msra.mxu1 %v6235_v57 }
 0xc78   :  { %4946 = vmatprep.subr.bf16.mxu0 %v6241_v55  ;;  %4978 = vmatprep.subr.bf16.mxu1 %v6243_v48 }
 0xc7b   :  { %4948 = vmatpush1.bf16.msra.mxu0 %v6249_v11  ;;  %4980 = vmatpush1.bf16.msra.mxu1 %v6251_v2 }
 0xc7c   :  { %4950 = vmatprep.subr.bf16.mxu0 %v6255_v22  ;;  %4982 = vmatprep.subr.bf16.mxu1 %v6257_v34 }
 0xc7f   :  { %4952 = vmatpush1.bf16.msra.mxu0 %v6265_v56  ;;  %4984 = vmatpush1.bf16.msra.mxu1 %v6267_v61 }
 0xc80   :  { %4954 = vmatprep.subr.bf16.mxu0 %v6271_v9  ;;  %4986 = vmatprep.subr.bf16.mxu1 %v6273_v36 }
 0xc83   :  { %4956 = vmatpush1.bf16.msra.mxu0 %v6279_v8  ;;  %4988 = vmatpush1.bf16.msra.mxu1 %v6281_v41 }
 0xc84   :  { %4958 = vmatprep.subr.bf16.mxu0 %v6285_v28  ;;  %4990 = vmatprep.subr.bf16.mxu1 %v6287_v1 }
 0xc87   :  { %4960 = vmatpush1.bf16.msra.mxu0 %v6291_v0  ;;  %4992 = vmatpush1.bf16.msra.mxu1 %v6293_v4 }
 0xc88   :  { %4962 = vmatprep.subr.bf16.mxu0 %v6297_v6  ;;  %4994 = vmatprep.subr.bf16.mxu1 %v6299_v16 }
 0xc8b   :  { %4964 = vmatpush1.bf16.msra.mxu0 %v6303_v24  ;;  %4996 = vmatpush1.bf16.msra.mxu1 %v6305_v38 }
 0xc8c   :  { %4998 = vmatprep.subr.bf16.mxu0 %v6197_v23  ;;  %5030 = vmatprep.subr.bf16.mxu1 %v6199_v50 }
 0xd41   :  { %v3430_v46 = vpop.f32.mrb[26].mxu0  ;;  %v3501_v49 = vpop.f32.mrb[26].mxu1 }
 0xd42   :  { %v5111_v44 = vadd.f32 %v3430_v46, %v6361_v15  ;;  %v3432_v3 = vpop.f32.mrb[27].mxu0  ;;  %v3503_v27 = vpop.f32.mrb[27].mxu1  ;;  %v5119_v19 = vadd.f32 %v3501_v49, %v6370_v17 }
 0xd43   :  { %v5112_v58 = vadd.f32 %v3432_v3, %v6365_v35  ;;  %v5120_v21 = vadd.f32 %v3503_v27, %v6376_v31 }
 0xd44   :  { %v3510_v32 = vmul.f32 0.5, %v5111_v44 }
 0xd45   :  { %v3514_v45 = vmul.f32 0.5, %v5112_v58  ;;  %v3519_v23 = vmul.f32 0.5, %v5120_v21 }
 0xd46   :  { %5329 = vtanh.f32 %v3510_v32 }
 0xd47   :  { %5331 = vtanh.f32 %v3514_v45 }
 0xd48   :  { %5333 = vtanh.f32 %v5119_v19 }
 0xd49   :  { %5335 = vtanh.f32 %v3519_v23 }
 0xd50   :  { %v5330_v29 = vpop.eup %5329 }
 0xd51   :  { %v5332_v50 = vpop.eup %5331  ;;  %v3512_v25 = vmul.f32 0.5, %v5330_v29 }
 0xd52   :  { %v3516_v60 = vmul.f32 0.5, %v5332_v50  ;;  %v5334_v39 = vpop.eup %5333 }
 0xd53   :  { %v3513_v30 = vadd.f32 0.5, %v3512_v25  ;;  %v5336_v33 = vpop.eup %5335 }
 0xd54   :  { %v3517_v10 = vadd.f32 0.5, %v3516_v60  ;;  %v3521_v63 = vmul.f32 0.5, %v5336_v33 }
 0xd55   :  { %v3524_v26 = vmul.f32 %v5334_v39, %v3513_v30  ;;  %v3908_v39 = vld [vmem:[#allocation4] ss:$0 sm:$0xff] }
 0xd56   :  { %v3523_v13 = vmul.f32 %v3517_v10, %v6595_v42  ;;  %v3522_v20 = vadd.f32 0.5, %v3521_v63 }
 0xd58   :  { %v6637_v53 = vadd.f32 %v3524_v26, %v3523_v13 }
 0xd5a   :  { %5337 = vtanh.f32 %v6637_v53 }
 0xd64   :  { %v5338_v43 = vpop.eup %5337 }
 0xd65   :  { %v3527_v14 = vmul.f32 %v5338_v43, %v3522_v20 }
 0xd67   :  { %3597 = vmatmul.mubr.f32.vlgmr.msra.gmra.mrb[28].mxu0 %v3527_v14  ;;  %3668 = vmatmul.mubr.f32.vlgmr.msra.gmra.mrb[28].mxu1 %v3527_v14 }
 0xd68   :  { %5000 = vmatpush1.bf16.msra.mxu0 %v6203_v12  ;;  %5032 = vmatpush1.bf16.msra.mxu1 %v6205_v40 }
 0xd69   :  { %5002 = vmatprep.subr.bf16.mxu0 %v6209_v47  ;;  %5034 = vmatprep.subr.bf16.mxu1 %v6211_v51 }
 0xd6a   :  { %3764 = vmatprep.mubr.f32.mxu0 %v6761_v5  ;;  %3835 = vmatprep.mubr.f32.mxu1 %v6761_v5 }
 0xd6c   :  { %5004 = vmatpush1.bf16.msra.mxu0 %v6217_v62  ;;  %5036 = vmatpush1.bf16.msra.mxu1 %v6219_v54 }
 0xd6d   :  { %5006 = vmatprep.subr.bf16.mxu0 %v6225_v37  ;;  %5038 = vmatprep.subr.bf16.mxu1 %v6227_v18 }
 0xd70   :  { %5008 = vmatpush1.bf16.msra.mxu0 %v6233_v59  ;;  %5040 = vmatpush1.bf16.msra.mxu1 %v6235_v57 }
 0xd71   :  { %5010 = vmatprep.subr.bf16.mxu0 %v6241_v55  ;;  %5042 = vmatprep.subr.bf16.mxu1 %v6243_v48 }
 0xd74   :  { %5012 = vmatpush1.bf16.msra.mxu0 %v6249_v11  ;;  %5044 = vmatpush1.bf16.msra.mxu1 %v6251_v2 }
 0xd75   :  { %5014 = vmatprep.subr.bf16.mxu0 %v6255_v22  ;;  %5046 = vmatprep.subr.bf16.mxu1 %v6257_v34 }
 0xd78   :  { %5016 = vmatpush1.bf16.msra.mxu0 %v6265_v56  ;;  %5048 = vmatpush1.bf16.msra.mxu1 %v6267_v61 }
 0xd79   :  { %5018 = vmatprep.subr.bf16.mxu0 %v6271_v9  ;;  %5050 = vmatprep.subr.bf16.mxu1 %v6273_v36 }
 0xd7c   :  { %5020 = vmatpush1.bf16.msra.mxu0 %v6279_v8  ;;  %5052 = vmatpush1.bf16.msra.mxu1 %v6281_v41 }
 0xd7d   :  { %5022 = vmatprep.subr.bf16.mxu0 %v6285_v28  ;;  %5054 = vmatprep.subr.bf16.mxu1 %v6287_v1 }
 0xd80   :  { %5024 = vmatpush1.bf16.msra.mxu0 %v6291_v0  ;;  %5056 = vmatpush1.bf16.msra.mxu1 %v6293_v4 }
 0xd81   :  { %5026 = vmatprep.subr.bf16.mxu0 %v6297_v6  ;;  %5058 = vmatprep.subr.bf16.mxu1 %v6299_v16 }
 0xd84   :  { %5028 = vmatpush1.bf16.msra.mxu0 %v6303_v24  ;;  %5060 = vmatpush1.bf16.msra.mxu1 %v6305_v38 }
 0xe3a   :  { %v3598_v18 = vpop.f32.mrb[28].mxu0  ;;  %v3669_v54 = vpop.f32.mrb[28].mxu1 }
 0xe3b   :  { %v5113_v36 = vadd.f32 %v3598_v18, %v6361_v15  ;;  %v3600_v2 = vpop.f32.mrb[29].mxu0  ;;  %v3671_v48 = vpop.f32.mrb[29].mxu1  ;;  %v5121_v12 = vadd.f32 %v3669_v54, %v6370_v17 }
 0xe3c   :  { %v5114_v55 = vadd.f32 %v3600_v2, %v6365_v35  ;;  %v5122_v40 = vadd.f32 %v3671_v48, %v6376_v31 }
 0xe3d   :  { %v3678_v57 = vmul.f32 0.5, %v5113_v36 }
 0xe3e   :  { %v3682_v59 = vmul.f32 0.5, %v5114_v55  ;;  %v3687_v47 = vmul.f32 0.5, %v5122_v40 }
 0xe3f   :  { %5339 = vtanh.f32 %v3678_v57 }
 0xe40   :  { %5341 = vtanh.f32 %v3682_v59 }
 0xe41   :  { %5343 = vtanh.f32 %v5121_v12 }
 0xe42   :  { %5345 = vtanh.f32 %v3687_v47 }
 0xe49   :  { %v5340_v51 = vpop.eup %5339 }
 0xe4a   :  { %v5342_v62 = vpop.eup %5341  ;;  %v3680_v5 = vmul.f32 0.5, %v5340_v51 }
 0xe4b   :  { %v3684_v37 = vmul.f32 0.5, %v5342_v62  ;;  %v5344_v22 = vpop.eup %5343 }
 0xe4c   :  { %v3681_v11 = vadd.f32 0.5, %v3680_v5  ;;  %v5346_v8 = vpop.eup %5345 }
 0xe4d   :  { %v3685_v34 = vadd.f32 0.5, %v3684_v37  ;;  %v3689_v41 = vmul.f32 0.5, %v5346_v8 }
 0xe4e   :  { %v3692_v56 = vmul.f32 %v5344_v22, %v3681_v11 }
 0xe4f   :  { %v3691_v61 = vmul.f32 %v3685_v34, %v6637_v53  ;;  %v3690_v28 = vadd.f32 0.5, %v3689_v41 }
 0xe51   :  { %v3693_v9 = vadd.f32 %v3692_v56, %v3691_v61 }
 0xe53   :  { %5347 = vtanh.f32 %v3693_v9 }
 0xe5d   :  { %v5348_v1 = vpop.eup %5347 }
 0xe5e   :  { %v3695_v0 = vmul.f32 %v5348_v1, %v3690_v28 }
 0xe60   :  { %3765 = vmatmul.mubr.f32.vlgmr.msra.gmra.mrb[30].mxu0 %v3695_v0  ;;  %3836 = vmatmul.mubr.f32.vlgmr.msra.gmra.mrb[30].mxu1 %v3695_v0 }
 0xf33   :  { %v3766_v4 = vpop.f32.mrb[30].mxu0  ;;  %v3837_v6 = vpop.f32.mrb[30].mxu1 }
 0xf34   :  { %v5115_v16 = vadd.f32 %v3766_v4, %v6361_v15  ;;  %v3768_v24 = vpop.f32.mrb[31].mxu0  ;;  %v3839_v38 = vpop.f32.mrb[31].mxu1  ;;  %v5123_v46 = vadd.f32 %v3837_v6, %v6370_v17 }
 0xf35   :  { %v5116_v42 = vadd.f32 %v3768_v24, %v6365_v35  ;;  %v5124_v49 = vadd.f32 %v3839_v38, %v6376_v31  ;;  %v3907_v31 = vld [vmem:[%s6694_s7] ss:$0 sm:$0xff] }
 0xf36   :  { %v3846_v52 = vmul.f32 0.5, %v5115_v16 }
 0xf37   :  { %v3850_v7 = vmul.f32 0.5, %v5116_v42  ;;  %v3855_v44 = vmul.f32 0.5, %v5124_v49 }
 0xf38   :  { %5349 = vtanh.f32 %v3846_v52 }
 0xf39   :  { %5351 = vtanh.f32 %v3850_v7 }
 0xf3a   :  { %5353 = vtanh.f32 %v5123_v46 }
 0xf3b   :  { %5355 = vtanh.f32 %v3855_v44 }
 0xf42   :  { %v5350_v3 = vpop.eup %5349 }
 0xf43   :  { %v5352_v27 = vpop.eup %5351  ;;  %v3848_v58 = vmul.f32 0.5, %v5350_v3 }
 0xf44   :  { %v3852_v32 = vmul.f32 0.5, %v5352_v27  ;;  %v5354_v45 = vpop.eup %5353 }
 0xf45   :  { %v3849_v15 = vadd.f32 0.5, %v3848_v58  ;;  %v5356_v29 = vpop.eup %5355 }
 0xf46   :  { %v3853_v19 = vadd.f32 0.5, %v3852_v32  ;;  %v3857_v50 = vmul.f32 0.5, %v5356_v29 }
 0xf47   :  { %v3860_v21 = vmul.f32 %v5354_v45, %v3849_v15 }
 0xf48   :  { %v3859_v35 = vmul.f32 %v3853_v19, %v3693_v9  ;;  %v3858_v17 = vadd.f32 0.5, %v3857_v50 }
 0xf4a   :  { %v3861_v23 = vadd.f32 %v3860_v21, %v3859_v35 }
 0xf4c   :  { %5357 = vtanh.f32 %v3861_v23 }
 0xf56   :  { %v5358_v25 = vpop.eup %5357 }
 0xf57   :  { %v3863_v60 = vmul.f32 %v5358_v25, %v3858_v17 }
 0xf59   :  { %v3871_v30 = vmul.f32 %v3907_v31, %v3863_v60 }
 0xf5b   :  { %3872 = vadd.xlane.f32.xlu0 %v3871_v30 }
 0xfe8   :  { %v3873_v10 = vpop.xlane.xlu0 %3872 }
 0xfe9   :  { %v3881_v26 = vadd.f32 %v3908_v39, %v3873_v10 }
 0xfeb   :  { %3883 = vst.msk [vmem:[%s6696_s9] sm:$0xff] %vm3882_vm1, %v3881_v26 }
 0xfec   :  { %3888 = vsyncpa [#allocation6], 1 }
 0xfed   :  { %3889 = vsyncpa [#allocation8], 1 }
 0xfee   :  { %3890 = vsyncpa [#allocation11], 1 }

</bundles_post_ra>
